<compile_context>
chip_gen: v7x
topology: tpu7x:2x2x1
jax: 0.10.0
libtpu: 0.0.40
codegen_flags: <defaults>
</compile_context>

<pallas_src>
import functools

import jax
import jax.numpy as jnp
from jax.experimental import pallas as pl
from jax.experimental.pallas import tpu as pltpu


def _round_up(x, m):
    return ((x + m - 1) // m) * m


def _pick_time_chunk(seq_len, cap=128):
    """Largest divisor of seq_len that is <= cap (seq_len itself if small)."""
    if seq_len <= cap:
        return seq_len
    for t in range(cap, 0, -1):
        if seq_len % t == 0:
            return t
    return seq_len


# --------------------------- fused multi-layer GRU kernel ---------------------------
def _make_gru_stack_kernel(num_layers, t_chunk, b_pad, h_pad):
    h3 = 3 * h_pad

    def kernel(*refs):
        x_ref = refs[0]                                   # (T, B_pad, In)   layer-0 input chunk
        w_refs = refs[1:1 + 4 * num_layers]               # per layer: wih, whh, bgi, bhn
        out_ref = refs[1 + 4 * num_layers]                # (T, B_pad, H_pad)
        scratch = refs[2 + 4 * num_layers:]
        gi_scr = scratch[0]                               # (T, B_pad, 3H_pad) f32, reused per layer
        if num_layers > 1:
            buf = scratch[1]                              # (T, B_pad, H_pad) f32, inter-layer acts
            h_scrs = scratch[2:]
        else:
            buf = None
            h_scrs = scratch[1:]                          # per-layer (B_pad, H_pad) hidden state

        c = pl.program_id(0)

        @pl.when(c == 0)
        def _init():
            for l in range(num_layers):
                h_scrs[l][...] = jnp.zeros_like(h_scrs[l])

        for l in range(num_layers):
            wih = w_refs[4 * l][...]       # (in_l, 3H_pad), compute dtype (pre-transposed)
            whh = w_refs[4 * l + 1][...]   # (H_pad, 3H_pad), compute dtype (pre-transposed)
            bgi = w_refs[4 * l + 2][...]   # (1, 3H_pad) f32 : [b_ir+b_hr | b_iz+b_hz | b_in]
            bhn = w_refs[4 * l + 3][...]   # (1, H_pad)  f32 : b_hn (must stay inside r*(...))
            cdt = wih.dtype
            last = (l == num_layers - 1)

            # ---- dense input projection for the whole chunk (hoisted out of the recurrence) ----
            xin = x_ref[...] if l == 0 else buf[...]
            in_dim = xin.shape[-1]
            x2 = xin.reshape(t_chunk * b_pad, in_dim).astype(cdt)
            gi = jnp.dot(x2, wih, preferred_element_type=jnp.float32) + bgi
            gi_scr[...] = gi.reshape(t_chunk, b_pad, h3)

            # ---------------------------- sequential recurrence ----------------------------
            def step(t, h_prev):
                gi_t = gi_scr[t]                                       # (B_pad, 3H_pad) f32
                gh = jnp.dot(h_prev.astype(cdt), whh,
                             preferred_element_type=jnp.float32)       # (B_pad, 3H_pad) f32
                r = jax.nn.sigmoid(gi_t[:, :h_pad] + gh[:, :h_pad])
                z = jax.nn.sigmoid(gi_t[:, h_pad:2 * h_pad] + gh[:, h_pad:2 * h_pad])
                n = jnp.tanh(gi_t[:, 2 * h_pad:] + r * (gh[:, 2 * h_pad:] + bhn))
                h_new = (1.0 - z) * n + z * h_prev
                if last:
                    out_ref[t] = h_new.astype(out_ref.dtype)
                else:
                    buf[t] = h_new
                return h_new

            unroll = True if t_chunk <= 16 else 4
            h_last = jax.lax.fori_loop(0, t_chunk, step, h_scrs[l][...], unroll=unroll)
            h_scrs[l][...] = h_last

    return kernel


# ------------------------------- host-side weight prep -------------------------------
def _prep_w(w, in_pad, h_pad, dtype):
    """(3H, In) PyTorch-layout weight -> (in_pad, 3*h_pad), gates r|z|n along columns, zero pad."""
    three_h, in_sz = w.shape
    h = three_h // 3
    w = w.reshape(3, h, in_sz)
    w = jnp.pad(w, ((0, 0), (0, h_pad - h), (0, in_pad - in_sz)))
    return jnp.transpose(w, (2, 0, 1)).reshape(in_pad, 3 * h_pad).astype(dtype)


def _prep_biases(b_ih, b_hh, h_pad):
    h = b_ih.shape[0] // 3

    def pad_gate(v):
        return jnp.pad(v, (0, h_pad - h))

    b_r = pad_gate(b_ih[0:h] + b_hh[0:h])            # r/z bias pairs pre-added (host side)
    b_z = pad_gate(b_ih[h:2 * h] + b_hh[h:2 * h])
    b_in = pad_gate(b_ih[2 * h:3 * h])
    b_hn = pad_gate(b_hh[2 * h:3 * h])
    bgi = jnp.concatenate([b_r, b_z, b_in]).reshape(1, 3 * h_pad).astype(jnp.float32)
    bhn = b_hn.reshape(1, h_pad).astype(jnp.float32)
    return bgi, bhn


# ------------------------------------ public forward ------------------------------------
@functools.partial(jax.jit, static_argnames=("num_layers", "compute_dtype", "t_chunk"))
def rnn_net_forward(x_bsf, params, num_layers, compute_dtype=jnp.float32, t_chunk=None):
    """Equivalent of RnnNet.forward (eval): (B, S, input) -> (B, S, hidden)."""
    B, S, In = x_bsf.shape
    H = params[0][1].shape[1]                       # w_hh: (3H, H)
    b_pad = _round_up(max(B, 8), 8)                 # sublane multiple
    h_pad = _round_up(H, 128)                       # lane multiple -> lane-dense gates & outputs
    tc = _pick_time_chunk(S) if t_chunk is None else t_chunk
    num_chunks = S // tc
    assert num_chunks * tc == S

    # time-major, batch padded to the sublane multiple
    x = jnp.transpose(x_bsf, (1, 0, 2)).astype(compute_dtype)
    x = jnp.pad(x, ((0, 0), (0, b_pad - B), (0, 0)))

    flat_params = []
    in_specs = [pl.BlockSpec((tc, b_pad, In), lambda c: (c, 0, 0))]
    for l in range(num_layers):
        w_ih, w_hh, b_ih, b_hh = params[l]
        in_l = In if l == 0 else h_pad
        flat_params.append(_prep_w(w_ih, in_l, h_pad, compute_dtype))
        flat_params.append(_prep_w(w_hh, h_pad, h_pad, compute_dtype))
        bgi, bhn = _prep_biases(b_ih, b_hh, h_pad)
        flat_params.append(bgi)
        flat_params.append(bhn)
        in_specs += [
            pl.BlockSpec((in_l, 3 * h_pad), lambda c: (0, 0)),
            pl.BlockSpec((h_pad, 3 * h_pad), lambda c: (0, 0)),
            pl.BlockSpec((1, 3 * h_pad), lambda c: (0, 0)),
            pl.BlockSpec((1, h_pad), lambda c: (0, 0)),
        ]

    scratch_shapes = [pltpu.VMEM((tc, b_pad, 3 * h_pad), jnp.float32)]   # per-chunk gi
    if num_layers > 1:
        scratch_shapes.append(pltpu.VMEM((tc, b_pad, h_pad), jnp.float32))  # inter-layer acts
    scratch_shapes += [pltpu.VMEM((b_pad, h_pad), jnp.float32) for _ in range(num_layers)]

    kernel = _make_gru_stack_kernel(num_layers, tc, b_pad, h_pad)

    out = pl.pallas_call(
        kernel,
        out_shape=jax.ShapeDtypeStruct((S, b_pad, h_pad), jnp.float32),
        grid_spec=pltpu.PrefetchScalarGridSpec(
            num_scalar_prefetch=0,
            grid=(num_chunks,),
            in_specs=in_specs,
            out_specs=pl.BlockSpec((tc, b_pad, h_pad), lambda c: (c, 0, 0)),
            scratch_shapes=scratch_shapes,
        ),
        compiler_params=pltpu.CompilerParams(
            dimension_semantics=("arbitrary",)),     # recurrence carries state -> sequential
    )(x, *flat_params)

    return jnp.transpose(out[:, :B, :H], (1, 0, 2))


# ---------------- pure-JAX reference (for correctness check) -----------------
def gru_layer_ref(x_sbf, w_ih, w_hh, b_ih, b_hh):
    S, B, _ = x_sbf.shape
    H = w_hh.shape[1]

    def step(h_prev, x_t):
        gi = x_t @ w_ih.T + b_ih
        gh = h_prev @ w_hh.T + b_hh
        i_r, i_z, i_n = jnp.split(gi, 3, axis=-1)
        h_r, h_z, h_n = jnp.split(gh, 3, axis=-1)
        r = jax.nn.sigmoid(i_r + h_r)
        z = jax.nn.sigmoid(i_z + h_z)
        n = jnp.tanh(i_n + r * h_n)
        h_new = (1.0 - z) * n + z * h_prev
        return h_new, h_new

    h0 = jnp.zeros((B, H), jnp.float32)
    _, ys = jax.lax.scan(step, h0, x_sbf)
    return ys


def rnn_net_ref(x_bsf, params, num_layers):
    h = jnp.transpose(x_bsf, (1, 0, 2))
    for layer in range(num_layers):
        h = gru_layer_ref(h, *params[layer])
    return jnp.transpose(h, (1, 0, 2))


# ---------------------------- parameter init --------------------------------
def init_gru_params(key, input_size, hidden_size, num_layers):
    """Deterministic init matching nn.GRU shapes: U(-1/sqrt(H), 1/sqrt(H))."""
    stdv = 1.0 / jnp.sqrt(hidden_size)
    params = []
    for layer in range(num_layers):
        in_sz = input_size if layer == 0 else hidden_size
        key, k1, k2, k3, k4 = jax.random.split(key, 5)
        w_ih = jax.random.uniform(k1, (3 * hidden_size, in_sz), jnp.float32, -stdv, stdv)
        w_hh = jax.random.uniform(k2, (3 * hidden_size, hidden_size), jnp.float32, -stdv, stdv)
        b_ih = jax.random.uniform(k3, (3 * hidden_size,), jnp.float32, -stdv, stdv)
        b_hh = jax.random.uniform(k4, (3 * hidden_size,), jnp.float32, -stdv, stdv)
        params.append((w_ih, w_hh, b_ih, b_hh))
    return params


if __name__ == "__main__":
    # Shapes consistent with RnnNet(input_size=16, hidden_size=32, num_layers=2)
    batch, seq, input_size, hidden_size, num_layers = 2, 8, 16, 32, 2

    key = jax.random.PRNGKey(0)
    key, kx = jax.random.split(key)
    x = jax.random.normal(kx, (batch, seq, input_size), jnp.float32)
    params = init_gru_params(key, input_size, hidden_size, num_layers)

    ref = rnn_net_ref(x, params, num_layers)

    # f32 MXU operands: tight check against pure-JAX reference.
    out = rnn_net_forward(x, params, num_layers=num_layers)
    out = jax.block_until_ready(out)
    assert out.shape == (batch, seq, hidden_size), out.shape
    err = float(jnp.max(jnp.abs(out - ref)))
    assert jnp.allclose(out, ref, atol=1e-4, rtol=1e-4), err

    # bf16 MXU operands (fast path on v6e/v7x), f32 gate math & accumulation: loose check.
    out_bf16 = rnn_net_forward(x, params, num_layers=num_layers, compute_dtype=jnp.bfloat16)
    out_bf16 = jax.block_until_ready(out_bf16)
    err_bf16 = float(jnp.max(jnp.abs(out_bf16 - ref)))
    assert err_bf16 < 0.1, err_bf16

    print("KERNEL_OK")
</pallas_src>

<mosaic_0001>
module attributes {stable_mosaic.version = 11 : i64} {
  func.func @kernel(%arg0: i32, %arg1: memref<8x8x16xf32, #tpu.memory_space<vmem>>, %arg2: memref<16x384xf32, #tpu.memory_space<vmem>>, %arg3: memref<128x384xf32, #tpu.memory_space<vmem>>, %arg4: memref<1x384xf32, #tpu.memory_space<vmem>>, %arg5: memref<1x128xf32, #tpu.memory_space<vmem>>, %arg6: memref<128x384xf32, #tpu.memory_space<vmem>>, %arg7: memref<128x384xf32, #tpu.memory_space<vmem>>, %arg8: memref<1x384xf32, #tpu.memory_space<vmem>>, %arg9: memref<1x128xf32, #tpu.memory_space<vmem>>, %arg10: memref<8x8x128xf32, #tpu.memory_space<vmem>>, %arg11: memref<8x8x384xf32, #tpu.memory_space<vmem>>, %arg12: memref<8x8x128xf32, #tpu.memory_space<vmem>>, %arg13: memref<8x128xf32, #tpu.memory_space<vmem>>, %arg14: memref<8x128xf32, #tpu.memory_space<vmem>>) attributes {dimension_semantics = [#tpu.dimension_semantics<arbitrary>], iteration_bounds = array<i64: 1>, scalar_prefetch = 0 : i64, scratch_operands = 4 : i64, tpu.core_type = #tpu.core_type<tc>, window_params = [{transform_indices = @transform_0, window_bounds = array<i64: 8, 8, 16>}, {pipeline_mode = #tpu.pipeline_mode<synchronous>, transform_indices = @transform_1, window_bounds = array<i64: 16, 384>}, {pipeline_mode = #tpu.pipeline_mode<synchronous>, transform_indices = @transform_2, window_bounds = array<i64: 128, 384>}, {pipeline_mode = #tpu.pipeline_mode<synchronous>, transform_indices = @transform_3, window_bounds = array<i64: 1, 384>}, {pipeline_mode = #tpu.pipeline_mode<synchronous>, transform_indices = @transform_4, window_bounds = array<i64: 1, 128>}, {pipeline_mode = #tpu.pipeline_mode<synchronous>, transform_indices = @transform_5, window_bounds = array<i64: 128, 384>}, {pipeline_mode = #tpu.pipeline_mode<synchronous>, transform_indices = @transform_6, window_bounds = array<i64: 128, 384>}, {pipeline_mode = #tpu.pipeline_mode<synchronous>, transform_indices = @transform_7, window_bounds = array<i64: 1, 384>}, {pipeline_mode = #tpu.pipeline_mode<synchronous>, transform_indices = @transform_8, window_bounds = array<i64: 1, 128>}, {transform_indices = @transform_9, window_bounds = array<i64: 8, 8, 128>}]} {
    %c0_i32 = arith.constant 0 : i32
    %0 = arith.cmpi eq, %arg0, %c0_i32 : i32
    %1 = arith.extui %0 : i1 to i32
    %c0_i32_0 = arith.constant 0 : i32
    %2 = arith.cmpi ne, %1, %c0_i32_0 : i32
    scf.if %2 {
      %cst_175 = arith.constant 0.000000e+00 : f32
      %605 = vector.broadcast %cst_175 : f32 to vector<8x128xf32>
      %c0_176 = arith.constant 0 : index
      %c0_177 = arith.constant 0 : index
      %606 = vector.load %arg13[%c0_176, %c0_177] : memref<8x128xf32, #tpu.memory_space<vmem>>, vector<8x128xf32>
      tpu.vector_store %arg13[%c0_176, %c0_177], %605 {strides = array<i32>} : memref<8x128xf32, #tpu.memory_space<vmem>>, vector<8x128xf32>,
      %cst_178 = arith.constant 0.000000e+00 : f32
      %607 = vector.broadcast %cst_178 : f32 to vector<8x128xf32>
      %c0_179 = arith.constant 0 : index
      %c0_180 = arith.constant 0 : index
      %608 = vector.load %arg14[%c0_179, %c0_180] : memref<8x128xf32, #tpu.memory_space<vmem>>, vector<8x128xf32>
      tpu.vector_store %arg14[%c0_179, %c0_180], %607 {strides = array<i32>} : memref<8x128xf32, #tpu.memory_space<vmem>>, vector<8x128xf32>,
    } else {
    }
    %c0 = arith.constant 0 : index
    %c0_1 = arith.constant 0 : index
    %3 = vector.load %arg2[%c0, %c0_1] : memref<16x384xf32, #tpu.memory_space<vmem>>, vector<16x384xf32>
    %c0_2 = arith.constant 0 : index
    %c0_3 = arith.constant 0 : index
    %4 = vector.load %arg3[%c0_2, %c0_3] : memref<128x384xf32, #tpu.memory_space<vmem>>, vector<128x384xf32>
    %c0_4 = arith.constant 0 : index
    %c0_5 = arith.constant 0 : index
    %5 = vector.load %arg4[%c0_4, %c0_5] : memref<1x384xf32, #tpu.memory_space<vmem>>, vector<1x384xf32>
    %c0_6 = arith.constant 0 : index
    %c0_7 = arith.constant 0 : index
    %6 = vector.load %arg5[%c0_6, %c0_7] : memref<1x128xf32, #tpu.memory_space<vmem>>, vector<1x128xf32>
    %c0_8 = arith.constant 0 : index
    %c0_9 = arith.constant 0 : index
    %c0_10 = arith.constant 0 : index
    %7 = vector.load %arg1[%c0_8, %c0_9, %c0_10] : memref<8x8x16xf32, #tpu.memory_space<vmem>>, vector<8x8x16xf32>
    %8 = vector.shape_cast %7 : vector<8x8x16xf32> to vector<64x16xf32>
    %cst = arith.constant dense<0.000000e+00> : vector<64x384xf32>
    %9 = tpu.matmul %8, %3, %cst {dimension_numbers = #tpu.dot_dimension_numbers<[1], [0], [0], [1], [0, 0, 1, 1], [], []>} : vector<64x16xf32>, vector<16x384xf32>, vector<64x384xf32> -> vector<64x384xf32>
    %10 = vector.broadcast %5 : vector<1x384xf32> to vector<64x384xf32>
    %11 = arith.addf %9, %10 : vector<64x384xf32>
    %12 = vector.shape_cast %11 : vector<64x384xf32> to vector<8x8x384xf32>
    %c0_11 = arith.constant 0 : index
    %c0_12 = arith.constant 0 : index
    %c0_13 = arith.constant 0 : index
    %13 = vector.load %arg11[%c0_11, %c0_12, %c0_13] : memref<8x8x384xf32, #tpu.memory_space<vmem>>, vector<8x8x384xf32>
    tpu.vector_store %arg11[%c0_11, %c0_12, %c0_13], %12 {strides = array<i32>} : memref<8x8x384xf32, #tpu.memory_space<vmem>>, vector<8x8x384xf32>,
    %c0_14 = arith.constant 0 : index
    %c0_15 = arith.constant 0 : index
    %14 = vector.load %arg13[%c0_14, %c0_15] : memref<8x128xf32, #tpu.memory_space<vmem>>, vector<8x128xf32>
    %c0_i32_16 = arith.constant 0 : i32
    %15 = arith.index_cast %c0_i32_16 : i32 to index
    %c0_17 = arith.constant 0 : index
    %c0_18 = arith.constant 0 : index
    %16 = vector.load %arg11[%15, %c0_17, %c0_18] : memref<8x8x384xf32, #tpu.memory_space<vmem>>, vector<1x8x384xf32>
    %17 = vector.shape_cast %16 : vector<1x8x384xf32> to vector<8x384xf32>
    %cst_19 = arith.constant dense<0.000000e+00> : vector<8x384xf32>
    %18 = tpu.matmul %14, %4, %cst_19 {dimension_numbers = #tpu.dot_dimension_numbers<[1], [0], [0], [1], [0, 0, 1, 1], [], []>} : vector<8x128xf32>, vector<128x384xf32>, vector<8x384xf32> -> vector<8x384xf32>
    %19 = vector.extract_strided_slice %17 {offsets = [0, 0], sizes = [8, 128], strides = [1, 1]} : vector<8x384xf32> to vector<8x128xf32>
    %20 = vector.extract_strided_slice %18 {offsets = [0, 0], sizes = [8, 128], strides = [1, 1]} : vector<8x384xf32> to vector<8x128xf32>
    %21 = arith.addf %19, %20 : vector<8x128xf32>
    %22 = arith.negf %21 : vector<8x128xf32>
    %23 = math.exp %22 : vector<8x128xf32>
    %cst_20 = arith.constant 1.000000e+00 : f32
    %24 = vector.broadcast %cst_20 : f32 to vector<8x128xf32>
    %25 = arith.addf %24, %23 : vector<8x128xf32>
    %26 = arith.divf %24, %25 : vector<8x128xf32>
    %27 = vector.extract_strided_slice %17 {offsets = [0, 128], sizes = [8, 128], strides = [1, 1]} : vector<8x384xf32> to vector<8x128xf32>
    %28 = vector.extract_strided_slice %18 {offsets = [0, 128], sizes = [8, 128], strides = [1, 1]} : vector<8x384xf32> to vector<8x128xf32>
    %29 = arith.addf %27, %28 : vector<8x128xf32>
    %30 = arith.negf %29 : vector<8x128xf32>
    %31 = math.exp %30 : vector<8x128xf32>
    %cst_21 = arith.constant 1.000000e+00 : f32
    %32 = vector.broadcast %cst_21 : f32 to vector<8x128xf32>
    %33 = arith.addf %32, %31 : vector<8x128xf32>
    %34 = arith.divf %32, %33 : vector<8x128xf32>
    %35 = vector.extract_strided_slice %17 {offsets = [0, 256], sizes = [8, 128], strides = [1, 1]} : vector<8x384xf32> to vector<8x128xf32>
    %36 = vector.extract_strided_slice %18 {offsets = [0, 256], sizes = [8, 128], strides = [1, 1]} : vector<8x384xf32> to vector<8x128xf32>
    %37 = vector.broadcast %6 : vector<1x128xf32> to vector<8x128xf32>
    %38 = arith.addf %36, %37 : vector<8x128xf32>
    %39 = arith.mulf %26, %38 : vector<8x128xf32>
    %40 = arith.addf %35, %39 : vector<8x128xf32>
    %41 = math.tanh %40 : vector<8x128xf32>
    %cst_22 = arith.constant 1.000000e+00 : f32
    %42 = vector.broadcast %cst_22 : f32 to vector<8x128xf32>
    %43 = arith.subf %42, %34 : vector<8x128xf32>
    %44 = arith.mulf %43, %41 : vector<8x128xf32>
    %45 = arith.mulf %34, %14 : vector<8x128xf32>
    %46 = arith.addf %44, %45 : vector<8x128xf32>
    %47 = arith.index_cast %c0_i32_16 : i32 to index
    %c0_23 = arith.constant 0 : index
    %c0_24 = arith.constant 0 : index
    %48 = vector.load %arg12[%47, %c0_23, %c0_24] : memref<8x8x128xf32, #tpu.memory_space<vmem>>, vector<1x8x128xf32>
    %49 = vector.shape_cast %48 : vector<1x8x128xf32> to vector<8x128xf32>
    %50 = vector.shape_cast %46 : vector<8x128xf32> to vector<1x8x128xf32>
    tpu.vector_store %arg12[%47, %c0_23, %c0_24], %50 {strides = array<i32>} : memref<8x8x128xf32, #tpu.memory_space<vmem>>, vector<1x8x128xf32>,
    %c1_i32 = arith.constant 1 : i32
    %51 = arith.index_cast %c1_i32 : i32 to index
    %c0_25 = arith.constant 0 : index
    %c0_26 = arith.constant 0 : index
    %52 = vector.load %arg11[%51, %c0_25, %c0_26] : memref<8x8x384xf32, #tpu.memory_space<vmem>>, vector<1x8x384xf32>
    %53 = vector.shape_cast %52 : vector<1x8x384xf32> to vector<8x384xf32>
    %cst_27 = arith.constant dense<0.000000e+00> : vector<8x384xf32>
    %54 = tpu.matmul %46, %4, %cst_27 {dimension_numbers = #tpu.dot_dimension_numbers<[1], [0], [0], [1], [0, 0, 1, 1], [], []>} : vector<8x128xf32>, vector<128x384xf32>, vector<8x384xf32> -> vector<8x384xf32>
    %55 = vector.extract_strided_slice %53 {offsets = [0, 0], sizes = [8, 128], strides = [1, 1]} : vector<8x384xf32> to vector<8x128xf32>
    %56 = vector.extract_strided_slice %54 {offsets = [0, 0], sizes = [8, 128], strides = [1, 1]} : vector<8x384xf32> to vector<8x128xf32>
    %57 = arith.addf %55, %56 : vector<8x128xf32>
    %58 = arith.negf %57 : vector<8x128xf32>
    %59 = math.exp %58 : vector<8x128xf32>
    %cst_28 = arith.constant 1.000000e+00 : f32
    %60 = vector.broadcast %cst_28 : f32 to vector<8x128xf32>
    %61 = arith.addf %60, %59 : vector<8x128xf32>
    %62 = arith.divf %60, %61 : vector<8x128xf32>
    %63 = vector.extract_strided_slice %53 {offsets = [0, 128], sizes = [8, 128], strides = [1, 1]} : vector<8x384xf32> to vector<8x128xf32>
    %64 = vector.extract_strided_slice %54 {offsets = [0, 128], sizes = [8, 128], strides = [1, 1]} : vector<8x384xf32> to vector<8x128xf32>
    %65 = arith.addf %63, %64 : vector<8x128xf32>
    %66 = arith.negf %65 : vector<8x128xf32>
    %67 = math.exp %66 : vector<8x128xf32>
    %cst_29 = arith.constant 1.000000e+00 : f32
    %68 = vector.broadcast %cst_29 : f32 to vector<8x128xf32>
    %69 = arith.addf %68, %67 : vector<8x128xf32>
    %70 = arith.divf %68, %69 : vector<8x128xf32>
    %71 = vector.extract_strided_slice %53 {offsets = [0, 256], sizes = [8, 128], strides = [1, 1]} : vector<8x384xf32> to vector<8x128xf32>
    %72 = vector.extract_strided_slice %54 {offsets = [0, 256], sizes = [8, 128], strides = [1, 1]} : vector<8x384xf32> to vector<8x128xf32>
    %73 = vector.broadcast %6 : vector<1x128xf32> to vector<8x128xf32>
    %74 = arith.addf %72, %73 : vector<8x128xf32>
    %75 = arith.mulf %62, %74 : vector<8x128xf32>
    %76 = arith.addf %71, %75 : vector<8x128xf32>
    %77 = math.tanh %76 : vector<8x128xf32>
    %cst_30 = arith.constant 1.000000e+00 : f32
    %78 = vector.broadcast %cst_30 : f32 to vector<8x128xf32>
    %79 = arith.subf %78, %70 : vector<8x128xf32>
    %80 = arith.mulf %79, %77 : vector<8x128xf32>
    %81 = arith.mulf %70, %46 : vector<8x128xf32>
    %82 = arith.addf %80, %81 : vector<8x128xf32>
    %83 = arith.index_cast %c1_i32 : i32 to index
    %c0_31 = arith.constant 0 : index
    %c0_32 = arith.constant 0 : index
    %84 = vector.load %arg12[%83, %c0_31, %c0_32] : memref<8x8x128xf32, #tpu.memory_space<vmem>>, vector<1x8x128xf32>
    %85 = vector.shape_cast %84 : vector<1x8x128xf32> to vector<8x128xf32>
    %86 = vector.shape_cast %82 : vector<8x128xf32> to vector<1x8x128xf32>
    tpu.vector_store %arg12[%83, %c0_31, %c0_32], %86 {strides = array<i32>} : memref<8x8x128xf32, #tpu.memory_space<vmem>>, vector<1x8x128xf32>,
    %c2_i32 = arith.constant 2 : i32
    %87 = arith.index_cast %c2_i32 : i32 to index
    %c0_33 = arith.constant 0 : index
    %c0_34 = arith.constant 0 : index
    %88 = vector.load %arg11[%87, %c0_33, %c0_34] : memref<8x8x384xf32, #tpu.memory_space<vmem>>, vector<1x8x384xf32>
    %89 = vector.shape_cast %88 : vector<1x8x384xf32> to vector<8x384xf32>
    %cst_35 = arith.constant dense<0.000000e+00> : vector<8x384xf32>
    %90 = tpu.matmul %82, %4, %cst_35 {dimension_numbers = #tpu.dot_dimension_numbers<[1], [0], [0], [1], [0, 0, 1, 1], [], []>} : vector<8x128xf32>, vector<128x384xf32>, vector<8x384xf32> -> vector<8x384xf32>
    %91 = vector.extract_strided_slice %89 {offsets = [0, 0], sizes = [8, 128], strides = [1, 1]} : vector<8x384xf32> to vector<8x128xf32>
    %92 = vector.extract_strided_slice %90 {offsets = [0, 0], sizes = [8, 128], strides = [1, 1]} : vector<8x384xf32> to vector<8x128xf32>
    %93 = arith.addf %91, %92 : vector<8x128xf32>
    %94 = arith.negf %93 : vector<8x128xf32>
    %95 = math.exp %94 : vector<8x128xf32>
    %cst_36 = arith.constant 1.000000e+00 : f32
    %96 = vector.broadcast %cst_36 : f32 to vector<8x128xf32>
    %97 = arith.addf %96, %95 : vector<8x128xf32>
    %98 = arith.divf %96, %97 : vector<8x128xf32>
    %99 = vector.extract_strided_slice %89 {offsets = [0, 128], sizes = [8, 128], strides = [1, 1]} : vector<8x384xf32> to vector<8x128xf32>
    %100 = vector.extract_strided_slice %90 {offsets = [0, 128], sizes = [8, 128], strides = [1, 1]} : vector<8x384xf32> to vector<8x128xf32>
    %101 = arith.addf %99, %100 : vector<8x128xf32>
    %102 = arith.negf %101 : vector<8x128xf32>
    %103 = math.exp %102 : vector<8x128xf32>
    %cst_37 = arith.constant 1.000000e+00 : f32
    %104 = vector.broadcast %cst_37 : f32 to vector<8x128xf32>
    %105 = arith.addf %104, %103 : vector<8x128xf32>
    %106 = arith.divf %104, %105 : vector<8x128xf32>
    %107 = vector.extract_strided_slice %89 {offsets = [0, 256], sizes = [8, 128], strides = [1, 1]} : vector<8x384xf32> to vector<8x128xf32>
    %108 = vector.extract_strided_slice %90 {offsets = [0, 256], sizes = [8, 128], strides = [1, 1]} : vector<8x384xf32> to vector<8x128xf32>
    %109 = vector.broadcast %6 : vector<1x128xf32> to vector<8x128xf32>
    %110 = arith.addf %108, %109 : vector<8x128xf32>
    %111 = arith.mulf %98, %110 : vector<8x128xf32>
    %112 = arith.addf %107, %111 : vector<8x128xf32>
    %113 = math.tanh %112 : vector<8x128xf32>
    %cst_38 = arith.constant 1.000000e+00 : f32
    %114 = vector.broadcast %cst_38 : f32 to vector<8x128xf32>
    %115 = arith.subf %114, %106 : vector<8x128xf32>
    %116 = arith.mulf %115, %113 : vector<8x128xf32>
    %117 = arith.mulf %106, %82 : vector<8x128xf32>
    %118 = arith.addf %116, %117 : vector<8x128xf32>
    %119 = arith.index_cast %c2_i32 : i32 to index
    %c0_39 = arith.constant 0 : index
    %c0_40 = arith.constant 0 : index
    %120 = vector.load %arg12[%119, %c0_39, %c0_40] : memref<8x8x128xf32, #tpu.memory_space<vmem>>, vector<1x8x128xf32>
    %121 = vector.shape_cast %120 : vector<1x8x128xf32> to vector<8x128xf32>
    %122 = vector.shape_cast %118 : vector<8x128xf32> to vector<1x8x128xf32>
    tpu.vector_store %arg12[%119, %c0_39, %c0_40], %122 {strides = array<i32>} : memref<8x8x128xf32, #tpu.memory_space<vmem>>, vector<1x8x128xf32>,
    %c3_i32 = arith.constant 3 : i32
    %123 = arith.index_cast %c3_i32 : i32 to index
    %c0_41 = arith.constant 0 : index
    %c0_42 = arith.constant 0 : index
    %124 = vector.load %arg11[%123, %c0_41, %c0_42] : memref<8x8x384xf32, #tpu.memory_space<vmem>>, vector<1x8x384xf32>
    %125 = vector.shape_cast %124 : vector<1x8x384xf32> to vector<8x384xf32>
    %cst_43 = arith.constant dense<0.000000e+00> : vector<8x384xf32>
    %126 = tpu.matmul %118, %4, %cst_43 {dimension_numbers = #tpu.dot_dimension_numbers<[1], [0], [0], [1], [0, 0, 1, 1], [], []>} : vector<8x128xf32>, vector<128x384xf32>, vector<8x384xf32> -> vector<8x384xf32>
    %127 = vector.extract_strided_slice %125 {offsets = [0, 0], sizes = [8, 128], strides = [1, 1]} : vector<8x384xf32> to vector<8x128xf32>
    %128 = vector.extract_strided_slice %126 {offsets = [0, 0], sizes = [8, 128], strides = [1, 1]} : vector<8x384xf32> to vector<8x128xf32>
    %129 = arith.addf %127, %128 : vector<8x128xf32>
    %130 = arith.negf %129 : vector<8x128xf32>
    %131 = math.exp %130 : vector<8x128xf32>
    %cst_44 = arith.constant 1.000000e+00 : f32
    %132 = vector.broadcast %cst_44 : f32 to vector<8x128xf32>
    %133 = arith.addf %132, %131 : vector<8x128xf32>
    %134 = arith.divf %132, %133 : vector<8x128xf32>
    %135 = vector.extract_strided_slice %125 {offsets = [0, 128], sizes = [8, 128], strides = [1, 1]} : vector<8x384xf32> to vector<8x128xf32>
    %136 = vector.extract_strided_slice %126 {offsets = [0, 128], sizes = [8, 128], strides = [1, 1]} : vector<8x384xf32> to vector<8x128xf32>
    %137 = arith.addf %135, %136 : vector<8x128xf32>
    %138 = arith.negf %137 : vector<8x128xf32>
    %139 = math.exp %138 : vector<8x128xf32>
    %cst_45 = arith.constant 1.000000e+00 : f32
    %140 = vector.broadcast %cst_45 : f32 to vector<8x128xf32>
    %141 = arith.addf %140, %139 : vector<8x128xf32>
    %142 = arith.divf %140, %141 : vector<8x128xf32>
    %143 = vector.extract_strided_slice %125 {offsets = [0, 256], sizes = [8, 128], strides = [1, 1]} : vector<8x384xf32> to vector<8x128xf32>
    %144 = vector.extract_strided_slice %126 {offsets = [0, 256], sizes = [8, 128], strides = [1, 1]} : vector<8x384xf32> to vector<8x128xf32>
    %145 = vector.broadcast %6 : vector<1x128xf32> to vector<8x128xf32>
    %146 = arith.addf %144, %145 : vector<8x128xf32>
    %147 = arith.mulf %134, %146 : vector<8x128xf32>
    %148 = arith.addf %143, %147 : vector<8x128xf32>
    %149 = math.tanh %148 : vector<8x128xf32>
    %cst_46 = arith.constant 1.000000e+00 : f32
    %150 = vector.broadcast %cst_46 : f32 to vector<8x128xf32>
    %151 = arith.subf %150, %142 : vector<8x128xf32>
    %152 = arith.mulf %151, %149 : vector<8x128xf32>
    %153 = arith.mulf %142, %118 : vector<8x128xf32>
    %154 = arith.addf %152, %153 : vector<8x128xf32>
    %155 = arith.index_cast %c3_i32 : i32 to index
    %c0_47 = arith.constant 0 : index
    %c0_48 = arith.constant 0 : index
    %156 = vector.load %arg12[%155, %c0_47, %c0_48] : memref<8x8x128xf32, #tpu.memory_space<vmem>>, vector<1x8x128xf32>
    %157 = vector.shape_cast %156 : vector<1x8x128xf32> to vector<8x128xf32>
    %158 = vector.shape_cast %154 : vector<8x128xf32> to vector<1x8x128xf32>
    tpu.vector_store %arg12[%155, %c0_47, %c0_48], %158 {strides = array<i32>} : memref<8x8x128xf32, #tpu.memory_space<vmem>>, vector<1x8x128xf32>,
    %c4_i32 = arith.constant 4 : i32
    %159 = arith.index_cast %c4_i32 : i32 to index
    %c0_49 = arith.constant 0 : index
    %c0_50 = arith.constant 0 : index
    %160 = vector.load %arg11[%159, %c0_49, %c0_50] : memref<8x8x384xf32, #tpu.memory_space<vmem>>, vector<1x8x384xf32>
    %161 = vector.shape_cast %160 : vector<1x8x384xf32> to vector<8x384xf32>
    %cst_51 = arith.constant dense<0.000000e+00> : vector<8x384xf32>
    %162 = tpu.matmul %154, %4, %cst_51 {dimension_numbers = #tpu.dot_dimension_numbers<[1], [0], [0], [1], [0, 0, 1, 1], [], []>} : vector<8x128xf32>, vector<128x384xf32>, vector<8x384xf32> -> vector<8x384xf32>
    %163 = vector.extract_strided_slice %161 {offsets = [0, 0], sizes = [8, 128], strides = [1, 1]} : vector<8x384xf32> to vector<8x128xf32>
    %164 = vector.extract_strided_slice %162 {offsets = [0, 0], sizes = [8, 128], strides = [1, 1]} : vector<8x384xf32> to vector<8x128xf32>
    %165 = arith.addf %163, %164 : vector<8x128xf32>
    %166 = arith.negf %165 : vector<8x128xf32>
    %167 = math.exp %166 : vector<8x128xf32>
    %cst_52 = arith.constant 1.000000e+00 : f32
    %168 = vector.broadcast %cst_52 : f32 to vector<8x128xf32>
    %169 = arith.addf %168, %167 : vector<8x128xf32>
    %170 = arith.divf %168, %169 : vector<8x128xf32>
    %171 = vector.extract_strided_slice %161 {offsets = [0, 128], sizes = [8, 128], strides = [1, 1]} : vector<8x384xf32> to vector<8x128xf32>
    %172 = vector.extract_strided_slice %162 {offsets = [0, 128], sizes = [8, 128], strides = [1, 1]} : vector<8x384xf32> to vector<8x128xf32>
    %173 = arith.addf %171, %172 : vector<8x128xf32>
    %174 = arith.negf %173 : vector<8x128xf32>
    %175 = math.exp %174 : vector<8x128xf32>
    %cst_53 = arith.constant 1.000000e+00 : f32
    %176 = vector.broadcast %cst_53 : f32 to vector<8x128xf32>
    %177 = arith.addf %176, %175 : vector<8x128xf32>
    %178 = arith.divf %176, %177 : vector<8x128xf32>
    %179 = vector.extract_strided_slice %161 {offsets = [0, 256], sizes = [8, 128], strides = [1, 1]} : vector<8x384xf32> to vector<8x128xf32>
    %180 = vector.extract_strided_slice %162 {offsets = [0, 256], sizes = [8, 128], strides = [1, 1]} : vector<8x384xf32> to vector<8x128xf32>
    %181 = vector.broadcast %6 : vector<1x128xf32> to vector<8x128xf32>
    %182 = arith.addf %180, %181 : vector<8x128xf32>
    %183 = arith.mulf %170, %182 : vector<8x128xf32>
    %184 = arith.addf %179, %183 : vector<8x128xf32>
    %185 = math.tanh %184 : vector<8x128xf32>
    %cst_54 = arith.constant 1.000000e+00 : f32
    %186 = vector.broadcast %cst_54 : f32 to vector<8x128xf32>
    %187 = arith.subf %186, %178 : vector<8x128xf32>
    %188 = arith.mulf %187, %185 : vector<8x128xf32>
    %189 = arith.mulf %178, %154 : vector<8x128xf32>
    %190 = arith.addf %188, %189 : vector<8x128xf32>
    %191 = arith.index_cast %c4_i32 : i32 to index
    %c0_55 = arith.constant 0 : index
    %c0_56 = arith.constant 0 : index
    %192 = vector.load %arg12[%191, %c0_55, %c0_56] : memref<8x8x128xf32, #tpu.memory_space<vmem>>, vector<1x8x128xf32>
    %193 = vector.shape_cast %192 : vector<1x8x128xf32> to vector<8x128xf32>
    %194 = vector.shape_cast %190 : vector<8x128xf32> to vector<1x8x128xf32>
    tpu.vector_store %arg12[%191, %c0_55, %c0_56], %194 {strides = array<i32>} : memref<8x8x128xf32, #tpu.memory_space<vmem>>, vector<1x8x128xf32>,
    %c5_i32 = arith.constant 5 : i32
    %195 = arith.index_cast %c5_i32 : i32 to index
    %c0_57 = arith.constant 0 : index
    %c0_58 = arith.constant 0 : index
    %196 = vector.load %arg11[%195, %c0_57, %c0_58] : memref<8x8x384xf32, #tpu.memory_space<vmem>>, vector<1x8x384xf32>
    %197 = vector.shape_cast %196 : vector<1x8x384xf32> to vector<8x384xf32>
    %cst_59 = arith.constant dense<0.000000e+00> : vector<8x384xf32>
    %198 = tpu.matmul %190, %4, %cst_59 {dimension_numbers = #tpu.dot_dimension_numbers<[1], [0], [0], [1], [0, 0, 1, 1], [], []>} : vector<8x128xf32>, vector<128x384xf32>, vector<8x384xf32> -> vector<8x384xf32>
    %199 = vector.extract_strided_slice %197 {offsets = [0, 0], sizes = [8, 128], strides = [1, 1]} : vector<8x384xf32> to vector<8x128xf32>
    %200 = vector.extract_strided_slice %198 {offsets = [0, 0], sizes = [8, 128], strides = [1, 1]} : vector<8x384xf32> to vector<8x128xf32>
    %201 = arith.addf %199, %200 : vector<8x128xf32>
    %202 = arith.negf %201 : vector<8x128xf32>
    %203 = math.exp %202 : vector<8x128xf32>
    %cst_60 = arith.constant 1.000000e+00 : f32
    %204 = vector.broadcast %cst_60 : f32 to vector<8x128xf32>
    %205 = arith.addf %204, %203 : vector<8x128xf32>
    %206 = arith.divf %204, %205 : vector<8x128xf32>
    %207 = vector.extract_strided_slice %197 {offsets = [0, 128], sizes = [8, 128], strides = [1, 1]} : vector<8x384xf32> to vector<8x128xf32>
    %208 = vector.extract_strided_slice %198 {offsets = [0, 128], sizes = [8, 128], strides = [1, 1]} : vector<8x384xf32> to vector<8x128xf32>
    %209 = arith.addf %207, %208 : vector<8x128xf32>
    %210 = arith.negf %209 : vector<8x128xf32>
    %211 = math.exp %210 : vector<8x128xf32>
    %cst_61 = arith.constant 1.000000e+00 : f32
    %212 = vector.broadcast %cst_61 : f32 to vector<8x128xf32>
    %213 = arith.addf %212, %211 : vector<8x128xf32>
    %214 = arith.divf %212, %213 : vector<8x128xf32>
    %215 = vector.extract_strided_slice %197 {offsets = [0, 256], sizes = [8, 128], strides = [1, 1]} : vector<8x384xf32> to vector<8x128xf32>
    %216 = vector.extract_strided_slice %198 {offsets = [0, 256], sizes = [8, 128], strides = [1, 1]} : vector<8x384xf32> to vector<8x128xf32>
    %217 = vector.broadcast %6 : vector<1x128xf32> to vector<8x128xf32>
    %218 = arith.addf %216, %217 : vector<8x128xf32>
    %219 = arith.mulf %206, %218 : vector<8x128xf32>
    %220 = arith.addf %215, %219 : vector<8x128xf32>
    %221 = math.tanh %220 : vector<8x128xf32>
    %cst_62 = arith.constant 1.000000e+00 : f32
    %222 = vector.broadcast %cst_62 : f32 to vector<8x128xf32>
    %223 = arith.subf %222, %214 : vector<8x128xf32>
    %224 = arith.mulf %223, %221 : vector<8x128xf32>
    %225 = arith.mulf %214, %190 : vector<8x128xf32>
    %226 = arith.addf %224, %225 : vector<8x128xf32>
    %227 = arith.index_cast %c5_i32 : i32 to index
    %c0_63 = arith.constant 0 : index
    %c0_64 = arith.constant 0 : index
    %228 = vector.load %arg12[%227, %c0_63, %c0_64] : memref<8x8x128xf32, #tpu.memory_space<vmem>>, vector<1x8x128xf32>
    %229 = vector.shape_cast %228 : vector<1x8x128xf32> to vector<8x128xf32>
    %230 = vector.shape_cast %226 : vector<8x128xf32> to vector<1x8x128xf32>
    tpu.vector_store %arg12[%227, %c0_63, %c0_64], %230 {strides = array<i32>} : memref<8x8x128xf32, #tpu.memory_space<vmem>>, vector<1x8x128xf32>,
    %c6_i32 = arith.constant 6 : i32
    %231 = arith.index_cast %c6_i32 : i32 to index
    %c0_65 = arith.constant 0 : index
    %c0_66 = arith.constant 0 : index
    %232 = vector.load %arg11[%231, %c0_65, %c0_66] : memref<8x8x384xf32, #tpu.memory_space<vmem>>, vector<1x8x384xf32>
    %233 = vector.shape_cast %232 : vector<1x8x384xf32> to vector<8x384xf32>
    %cst_67 = arith.constant dense<0.000000e+00> : vector<8x384xf32>
    %234 = tpu.matmul %226, %4, %cst_67 {dimension_numbers = #tpu.dot_dimension_numbers<[1], [0], [0], [1], [0, 0, 1, 1], [], []>} : vector<8x128xf32>, vector<128x384xf32>, vector<8x384xf32> -> vector<8x384xf32>
    %235 = vector.extract_strided_slice %233 {offsets = [0, 0], sizes = [8, 128], strides = [1, 1]} : vector<8x384xf32> to vector<8x128xf32>
    %236 = vector.extract_strided_slice %234 {offsets = [0, 0], sizes = [8, 128], strides = [1, 1]} : vector<8x384xf32> to vector<8x128xf32>
    %237 = arith.addf %235, %236 : vector<8x128xf32>
    %238 = arith.negf %237 : vector<8x128xf32>
    %239 = math.exp %238 : vector<8x128xf32>
    %cst_68 = arith.constant 1.000000e+00 : f32
    %240 = vector.broadcast %cst_68 : f32 to vector<8x128xf32>
    %241 = arith.addf %240, %239 : vector<8x128xf32>
    %242 = arith.divf %240, %241 : vector<8x128xf32>
    %243 = vector.extract_strided_slice %233 {offsets = [0, 128], sizes = [8, 128], strides = [1, 1]} : vector<8x384xf32> to vector<8x128xf32>
    %244 = vector.extract_strided_slice %234 {offsets = [0, 128], sizes = [8, 128], strides = [1, 1]} : vector<8x384xf32> to vector<8x128xf32>
    %245 = arith.addf %243, %244 : vector<8x128xf32>
    %246 = arith.negf %245 : vector<8x128xf32>
    %247 = math.exp %246 : vector<8x128xf32>
    %cst_69 = arith.constant 1.000000e+00 : f32
    %248 = vector.broadcast %cst_69 : f32 to vector<8x128xf32>
    %249 = arith.addf %248, %247 : vector<8x128xf32>
    %250 = arith.divf %248, %249 : vector<8x128xf32>
    %251 = vector.extract_strided_slice %233 {offsets = [0, 256], sizes = [8, 128], strides = [1, 1]} : vector<8x384xf32> to vector<8x128xf32>
    %252 = vector.extract_strided_slice %234 {offsets = [0, 256], sizes = [8, 128], strides = [1, 1]} : vector<8x384xf32> to vector<8x128xf32>
    %253 = vector.broadcast %6 : vector<1x128xf32> to vector<8x128xf32>
    %254 = arith.addf %252, %253 : vector<8x128xf32>
    %255 = arith.mulf %242, %254 : vector<8x128xf32>
    %256 = arith.addf %251, %255 : vector<8x128xf32>
    %257 = math.tanh %256 : vector<8x128xf32>
    %cst_70 = arith.constant 1.000000e+00 : f32
    %258 = vector.broadcast %cst_70 : f32 to vector<8x128xf32>
    %259 = arith.subf %258, %250 : vector<8x128xf32>
    %260 = arith.mulf %259, %257 : vector<8x128xf32>
    %261 = arith.mulf %250, %226 : vector<8x128xf32>
    %262 = arith.addf %260, %261 : vector<8x128xf32>
    %263 = arith.index_cast %c6_i32 : i32 to index
    %c0_71 = arith.constant 0 : index
    %c0_72 = arith.constant 0 : index
    %264 = vector.load %arg12[%263, %c0_71, %c0_72] : memref<8x8x128xf32, #tpu.memory_space<vmem>>, vector<1x8x128xf32>
    %265 = vector.shape_cast %264 : vector<1x8x128xf32> to vector<8x128xf32>
    %266 = vector.shape_cast %262 : vector<8x128xf32> to vector<1x8x128xf32>
    tpu.vector_store %arg12[%263, %c0_71, %c0_72], %266 {strides = array<i32>} : memref<8x8x128xf32, #tpu.memory_space<vmem>>, vector<1x8x128xf32>,
    %c7_i32 = arith.constant 7 : i32
    %267 = arith.index_cast %c7_i32 : i32 to index
    %c0_73 = arith.constant 0 : index
    %c0_74 = arith.constant 0 : index
    %268 = vector.load %arg11[%267, %c0_73, %c0_74] : memref<8x8x384xf32, #tpu.memory_space<vmem>>, vector<1x8x384xf32>
    %269 = vector.shape_cast %268 : vector<1x8x384xf32> to vector<8x384xf32>
    %cst_75 = arith.constant dense<0.000000e+00> : vector<8x384xf32>
    %270 = tpu.matmul %262, %4, %cst_75 {dimension_numbers = #tpu.dot_dimension_numbers<[1], [0], [0], [1], [0, 0, 1, 1], [], []>} : vector<8x128xf32>, vector<128x384xf32>, vector<8x384xf32> -> vector<8x384xf32>
    %271 = vector.extract_strided_slice %269 {offsets = [0, 0], sizes = [8, 128], strides = [1, 1]} : vector<8x384xf32> to vector<8x128xf32>
    %272 = vector.extract_strided_slice %270 {offsets = [0, 0], sizes = [8, 128], strides = [1, 1]} : vector<8x384xf32> to vector<8x128xf32>
    %273 = arith.addf %271, %272 : vector<8x128xf32>
    %274 = arith.negf %273 : vector<8x128xf32>
    %275 = math.exp %274 : vector<8x128xf32>
    %cst_76 = arith.constant 1.000000e+00 : f32
    %276 = vector.broadcast %cst_76 : f32 to vector<8x128xf32>
    %277 = arith.addf %276, %275 : vector<8x128xf32>
    %278 = arith.divf %276, %277 : vector<8x128xf32>
    %279 = vector.extract_strided_slice %269 {offsets = [0, 128], sizes = [8, 128], strides = [1, 1]} : vector<8x384xf32> to vector<8x128xf32>
    %280 = vector.extract_strided_slice %270 {offsets = [0, 128], sizes = [8, 128], strides = [1, 1]} : vector<8x384xf32> to vector<8x128xf32>
    %281 = arith.addf %279, %280 : vector<8x128xf32>
    %282 = arith.negf %281 : vector<8x128xf32>
    %283 = math.exp %282 : vector<8x128xf32>
    %cst_77 = arith.constant 1.000000e+00 : f32
    %284 = vector.broadcast %cst_77 : f32 to vector<8x128xf32>
    %285 = arith.addf %284, %283 : vector<8x128xf32>
    %286 = arith.divf %284, %285 : vector<8x128xf32>
    %287 = vector.extract_strided_slice %269 {offsets = [0, 256], sizes = [8, 128], strides = [1, 1]} : vector<8x384xf32> to vector<8x128xf32>
    %288 = vector.extract_strided_slice %270 {offsets = [0, 256], sizes = [8, 128], strides = [1, 1]} : vector<8x384xf32> to vector<8x128xf32>
    %289 = vector.broadcast %6 : vector<1x128xf32> to vector<8x128xf32>
    %290 = arith.addf %288, %289 : vector<8x128xf32>
    %291 = arith.mulf %278, %290 : vector<8x128xf32>
    %292 = arith.addf %287, %291 : vector<8x128xf32>
    %293 = math.tanh %292 : vector<8x128xf32>
    %cst_78 = arith.constant 1.000000e+00 : f32
    %294 = vector.broadcast %cst_78 : f32 to vector<8x128xf32>
    %295 = arith.subf %294, %286 : vector<8x128xf32>
    %296 = arith.mulf %295, %293 : vector<8x128xf32>
    %297 = arith.mulf %286, %262 : vector<8x128xf32>
    %298 = arith.addf %296, %297 : vector<8x128xf32>
    %299 = arith.index_cast %c7_i32 : i32 to index
    %c0_79 = arith.constant 0 : index
    %c0_80 = arith.constant 0 : index
    %300 = vector.load %arg12[%299, %c0_79, %c0_80] : memref<8x8x128xf32, #tpu.memory_space<vmem>>, vector<1x8x128xf32>
    %301 = vector.shape_cast %300 : vector<1x8x128xf32> to vector<8x128xf32>
    %302 = vector.shape_cast %298 : vector<8x128xf32> to vector<1x8x128xf32>
    tpu.vector_store %arg12[%299, %c0_79, %c0_80], %302 {strides = array<i32>} : memref<8x8x128xf32, #tpu.memory_space<vmem>>, vector<1x8x128xf32>,
    %c8_i32 = arith.constant 8 : i32
    %c0_81 = arith.constant 0 : index
    %c0_82 = arith.constant 0 : index
    %303 = vector.load %arg13[%c0_81, %c0_82] : memref<8x128xf32, #tpu.memory_space<vmem>>, vector<8x128xf32>
    tpu.vector_store %arg13[%c0_81, %c0_82], %298 {strides = array<i32>} : memref<8x128xf32, #tpu.memory_space<vmem>>, vector<8x128xf32>,
    %c0_83 = arith.constant 0 : index
    %c0_84 = arith.constant 0 : index
    %304 = vector.load %arg6[%c0_83, %c0_84] : memref<128x384xf32, #tpu.memory_space<vmem>>, vector<128x384xf32>
    %c0_85 = arith.constant 0 : index
    %c0_86 = arith.constant 0 : index
    %305 = vector.load %arg7[%c0_85, %c0_86] : memref<128x384xf32, #tpu.memory_space<vmem>>, vector<128x384xf32>
    %c0_87 = arith.constant 0 : index
    %c0_88 = arith.constant 0 : index
    %306 = vector.load %arg8[%c0_87, %c0_88] : memref<1x384xf32, #tpu.memory_space<vmem>>, vector<1x384xf32>
    %c0_89 = arith.constant 0 : index
    %c0_90 = arith.constant 0 : index
    %307 = vector.load %arg9[%c0_89, %c0_90] : memref<1x128xf32, #tpu.memory_space<vmem>>, vector<1x128xf32>
    %c0_91 = arith.constant 0 : index
    %c0_92 = arith.constant 0 : index
    %c0_93 = arith.constant 0 : index
    %308 = vector.load %arg12[%c0_91, %c0_92, %c0_93] : memref<8x8x128xf32, #tpu.memory_space<vmem>>, vector<8x8x128xf32>
    %309 = vector.shape_cast %308 : vector<8x8x128xf32> to vector<64x128xf32>
    %cst_94 = arith.constant dense<0.000000e+00> : vector<64x384xf32>
    %310 = tpu.matmul %309, %304, %cst_94 {dimension_numbers = #tpu.dot_dimension_numbers<[1], [0], [0], [1], [0, 0, 1, 1], [], []>} : vector<64x128xf32>, vector<128x384xf32>, vector<64x384xf32> -> vector<64x384xf32>
    %311 = vector.broadcast %306 : vector<1x384xf32> to vector<64x384xf32>
    %312 = arith.addf %310, %311 : vector<64x384xf32>
    %313 = vector.shape_cast %312 : vector<64x384xf32> to vector<8x8x384xf32>
    %c0_95 = arith.constant 0 : index
    %c0_96 = arith.constant 0 : index
    %c0_97 = arith.constant 0 : index
    %314 = vector.load %arg11[%c0_95, %c0_96, %c0_97] : memref<8x8x384xf32, #tpu.memory_space<vmem>>, vector<8x8x384xf32>
    tpu.vector_store %arg11[%c0_95, %c0_96, %c0_97], %313 {strides = array<i32>} : memref<8x8x384xf32, #tpu.memory_space<vmem>>, vector<8x8x384xf32>,
    %c0_98 = arith.constant 0 : index
    %c0_99 = arith.constant 0 : index
    %315 = vector.load %arg14[%c0_98, %c0_99] : memref<8x128xf32, #tpu.memory_space<vmem>>, vector<8x128xf32>
    %c0_i32_100 = arith.constant 0 : i32
    %316 = arith.index_cast %c0_i32_100 : i32 to index
    %c0_101 = arith.constant 0 : index
    %c0_102 = arith.constant 0 : index
    %317 = vector.load %arg11[%316, %c0_101, %c0_102] : memref<8x8x384xf32, #tpu.memory_space<vmem>>, vector<1x8x384xf32>
    %318 = vector.shape_cast %317 : vector<1x8x384xf32> to vector<8x384xf32>
    %cst_103 = arith.constant dense<0.000000e+00> : vector<8x384xf32>
    %319 = tpu.matmul %315, %305, %cst_103 {dimension_numbers = #tpu.dot_dimension_numbers<[1], [0], [0], [1], [0, 0, 1, 1], [], []>} : vector<8x128xf32>, vector<128x384xf32>, vector<8x384xf32> -> vector<8x384xf32>
    %320 = vector.extract_strided_slice %318 {offsets = [0, 0], sizes = [8, 128], strides = [1, 1]} : vector<8x384xf32> to vector<8x128xf32>
    %321 = vector.extract_strided_slice %319 {offsets = [0, 0], sizes = [8, 128], strides = [1, 1]} : vector<8x384xf32> to vector<8x128xf32>
    %322 = arith.addf %320, %321 : vector<8x128xf32>
    %323 = arith.negf %322 : vector<8x128xf32>
    %324 = math.exp %323 : vector<8x128xf32>
    %cst_104 = arith.constant 1.000000e+00 : f32
    %325 = vector.broadcast %cst_104 : f32 to vector<8x128xf32>
    %326 = arith.addf %325, %324 : vector<8x128xf32>
    %327 = arith.divf %325, %326 : vector<8x128xf32>
    %328 = vector.extract_strided_slice %318 {offsets = [0, 128], sizes = [8, 128], strides = [1, 1]} : vector<8x384xf32> to vector<8x128xf32>
    %329 = vector.extract_strided_slice %319 {offsets = [0, 128], sizes = [8, 128], strides = [1, 1]} : vector<8x384xf32> to vector<8x128xf32>
    %330 = arith.addf %328, %329 : vector<8x128xf32>
    %331 = arith.negf %330 : vector<8x128xf32>
    %332 = math.exp %331 : vector<8x128xf32>
    %cst_105 = arith.constant 1.000000e+00 : f32
    %333 = vector.broadcast %cst_105 : f32 to vector<8x128xf32>
    %334 = arith.addf %333, %332 : vector<8x128xf32>
    %335 = arith.divf %333, %334 : vector<8x128xf32>
    %336 = vector.extract_strided_slice %318 {offsets = [0, 256], sizes = [8, 128], strides = [1, 1]} : vector<8x384xf32> to vector<8x128xf32>
    %337 = vector.extract_strided_slice %319 {offsets = [0, 256], sizes = [8, 128], strides = [1, 1]} : vector<8x384xf32> to vector<8x128xf32>
    %338 = vector.broadcast %307 : vector<1x128xf32> to vector<8x128xf32>
    %339 = arith.addf %337, %338 : vector<8x128xf32>
    %340 = arith.mulf %327, %339 : vector<8x128xf32>
    %341 = arith.addf %336, %340 : vector<8x128xf32>
    %342 = math.tanh %341 : vector<8x128xf32>
    %cst_106 = arith.constant 1.000000e+00 : f32
    %343 = vector.broadcast %cst_106 : f32 to vector<8x128xf32>
    %344 = arith.subf %343, %335 : vector<8x128xf32>
    %345 = arith.mulf %344, %342 : vector<8x128xf32>
    %346 = arith.mulf %335, %315 : vector<8x128xf32>
    %347 = arith.addf %345, %346 : vector<8x128xf32>
    %348 = arith.index_cast %c0_i32_100 : i32 to index
    %c0_107 = arith.constant 0 : index
    %c0_108 = arith.constant 0 : index
    %349 = vector.load %arg10[%348, %c0_107, %c0_108] : memref<8x8x128xf32, #tpu.memory_space<vmem>>, vector<1x8x128xf32>
    %350 = vector.shape_cast %349 : vector<1x8x128xf32> to vector<8x128xf32>
    %351 = vector.shape_cast %347 : vector<8x128xf32> to vector<1x8x128xf32>
    tpu.vector_store %arg10[%348, %c0_107, %c0_108], %351 {strides = array<i32>} : memref<8x8x128xf32, #tpu.memory_space<vmem>>, vector<1x8x128xf32>,
    %c1_i32_109 = arith.constant 1 : i32
    %352 = arith.index_cast %c1_i32_109 : i32 to index
    %c0_110 = arith.constant 0 : index
    %c0_111 = arith.constant 0 : index
    %353 = vector.load %arg11[%352, %c0_110, %c0_111] : memref<8x8x384xf32, #tpu.memory_space<vmem>>, vector<1x8x384xf32>
    %354 = vector.shape_cast %353 : vector<1x8x384xf32> to vector<8x384xf32>
    %cst_112 = arith.constant dense<0.000000e+00> : vector<8x384xf32>
    %355 = tpu.matmul %347, %305, %cst_112 {dimension_numbers = #tpu.dot_dimension_numbers<[1], [0], [0], [1], [0, 0, 1, 1], [], []>} : vector<8x128xf32>, vector<128x384xf32>, vector<8x384xf32> -> vector<8x384xf32>
    %356 = vector.extract_strided_slice %354 {offsets = [0, 0], sizes = [8, 128], strides = [1, 1]} : vector<8x384xf32> to vector<8x128xf32>
    %357 = vector.extract_strided_slice %355 {offsets = [0, 0], sizes = [8, 128], strides = [1, 1]} : vector<8x384xf32> to vector<8x128xf32>
    %358 = arith.addf %356, %357 : vector<8x128xf32>
    %359 = arith.negf %358 : vector<8x128xf32>
    %360 = math.exp %359 : vector<8x128xf32>
    %cst_113 = arith.constant 1.000000e+00 : f32
    %361 = vector.broadcast %cst_113 : f32 to vector<8x128xf32>
    %362 = arith.addf %361, %360 : vector<8x128xf32>
    %363 = arith.divf %361, %362 : vector<8x128xf32>
    %364 = vector.extract_strided_slice %354 {offsets = [0, 128], sizes = [8, 128], strides = [1, 1]} : vector<8x384xf32> to vector<8x128xf32>
    %365 = vector.extract_strided_slice %355 {offsets = [0, 128], sizes = [8, 128], strides = [1, 1]} : vector<8x384xf32> to vector<8x128xf32>
    %366 = arith.addf %364, %365 : vector<8x128xf32>
    %367 = arith.negf %366 : vector<8x128xf32>
    %368 = math.exp %367 : vector<8x128xf32>
    %cst_114 = arith.constant 1.000000e+00 : f32
    %369 = vector.broadcast %cst_114 : f32 to vector<8x128xf32>
    %370 = arith.addf %369, %368 : vector<8x128xf32>
    %371 = arith.divf %369, %370 : vector<8x128xf32>
    %372 = vector.extract_strided_slice %354 {offsets = [0, 256], sizes = [8, 128], strides = [1, 1]} : vector<8x384xf32> to vector<8x128xf32>
    %373 = vector.extract_strided_slice %355 {offsets = [0, 256], sizes = [8, 128], strides = [1, 1]} : vector<8x384xf32> to vector<8x128xf32>
    %374 = vector.broadcast %307 : vector<1x128xf32> to vector<8x128xf32>
    %375 = arith.addf %373, %374 : vector<8x128xf32>
    %376 = arith.mulf %363, %375 : vector<8x128xf32>
    %377 = arith.addf %372, %376 : vector<8x128xf32>
    %378 = math.tanh %377 : vector<8x128xf32>
    %cst_115 = arith.constant 1.000000e+00 : f32
    %379 = vector.broadcast %cst_115 : f32 to vector<8x128xf32>
    %380 = arith.subf %379, %371 : vector<8x128xf32>
    %381 = arith.mulf %380, %378 : vector<8x128xf32>
    %382 = arith.mulf %371, %347 : vector<8x128xf32>
    %383 = arith.addf %381, %382 : vector<8x128xf32>
    %384 = arith.index_cast %c1_i32_109 : i32 to index
    %c0_116 = arith.constant 0 : index
    %c0_117 = arith.constant 0 : index
    %385 = vector.load %arg10[%384, %c0_116, %c0_117] : memref<8x8x128xf32, #tpu.memory_space<vmem>>, vector<1x8x128xf32>
    %386 = vector.shape_cast %385 : vector<1x8x128xf32> to vector<8x128xf32>
    %387 = vector.shape_cast %383 : vector<8x128xf32> to vector<1x8x128xf32>
    tpu.vector_store %arg10[%384, %c0_116, %c0_117], %387 {strides = array<i32>} : memref<8x8x128xf32, #tpu.memory_space<vmem>>, vector<1x8x128xf32>,
    %c2_i32_118 = arith.constant 2 : i32
    %388 = arith.index_cast %c2_i32_118 : i32 to index
    %c0_119 = arith.constant 0 : index
    %c0_120 = arith.constant 0 : index
    %389 = vector.load %arg11[%388, %c0_119, %c0_120] : memref<8x8x384xf32, #tpu.memory_space<vmem>>, vector<1x8x384xf32>
    %390 = vector.shape_cast %389 : vector<1x8x384xf32> to vector<8x384xf32>
    %cst_121 = arith.constant dense<0.000000e+00> : vector<8x384xf32>
    %391 = tpu.matmul %383, %305, %cst_121 {dimension_numbers = #tpu.dot_dimension_numbers<[1], [0], [0], [1], [0, 0, 1, 1], [], []>} : vector<8x128xf32>, vector<128x384xf32>, vector<8x384xf32> -> vector<8x384xf32>
    %392 = vector.extract_strided_slice %390 {offsets = [0, 0], sizes = [8, 128], strides = [1, 1]} : vector<8x384xf32> to vector<8x128xf32>
    %393 = vector.extract_strided_slice %391 {offsets = [0, 0], sizes = [8, 128], strides = [1, 1]} : vector<8x384xf32> to vector<8x128xf32>
    %394 = arith.addf %392, %393 : vector<8x128xf32>
    %395 = arith.negf %394 : vector<8x128xf32>
    %396 = math.exp %395 : vector<8x128xf32>
    %cst_122 = arith.constant 1.000000e+00 : f32
    %397 = vector.broadcast %cst_122 : f32 to vector<8x128xf32>
    %398 = arith.addf %397, %396 : vector<8x128xf32>
    %399 = arith.divf %397, %398 : vector<8x128xf32>
    %400 = vector.extract_strided_slice %390 {offsets = [0, 128], sizes = [8, 128], strides = [1, 1]} : vector<8x384xf32> to vector<8x128xf32>
    %401 = vector.extract_strided_slice %391 {offsets = [0, 128], sizes = [8, 128], strides = [1, 1]} : vector<8x384xf32> to vector<8x128xf32>
    %402 = arith.addf %400, %401 : vector<8x128xf32>
    %403 = arith.negf %402 : vector<8x128xf32>
    %404 = math.exp %403 : vector<8x128xf32>
    %cst_123 = arith.constant 1.000000e+00 : f32
    %405 = vector.broadcast %cst_123 : f32 to vector<8x128xf32>
    %406 = arith.addf %405, %404 : vector<8x128xf32>
    %407 = arith.divf %405, %406 : vector<8x128xf32>
    %408 = vector.extract_strided_slice %390 {offsets = [0, 256], sizes = [8, 128], strides = [1, 1]} : vector<8x384xf32> to vector<8x128xf32>
    %409 = vector.extract_strided_slice %391 {offsets = [0, 256], sizes = [8, 128], strides = [1, 1]} : vector<8x384xf32> to vector<8x128xf32>
    %410 = vector.broadcast %307 : vector<1x128xf32> to vector<8x128xf32>
    %411 = arith.addf %409, %410 : vector<8x128xf32>
    %412 = arith.mulf %399, %411 : vector<8x128xf32>
    %413 = arith.addf %408, %412 : vector<8x128xf32>
    %414 = math.tanh %413 : vector<8x128xf32>
    %cst_124 = arith.constant 1.000000e+00 : f32
    %415 = vector.broadcast %cst_124 : f32 to vector<8x128xf32>
    %416 = arith.subf %415, %407 : vector<8x128xf32>
    %417 = arith.mulf %416, %414 : vector<8x128xf32>
    %418 = arith.mulf %407, %383 : vector<8x128xf32>
    %419 = arith.addf %417, %418 : vector<8x128xf32>
    %420 = arith.index_cast %c2_i32_118 : i32 to index
    %c0_125 = arith.constant 0 : index
    %c0_126 = arith.constant 0 : index
    %421 = vector.load %arg10[%420, %c0_125, %c0_126] : memref<8x8x128xf32, #tpu.memory_space<vmem>>, vector<1x8x128xf32>
    %422 = vector.shape_cast %421 : vector<1x8x128xf32> to vector<8x128xf32>
    %423 = vector.shape_cast %419 : vector<8x128xf32> to vector<1x8x128xf32>
    tpu.vector_store %arg10[%420, %c0_125, %c0_126], %423 {strides = array<i32>} : memref<8x8x128xf32, #tpu.memory_space<vmem>>, vector<1x8x128xf32>,
    %c3_i32_127 = arith.constant 3 : i32
    %424 = arith.index_cast %c3_i32_127 : i32 to index
    %c0_128 = arith.constant 0 : index
    %c0_129 = arith.constant 0 : index
    %425 = vector.load %arg11[%424, %c0_128, %c0_129] : memref<8x8x384xf32, #tpu.memory_space<vmem>>, vector<1x8x384xf32>
    %426 = vector.shape_cast %425 : vector<1x8x384xf32> to vector<8x384xf32>
    %cst_130 = arith.constant dense<0.000000e+00> : vector<8x384xf32>
    %427 = tpu.matmul %419, %305, %cst_130 {dimension_numbers = #tpu.dot_dimension_numbers<[1], [0], [0], [1], [0, 0, 1, 1], [], []>} : vector<8x128xf32>, vector<128x384xf32>, vector<8x384xf32> -> vector<8x384xf32>
    %428 = vector.extract_strided_slice %426 {offsets = [0, 0], sizes = [8, 128], strides = [1, 1]} : vector<8x384xf32> to vector<8x128xf32>
    %429 = vector.extract_strided_slice %427 {offsets = [0, 0], sizes = [8, 128], strides = [1, 1]} : vector<8x384xf32> to vector<8x128xf32>
    %430 = arith.addf %428, %429 : vector<8x128xf32>
    %431 = arith.negf %430 : vector<8x128xf32>
    %432 = math.exp %431 : vector<8x128xf32>
    %cst_131 = arith.constant 1.000000e+00 : f32
    %433 = vector.broadcast %cst_131 : f32 to vector<8x128xf32>
    %434 = arith.addf %433, %432 : vector<8x128xf32>
    %435 = arith.divf %433, %434 : vector<8x128xf32>
    %436 = vector.extract_strided_slice %426 {offsets = [0, 128], sizes = [8, 128], strides = [1, 1]} : vector<8x384xf32> to vector<8x128xf32>
    %437 = vector.extract_strided_slice %427 {offsets = [0, 128], sizes = [8, 128], strides = [1, 1]} : vector<8x384xf32> to vector<8x128xf32>
    %438 = arith.addf %436, %437 : vector<8x128xf32>
    %439 = arith.negf %438 : vector<8x128xf32>
    %440 = math.exp %439 : vector<8x128xf32>
    %cst_132 = arith.constant 1.000000e+00 : f32
    %441 = vector.broadcast %cst_132 : f32 to vector<8x128xf32>
    %442 = arith.addf %441, %440 : vector<8x128xf32>
    %443 = arith.divf %441, %442 : vector<8x128xf32>
    %444 = vector.extract_strided_slice %426 {offsets = [0, 256], sizes = [8, 128], strides = [1, 1]} : vector<8x384xf32> to vector<8x128xf32>
    %445 = vector.extract_strided_slice %427 {offsets = [0, 256], sizes = [8, 128], strides = [1, 1]} : vector<8x384xf32> to vector<8x128xf32>
    %446 = vector.broadcast %307 : vector<1x128xf32> to vector<8x128xf32>
    %447 = arith.addf %445, %446 : vector<8x128xf32>
    %448 = arith.mulf %435, %447 : vector<8x128xf32>
    %449 = arith.addf %444, %448 : vector<8x128xf32>
    %450 = math.tanh %449 : vector<8x128xf32>
    %cst_133 = arith.constant 1.000000e+00 : f32
    %451 = vector.broadcast %cst_133 : f32 to vector<8x128xf32>
    %452 = arith.subf %451, %443 : vector<8x128xf32>
    %453 = arith.mulf %452, %450 : vector<8x128xf32>
    %454 = arith.mulf %443, %419 : vector<8x128xf32>
    %455 = arith.addf %453, %454 : vector<8x128xf32>
    %456 = arith.index_cast %c3_i32_127 : i32 to index
    %c0_134 = arith.constant 0 : index
    %c0_135 = arith.constant 0 : index
    %457 = vector.load %arg10[%456, %c0_134, %c0_135] : memref<8x8x128xf32, #tpu.memory_space<vmem>>, vector<1x8x128xf32>
    %458 = vector.shape_cast %457 : vector<1x8x128xf32> to vector<8x128xf32>
    %459 = vector.shape_cast %455 : vector<8x128xf32> to vector<1x8x128xf32>
    tpu.vector_store %arg10[%456, %c0_134, %c0_135], %459 {strides = array<i32>} : memref<8x8x128xf32, #tpu.memory_space<vmem>>, vector<1x8x128xf32>,
    %c4_i32_136 = arith.constant 4 : i32
    %460 = arith.index_cast %c4_i32_136 : i32 to index
    %c0_137 = arith.constant 0 : index
    %c0_138 = arith.constant 0 : index
    %461 = vector.load %arg11[%460, %c0_137, %c0_138] : memref<8x8x384xf32, #tpu.memory_space<vmem>>, vector<1x8x384xf32>
    %462 = vector.shape_cast %461 : vector<1x8x384xf32> to vector<8x384xf32>
    %cst_139 = arith.constant dense<0.000000e+00> : vector<8x384xf32>
    %463 = tpu.matmul %455, %305, %cst_139 {dimension_numbers = #tpu.dot_dimension_numbers<[1], [0], [0], [1], [0, 0, 1, 1], [], []>} : vector<8x128xf32>, vector<128x384xf32>, vector<8x384xf32> -> vector<8x384xf32>
    %464 = vector.extract_strided_slice %462 {offsets = [0, 0], sizes = [8, 128], strides = [1, 1]} : vector<8x384xf32> to vector<8x128xf32>
    %465 = vector.extract_strided_slice %463 {offsets = [0, 0], sizes = [8, 128], strides = [1, 1]} : vector<8x384xf32> to vector<8x128xf32>
    %466 = arith.addf %464, %465 : vector<8x128xf32>
    %467 = arith.negf %466 : vector<8x128xf32>
    %468 = math.exp %467 : vector<8x128xf32>
    %cst_140 = arith.constant 1.000000e+00 : f32
    %469 = vector.broadcast %cst_140 : f32 to vector<8x128xf32>
    %470 = arith.addf %469, %468 : vector<8x128xf32>
    %471 = arith.divf %469, %470 : vector<8x128xf32>
    %472 = vector.extract_strided_slice %462 {offsets = [0, 128], sizes = [8, 128], strides = [1, 1]} : vector<8x384xf32> to vector<8x128xf32>
    %473 = vector.extract_strided_slice %463 {offsets = [0, 128], sizes = [8, 128], strides = [1, 1]} : vector<8x384xf32> to vector<8x128xf32>
    %474 = arith.addf %472, %473 : vector<8x128xf32>
    %475 = arith.negf %474 : vector<8x128xf32>
    %476 = math.exp %475 : vector<8x128xf32>
    %cst_141 = arith.constant 1.000000e+00 : f32
    %477 = vector.broadcast %cst_141 : f32 to vector<8x128xf32>
    %478 = arith.addf %477, %476 : vector<8x128xf32>
    %479 = arith.divf %477, %478 : vector<8x128xf32>
    %480 = vector.extract_strided_slice %462 {offsets = [0, 256], sizes = [8, 128], strides = [1, 1]} : vector<8x384xf32> to vector<8x128xf32>
    %481 = vector.extract_strided_slice %463 {offsets = [0, 256], sizes = [8, 128], strides = [1, 1]} : vector<8x384xf32> to vector<8x128xf32>
    %482 = vector.broadcast %307 : vector<1x128xf32> to vector<8x128xf32>
    %483 = arith.addf %481, %482 : vector<8x128xf32>
    %484 = arith.mulf %471, %483 : vector<8x128xf32>
    %485 = arith.addf %480, %484 : vector<8x128xf32>
    %486 = math.tanh %485 : vector<8x128xf32>
    %cst_142 = arith.constant 1.000000e+00 : f32
    %487 = vector.broadcast %cst_142 : f32 to vector<8x128xf32>
    %488 = arith.subf %487, %479 : vector<8x128xf32>
    %489 = arith.mulf %488, %486 : vector<8x128xf32>
    %490 = arith.mulf %479, %455 : vector<8x128xf32>
    %491 = arith.addf %489, %490 : vector<8x128xf32>
    %492 = arith.index_cast %c4_i32_136 : i32 to index
    %c0_143 = arith.constant 0 : index
    %c0_144 = arith.constant 0 : index
    %493 = vector.load %arg10[%492, %c0_143, %c0_144] : memref<8x8x128xf32, #tpu.memory_space<vmem>>, vector<1x8x128xf32>
    %494 = vector.shape_cast %493 : vector<1x8x128xf32> to vector<8x128xf32>
    %495 = vector.shape_cast %491 : vector<8x128xf32> to vector<1x8x128xf32>
    tpu.vector_store %arg10[%492, %c0_143, %c0_144], %495 {strides = array<i32>} : memref<8x8x128xf32, #tpu.memory_space<vmem>>, vector<1x8x128xf32>,
    %c5_i32_145 = arith.constant 5 : i32
    %496 = arith.index_cast %c5_i32_145 : i32 to index
    %c0_146 = arith.constant 0 : index
    %c0_147 = arith.constant 0 : index
    %497 = vector.load %arg11[%496, %c0_146, %c0_147] : memref<8x8x384xf32, #tpu.memory_space<vmem>>, vector<1x8x384xf32>
    %498 = vector.shape_cast %497 : vector<1x8x384xf32> to vector<8x384xf32>
    %cst_148 = arith.constant dense<0.000000e+00> : vector<8x384xf32>
    %499 = tpu.matmul %491, %305, %cst_148 {dimension_numbers = #tpu.dot_dimension_numbers<[1], [0], [0], [1], [0, 0, 1, 1], [], []>} : vector<8x128xf32>, vector<128x384xf32>, vector<8x384xf32> -> vector<8x384xf32>
    %500 = vector.extract_strided_slice %498 {offsets = [0, 0], sizes = [8, 128], strides = [1, 1]} : vector<8x384xf32> to vector<8x128xf32>
    %501 = vector.extract_strided_slice %499 {offsets = [0, 0], sizes = [8, 128], strides = [1, 1]} : vector<8x384xf32> to vector<8x128xf32>
    %502 = arith.addf %500, %501 : vector<8x128xf32>
    %503 = arith.negf %502 : vector<8x128xf32>
    %504 = math.exp %503 : vector<8x128xf32>
    %cst_149 = arith.constant 1.000000e+00 : f32
    %505 = vector.broadcast %cst_149 : f32 to vector<8x128xf32>
    %506 = arith.addf %505, %504 : vector<8x128xf32>
    %507 = arith.divf %505, %506 : vector<8x128xf32>
    %508 = vector.extract_strided_slice %498 {offsets = [0, 128], sizes = [8, 128], strides = [1, 1]} : vector<8x384xf32> to vector<8x128xf32>
    %509 = vector.extract_strided_slice %499 {offsets = [0, 128], sizes = [8, 128], strides = [1, 1]} : vector<8x384xf32> to vector<8x128xf32>
    %510 = arith.addf %508, %509 : vector<8x128xf32>
    %511 = arith.negf %510 : vector<8x128xf32>
    %512 = math.exp %511 : vector<8x128xf32>
    %cst_150 = arith.constant 1.000000e+00 : f32
    %513 = vector.broadcast %cst_150 : f32 to vector<8x128xf32>
    %514 = arith.addf %513, %512 : vector<8x128xf32>
    %515 = arith.divf %513, %514 : vector<8x128xf32>
    %516 = vector.extract_strided_slice %498 {offsets = [0, 256], sizes = [8, 128], strides = [1, 1]} : vector<8x384xf32> to vector<8x128xf32>
    %517 = vector.extract_strided_slice %499 {offsets = [0, 256], sizes = [8, 128], strides = [1, 1]} : vector<8x384xf32> to vector<8x128xf32>
    %518 = vector.broadcast %307 : vector<1x128xf32> to vector<8x128xf32>
    %519 = arith.addf %517, %518 : vector<8x128xf32>
    %520 = arith.mulf %507, %519 : vector<8x128xf32>
    %521 = arith.addf %516, %520 : vector<8x128xf32>
    %522 = math.tanh %521 : vector<8x128xf32>
    %cst_151 = arith.constant 1.000000e+00 : f32
    %523 = vector.broadcast %cst_151 : f32 to vector<8x128xf32>
    %524 = arith.subf %523, %515 : vector<8x128xf32>
    %525 = arith.mulf %524, %522 : vector<8x128xf32>
    %526 = arith.mulf %515, %491 : vector<8x128xf32>
    %527 = arith.addf %525, %526 : vector<8x128xf32>
    %528 = arith.index_cast %c5_i32_145 : i32 to index
    %c0_152 = arith.constant 0 : index
    %c0_153 = arith.constant 0 : index
    %529 = vector.load %arg10[%528, %c0_152, %c0_153] : memref<8x8x128xf32, #tpu.memory_space<vmem>>, vector<1x8x128xf32>
    %530 = vector.shape_cast %529 : vector<1x8x128xf32> to vector<8x128xf32>
    %531 = vector.shape_cast %527 : vector<8x128xf32> to vector<1x8x128xf32>
    tpu.vector_store %arg10[%528, %c0_152, %c0_153], %531 {strides = array<i32>} : memref<8x8x128xf32, #tpu.memory_space<vmem>>, vector<1x8x128xf32>,
    %c6_i32_154 = arith.constant 6 : i32
    %532 = arith.index_cast %c6_i32_154 : i32 to index
    %c0_155 = arith.constant 0 : index
    %c0_156 = arith.constant 0 : index
    %533 = vector.load %arg11[%532, %c0_155, %c0_156] : memref<8x8x384xf32, #tpu.memory_space<vmem>>, vector<1x8x384xf32>
    %534 = vector.shape_cast %533 : vector<1x8x384xf32> to vector<8x384xf32>
    %cst_157 = arith.constant dense<0.000000e+00> : vector<8x384xf32>
    %535 = tpu.matmul %527, %305, %cst_157 {dimension_numbers = #tpu.dot_dimension_numbers<[1], [0], [0], [1], [0, 0, 1, 1], [], []>} : vector<8x128xf32>, vector<128x384xf32>, vector<8x384xf32> -> vector<8x384xf32>
    %536 = vector.extract_strided_slice %534 {offsets = [0, 0], sizes = [8, 128], strides = [1, 1]} : vector<8x384xf32> to vector<8x128xf32>
    %537 = vector.extract_strided_slice %535 {offsets = [0, 0], sizes = [8, 128], strides = [1, 1]} : vector<8x384xf32> to vector<8x128xf32>
    %538 = arith.addf %536, %537 : vector<8x128xf32>
    %539 = arith.negf %538 : vector<8x128xf32>
    %540 = math.exp %539 : vector<8x128xf32>
    %cst_158 = arith.constant 1.000000e+00 : f32
    %541 = vector.broadcast %cst_158 : f32 to vector<8x128xf32>
    %542 = arith.addf %541, %540 : vector<8x128xf32>
    %543 = arith.divf %541, %542 : vector<8x128xf32>
    %544 = vector.extract_strided_slice %534 {offsets = [0, 128], sizes = [8, 128], strides = [1, 1]} : vector<8x384xf32> to vector<8x128xf32>
    %545 = vector.extract_strided_slice %535 {offsets = [0, 128], sizes = [8, 128], strides = [1, 1]} : vector<8x384xf32> to vector<8x128xf32>
    %546 = arith.addf %544, %545 : vector<8x128xf32>
    %547 = arith.negf %546 : vector<8x128xf32>
    %548 = math.exp %547 : vector<8x128xf32>
    %cst_159 = arith.constant 1.000000e+00 : f32
    %549 = vector.broadcast %cst_159 : f32 to vector<8x128xf32>
    %550 = arith.addf %549, %548 : vector<8x128xf32>
    %551 = arith.divf %549, %550 : vector<8x128xf32>
    %552 = vector.extract_strided_slice %534 {offsets = [0, 256], sizes = [8, 128], strides = [1, 1]} : vector<8x384xf32> to vector<8x128xf32>
    %553 = vector.extract_strided_slice %535 {offsets = [0, 256], sizes = [8, 128], strides = [1, 1]} : vector<8x384xf32> to vector<8x128xf32>
    %554 = vector.broadcast %307 : vector<1x128xf32> to vector<8x128xf32>
    %555 = arith.addf %553, %554 : vector<8x128xf32>
    %556 = arith.mulf %543, %555 : vector<8x128xf32>
    %557 = arith.addf %552, %556 : vector<8x128xf32>
    %558 = math.tanh %557 : vector<8x128xf32>
    %cst_160 = arith.constant 1.000000e+00 : f32
    %559 = vector.broadcast %cst_160 : f32 to vector<8x128xf32>
    %560 = arith.subf %559, %551 : vector<8x128xf32>
    %561 = arith.mulf %560, %558 : vector<8x128xf32>
    %562 = arith.mulf %551, %527 : vector<8x128xf32>
    %563 = arith.addf %561, %562 : vector<8x128xf32>
    %564 = arith.index_cast %c6_i32_154 : i32 to index
    %c0_161 = arith.constant 0 : index
    %c0_162 = arith.constant 0 : index
    %565 = vector.load %arg10[%564, %c0_161, %c0_162] : memref<8x8x128xf32, #tpu.memory_space<vmem>>, vector<1x8x128xf32>
    %566 = vector.shape_cast %565 : vector<1x8x128xf32> to vector<8x128xf32>
    %567 = vector.shape_cast %563 : vector<8x128xf32> to vector<1x8x128xf32>
    tpu.vector_store %arg10[%564, %c0_161, %c0_162], %567 {strides = array<i32>} : memref<8x8x128xf32, #tpu.memory_space<vmem>>, vector<1x8x128xf32>,
    %c7_i32_163 = arith.constant 7 : i32
    %568 = arith.index_cast %c7_i32_163 : i32 to index
    %c0_164 = arith.constant 0 : index
    %c0_165 = arith.constant 0 : index
    %569 = vector.load %arg11[%568, %c0_164, %c0_165] : memref<8x8x384xf32, #tpu.memory_space<vmem>>, vector<1x8x384xf32>
    %570 = vector.shape_cast %569 : vector<1x8x384xf32> to vector<8x384xf32>
    %cst_166 = arith.constant dense<0.000000e+00> : vector<8x384xf32>
    %571 = tpu.matmul %563, %305, %cst_166 {dimension_numbers = #tpu.dot_dimension_numbers<[1], [0], [0], [1], [0, 0, 1, 1], [], []>} : vector<8x128xf32>, vector<128x384xf32>, vector<8x384xf32> -> vector<8x384xf32>
    %572 = vector.extract_strided_slice %570 {offsets = [0, 0], sizes = [8, 128], strides = [1, 1]} : vector<8x384xf32> to vector<8x128xf32>
    %573 = vector.extract_strided_slice %571 {offsets = [0, 0], sizes = [8, 128], strides = [1, 1]} : vector<8x384xf32> to vector<8x128xf32>
    %574 = arith.addf %572, %573 : vector<8x128xf32>
    %575 = arith.negf %574 : vector<8x128xf32>
    %576 = math.exp %575 : vector<8x128xf32>
    %cst_167 = arith.constant 1.000000e+00 : f32
    %577 = vector.broadcast %cst_167 : f32 to vector<8x128xf32>
    %578 = arith.addf %577, %576 : vector<8x128xf32>
    %579 = arith.divf %577, %578 : vector<8x128xf32>
    %580 = vector.extract_strided_slice %570 {offsets = [0, 128], sizes = [8, 128], strides = [1, 1]} : vector<8x384xf32> to vector<8x128xf32>
    %581 = vector.extract_strided_slice %571 {offsets = [0, 128], sizes = [8, 128], strides = [1, 1]} : vector<8x384xf32> to vector<8x128xf32>
    %582 = arith.addf %580, %581 : vector<8x128xf32>
    %583 = arith.negf %582 : vector<8x128xf32>
    %584 = math.exp %583 : vector<8x128xf32>
    %cst_168 = arith.constant 1.000000e+00 : f32
    %585 = vector.broadcast %cst_168 : f32 to vector<8x128xf32>
    %586 = arith.addf %585, %584 : vector<8x128xf32>
    %587 = arith.divf %585, %586 : vector<8x128xf32>
    %588 = vector.extract_strided_slice %570 {offsets = [0, 256], sizes = [8, 128], strides = [1, 1]} : vector<8x384xf32> to vector<8x128xf32>
    %589 = vector.extract_strided_slice %571 {offsets = [0, 256], sizes = [8, 128], strides = [1, 1]} : vector<8x384xf32> to vector<8x128xf32>
    %590 = vector.broadcast %307 : vector<1x128xf32> to vector<8x128xf32>
    %591 = arith.addf %589, %590 : vector<8x128xf32>
    %592 = arith.mulf %579, %591 : vector<8x128xf32>
    %593 = arith.addf %588, %592 : vector<8x128xf32>
    %594 = math.tanh %593 : vector<8x128xf32>
    %cst_169 = arith.constant 1.000000e+00 : f32
    %595 = vector.broadcast %cst_169 : f32 to vector<8x128xf32>
    %596 = arith.subf %595, %587 : vector<8x128xf32>
    %597 = arith.mulf %596, %594 : vector<8x128xf32>
    %598 = arith.mulf %587, %563 : vector<8x128xf32>
    %599 = arith.addf %597, %598 : vector<8x128xf32>
    %600 = arith.index_cast %c7_i32_163 : i32 to index
    %c0_170 = arith.constant 0 : index
    %c0_171 = arith.constant 0 : index
    %601 = vector.load %arg10[%600, %c0_170, %c0_171] : memref<8x8x128xf32, #tpu.memory_space<vmem>>, vector<1x8x128xf32>
    %602 = vector.shape_cast %601 : vector<1x8x128xf32> to vector<8x128xf32>
    %603 = vector.shape_cast %599 : vector<8x128xf32> to vector<1x8x128xf32>
    tpu.vector_store %arg10[%600, %c0_170, %c0_171], %603 {strides = array<i32>} : memref<8x8x128xf32, #tpu.memory_space<vmem>>, vector<1x8x128xf32>,
    %c8_i32_172 = arith.constant 8 : i32
    %c0_173 = arith.constant 0 : index
    %c0_174 = arith.constant 0 : index
    %604 = vector.load %arg14[%c0_173, %c0_174] : memref<8x128xf32, #tpu.memory_space<vmem>>, vector<8x128xf32>
    tpu.vector_store %arg14[%c0_173, %c0_174], %599 {strides = array<i32>} : memref<8x128xf32, #tpu.memory_space<vmem>>, vector<8x128xf32>,
    return
  }
  func.func @transform_0(%arg0: i32) -> (i32, i32, i32) {
    %c0_i32 = arith.constant 0 : i32
    %c0_i32_0 = arith.constant 0 : i32
    %c0_i32_1 = arith.constant 0 : i32
    return %arg0, %c0_i32, %c0_i32_0 : i32, i32, i32
  }
  func.func @transform_1(%arg0: i32) -> (i32, i32) {
    %c0_i32 = arith.constant 0 : i32
    %c0_i32_0 = arith.constant 0 : i32
    %c0_i32_1 = arith.constant 0 : i32
    return %c0_i32, %c0_i32_0 : i32, i32
  }
  func.func @transform_2(%arg0: i32) -> (i32, i32) {
    %c0_i32 = arith.constant 0 : i32
    %c0_i32_0 = arith.constant 0 : i32
    %c0_i32_1 = arith.constant 0 : i32
    return %c0_i32, %c0_i32_0 : i32, i32
  }
  func.func @transform_3(%arg0: i32) -> (i32, i32) {
    %c0_i32 = arith.constant 0 : i32
    %c0_i32_0 = arith.constant 0 : i32
    %c0_i32_1 = arith.constant 0 : i32
    return %c0_i32, %c0_i32_0 : i32, i32
  }
  func.func @transform_4(%arg0: i32) -> (i32, i32) {
    %c0_i32 = arith.constant 0 : i32
    %c0_i32_0 = arith.constant 0 : i32
    %c0_i32_1 = arith.constant 0 : i32
    return %c0_i32, %c0_i32_0 : i32, i32
  }
  func.func @transform_5(%arg0: i32) -> (i32, i32) {
    %c0_i32 = arith.constant 0 : i32
    %c0_i32_0 = arith.constant 0 : i32
    %c0_i32_1 = arith.constant 0 : i32
    return %c0_i32, %c0_i32_0 : i32, i32
  }
  func.func @transform_6(%arg0: i32) -> (i32, i32) {
    %c0_i32 = arith.constant 0 : i32
    %c0_i32_0 = arith.constant 0 : i32
    %c0_i32_1 = arith.constant 0 : i32
    return %c0_i32, %c0_i32_0 : i32, i32
  }
  func.func @transform_7(%arg0: i32) -> (i32, i32) {
    %c0_i32 = arith.constant 0 : i32
    %c0_i32_0 = arith.constant 0 : i32
    %c0_i32_1 = arith.constant 0 : i32
    return %c0_i32, %c0_i32_0 : i32, i32
  }
  func.func @transform_8(%arg0: i32) -> (i32, i32) {
    %c0_i32 = arith.constant 0 : i32
    %c0_i32_0 = arith.constant 0 : i32
    %c0_i32_1 = arith.constant 0 : i32
    return %c0_i32, %c0_i32_0 : i32, i32
  }
  func.func @transform_9(%arg0: i32) -> (i32, i32, i32) {
    %c0_i32 = arith.constant 0 : i32
    %c0_i32_0 = arith.constant 0 : i32
    %c0_i32_1 = arith.constant 0 : i32
    return %arg0, %c0_i32, %c0_i32_0 : i32, i32, i32
  }
}

</mosaic_0001>

<bundles_post_ra>
// kernel: rnn_net_forward.1
= control target key start
LH: loop header
LB: loop body
LE: loop exit
PB: predicated region body
PF: predicated region fallthrough
CT: control target
= control target key end

     0   :  { %v5641_v3 = vmov 0.0   ;;  %vm118_vm0 = vcmask 130048   ;;  %v5642_v48 = vmov 0.0|0.0   ;;  %vm5643_vm1 = vmmov 0   ;;  %s7109_s1 = inlined_call_operand.vmem [shape: f32[16,384], index: 1, kind: input, shape index: {}]   ;;  %s7110_s0 = inlined_call_operand.vmem [shape: f32[8,8,16], index: 0, kind: input, shape index: {}]   ;;  %s7111_s2 = inlined_call_operand.vmem [shape: f32[128,384], index: 2, kind: input, shape index: {}]   ;;  %s7112_s3 = inlined_call_operand.vmem [shape: f32[1,384], index: 3, kind: input, shape index: {}]   ;;  %s7113_s4 = inlined_call_operand.vmem [shape: f32[1,128], index: 4, kind: input, shape index: {}]   ;;  %s7114_s5 = inlined_call_operand.vmem [shape: f32[128,384], index: 5, kind: input, shape index: {}]   ;;  %s7115_s6 = inlined_call_operand.vmem [shape: f32[128,384], index: 6, kind: input, shape index: {}]   ;;  %s7116_s7 = inlined_call_operand.vmem [shape: f32[1,384], index: 7, kind: input, shape index: {}]   ;;  %s7117_s8 = inlined_call_operand.vmem [shape: f32[1,128], index: 8, kind: input, shape index: {}]   ;;  %s7118_s9 = inlined_call_operand.vmem [shape: f32[8,8,128], index: 9, kind: output, shape index: {}]  }
   0x1   :  { %v39_v0 = vld [vmem:[%s7109_s1 + $0x8] sm:$0xff]  ;;  %v42_v1 = vld [vmem:[%s7109_s1 + $0x20] sm:$0xff]  ;;  %207 = vmatprep.mubr.f32.mxu0 %v5641_v3  ;;  %v41_v5 = vld [vmem:[%s7109_s1 + $0x18] sm:$0xff] }
   0x2   :  { %v38_v2 = vld [vmem:[%s7109_s1] sm:$0xff]  ;;  %v4445_v4 = vpack.c.bf16 %v42_v1, %v39_v0  ;;  %v45_v7 = vld [vmem:[%s7111_s2 + $0x8] sm:$0xff]  ;;  %v47_v11 = vld [vmem:[%s7111_s2 + $0x18] sm:$0xff] }
   0x3   :  { %v94_v6 = vld [vmem:[%s7110_s0] sm:$0xff]  ;;  %v4447_v8 = vpack.c.bf16 %v41_v5, %v38_v2  ;;  %v51_v13 = vld [vmem:[%s7111_s2 + $0x38] sm:$0xff]  ;;  %v54_v14 = vld [vmem:[%s7111_s2 + $0x50] sm:$0xff] }
   0x4   :  { %v48_v9 = vld [vmem:[%s7111_s2 + $0x20] sm:$0xff]  ;;  %3829 = vmatprep.mubr.msk.f32.mxu1 %vm118_vm0, %v94_v6  ;;  %4446 = vmatprep.subr.bf16.mxu0 %v4445_v4  ;;  %v5734_v16 = vpack.c.bf16 %v54_v14, %v51_v13  ;;  %v50_v17 = vld [vmem:[%s7111_s2 + $0x30] sm:$0xff]  ;;  %v53_v18 = vld [vmem:[%s7111_s2 + $0x48] sm:$0xff] }
   0x5   :  { %v44_v10 = vld [vmem:[%s7111_s2] sm:$0xff]  ;;  %v5723_v12 = vpack.c.bf16 %v48_v9, %v45_v7  ;;  %4448 = vmatpush1.bf16.msra.mxu0 %v4447_v8  ;;  %v57_v19 = vld [vmem:[%s7111_s2 + $0x68] sm:$0xff]  ;;  %v5754_v22 = vpack.c.bf16 %v53_v18, %v50_v17  ;;  %v59_v25 = vld [vmem:[%s7111_s2 + $0x78] sm:$0xff] }
   0x6   :  { %v5731_v15 = vpack.c.bf16 %v47_v11, %v44_v10  ;;  %v60_v20 = vld [vmem:[%s7111_s2 + $0x80] sm:$0xff]  ;;  %v95_v21 = vld [vmem:[%s7110_s0 + $0x8] sm:$0xff]  ;;  %v63_v26 = vld [vmem:[%s7111_s2 + $0x98] sm:$0xff] }
   0x7   :  { %4454 = vmatprep.subr.bf16.mxu0 %v5723_v12  ;;  %v5757_v23 = vpack.c.bf16 %v60_v20, %v57_v19  ;;  %v56_v24 = vld [vmem:[%s7111_s2 + $0x60] sm:$0xff]  ;;  %v66_v27 = vld [vmem:[%s7111_s2 + $0xb0] sm:$0xff]  ;;  %v43_v29 = vld [vmem:[%s7109_s1 + $0x28] sm:$0xff] }
   0x8   :  { %3462 = vmatmul.mubr.msk.f32.vlgmr.msra.gmra.mrb[0].mxu0 %vm118_vm0, %v94_v6  ;;  %v40_v28 = vld [vmem:[%s7109_s1 + $0x10] sm:$0xff]  ;;  %v5783_v31 = vpack.c.bf16 %v59_v25, %v56_v24  ;;  %v5786_v33 = vpack.c.bf16 %v66_v27, %v63_v26  ;;  %v65_v35 = vld [vmem:[%s7111_s2 + $0xa8] sm:$0xff]  ;;  %v72_v38 = vld [vmem:[%s7111_s2 + $0xe0] sm:$0xff] }
   0x9   :  { %4456 = vmatpush1.bf16.msra.mxu0 %v5731_v15  ;;  %213 = vmatprep.mubr.f32.mxu0 %v5641_v3  ;;  %v96_v30 = vld [vmem:[%s7110_s0 + $0x10] sm:$0xff]  ;;  %v4449_v32 = vpack.c.bf16 %v43_v29, %v40_v28  ;;  %v69_v37 = vld [vmem:[%s7111_s2 + $0xc8] sm:$0xff]  ;;  %v97_v41 = vld [vmem:[%s7110_s0 + $0x18] sm:$0xff] }
   0xa   :  { %4458 = vmatprep.subr.bf16.mxu0 %v5734_v16  ;;  %v62_v34 = vld [vmem:[%s7111_s2 + $0x90] sm:$0xff]  ;;  %v49_v39 = vld [vmem:[%s7111_s2 + $0x28] sm:$0xff]  ;;  %v52_v43 = vld [vmem:[%s7111_s2 + $0x40] sm:$0xff]  ;;  %v5823_v45 = vpack.c.bf16 %v72_v38, %v69_v37 }
   0xb   :  { %v46_v36 = vld [vmem:[%s7111_s2 + $0x10] sm:$0xff]  ;;  %4450 = vmatprep.subr.bf16.mxu1 %v4449_v32  ;;  %v5814_v42 = vpack.c.bf16 %v65_v35, %v62_v34  ;;  %v55_v44 = vld [vmem:[%s7111_s2 + $0x58] sm:$0xff]  ;;  %v68_v46 = vld [vmem:[%s7111_s2 + $0xc0] sm:$0xff]  ;;  %v103_v35 = vlaneseq }
   0xc   :  { %3463 = vmatmul.mubr.msk.f32.gmra.mrb[2].mxu0 %vm118_vm0, %v95_v21  ;;  %4452 = vmatpush3.bf16.msra.mxu1 %v4449_v32  ;;  %v5807_v40 = vpack.c.bf16 %v49_v39, %v46_v36  ;;  %v71_v47 = vld [vmem:[%s7111_s2 + $0xd8] sm:$0xff]  ;;  %v78_v50 = vld [vmem:[%s7111_s2 + $0x110] sm:$0xff]  ;;  %v5841_v51 = vpack.c.bf16 %v55_v44, %v52_v43  ;;  %v98_v52 = vld [vmem:[%s7110_s0 + $0x20] sm:$0xff] }
   0xd   :  { %4460 = vmatpush1.bf16.msra.mxu0 %v5754_v22  ;;  %219 = vmatprep.mubr.f32.mxu0 %v5641_v3  ;;  %v75_v49 = vld [vmem:[%s7111_s2 + $0xf8] sm:$0xff]  ;;  %v5848_v53 = vpack.c.bf16 %v71_v47, %v68_v46  ;;  %v58_v54 = vld [vmem:[%s7111_s2 + $0x70] sm:$0xff]  ;;  %v61_v55 = vld [vmem:[%s7111_s2 + $0x88] sm:$0xff]  ;;  %v6026_v36 = vshrl.u32 %v103_v35, 7 }
   0xe   :  { %4462 = vmatprep.subr.bf16.mxu0 %v5757_v23  ;;  %4485 = vmatprep.subr.bf16.mxu1 %v5642_v48  ;;  %v5857_v56 = vpack.c.bf16 %v78_v50, %v75_v49  ;;  %v74_v57 = vld [vmem:[%s7111_s2 + $0xf0] sm:$0xff]  ;;  %v77_v58 = vld [vmem:[%s7111_s2 + $0x108] sm:$0xff]  ;;  %v84_v60 = vld [vmem:[%s7111_s2 + $0x140] sm:$0xff]  ;;  %v5875_v61 = vpack.c.bf16 %v61_v55, %v58_v54 }
   0xf   :  { %3830 = vmatmul.mubr.msk.f32.vlgmr.msra.gmra.mrb[0].mxu1 %vm118_vm0, %v95_v21  ;;  %v81_v59 = vld [vmem:[%s7111_s2 + $0x128] sm:$0xff]  ;;  %v5882_v63 = vpack.c.bf16 %v77_v58, %v74_v57  ;;  %v64_v0 = vld [vmem:[%s7111_s2 + $0xa0] sm:$0xff]  ;;  %v67_v1 = vld [vmem:[%s7111_s2 + $0xb8] sm:$0xff]  ;;  %v113_v37 = vsub.s32 2, %v6026_v36  ;;  %v109_v55 = vsub.s32 1, %v6026_v36 }
  0x10   :  { %3464 = vmatmul.mubr.msk.f32.gmra.mrb[4].mxu0 %vm118_vm0, %v96_v30  ;;  %4487 = vmatpush3.bf16.msra.mxu1 %v5807_v40  ;;  %v99_v62 = vld [vmem:[%s7110_s0 + $0x28] sm:$0xff]  ;;  %v5891_v2 = vpack.c.bf16 %v84_v60, %v81_v59  ;;  %v80_v4 = vld [vmem:[%s7111_s2 + $0x120] sm:$0xff]  ;;  %v83_v5 = vld [vmem:[%s7111_s2 + $0x138] sm:$0xff]  ;;  %v5909_v8 = vpack.c.bf16 %v67_v1, %v64_v0 }
  0x11   :  { %4464 = vmatpush1.bf16.msra.mxu0 %v5783_v31  ;;  %225 = vmatprep.mubr.f32.mxu0 %v5641_v3  ;;  %v87_v6 = vld [vmem:[%s7111_s2 + $0x158] sm:$0xff]  ;;  %v90_v7 = vld [vmem:[%s7111_s2 + $0x170] sm:$0xff]  ;;  %v5916_v10 = vpack.c.bf16 %v83_v5, %v80_v4  ;;  %v73_v13 = vld [vmem:[%s7111_s2 + $0xe8] sm:$0xff] }
  0x12   :  { %4466 = vmatprep.subr.bf16.mxu0 %v5786_v33  ;;  %4488 = vmatprep.subr.bf16.mxu1 %v5642_v48  ;;  %v100_v9 = vld [vmem:[%s7110_s0 + $0x30] sm:$0xff]  ;;  %v5925_v14 = vpack.c.bf16 %v90_v7, %v87_v6  ;;  %v89_v18 = vld [vmem:[%s7111_s2 + $0x168] sm:$0xff]  ;;  %v101_v20 = vld [vmem:[%s7110_s0 + $0x38] sm:$0xff] }
  0x13   :  { %3832 = vmatprep.mubr.msk.f32.mxu1 %vm118_vm0, %v96_v30  ;;  %v70_v11 = vld [vmem:[%s7111_s2 + $0xd0] sm:$0xff]  ;;  %v76_v24 = vld [vmem:[%s7111_s2 + $0x100] sm:$0xff]  ;;  %v79_v25 = vld [vmem:[%s7111_s2 + $0x118] sm:$0xff] }
  0x14   :  { %3465 = vmatmul.mubr.msk.f32.gmra.mrb[6].mxu0 %vm118_vm0, %v97_v41  ;;  %4490 = vmatpush3.bf16.msra.mxu1 %v5841_v51  ;;  %v86_v17 = vld [vmem:[%s7111_s2 + $0x150] sm:$0xff]  ;;  %v5937_v19 = vpack.c.bf16 %v73_v13, %v70_v11  ;;  %v5957_v26 = vpack.c.bf16 %v79_v25, %v76_v24  ;;  %v85_v28 = vld [vmem:[%s7111_s2 + $0x148] sm:$0xff]  ;;  %v88_v30 = vld [vmem:[%s7111_s2 + $0x160] sm:$0xff] }
  0x15   :  { %4468 = vmatpush1.bf16.msra.mxu0 %v5814_v42  ;;  %231 = vmatprep.mubr.f32.mxu0 %v5641_v3  ;;  %v5944_v21 = vpack.c.bf16 %v89_v18, %v86_v17  ;;  %v82_v27 = vld [vmem:[%s7111_s2 + $0x130] sm:$0xff]  ;;  %v91_v32 = vld [vmem:[%s7111_s2 + $0x178] sm:$0xff]  ;;  %v92_v38 = vld [vmem:[%s7112_s3] sm:$0x7] }
  0x16   :  { %4470 = vmatprep.subr.bf16.mxu0 %v5823_v45  ;;  %4491 = vmatprep.subr.bf16.mxu1 %v5642_v48  ;;  %v5973_v29 = vpack.c.bf16 %v85_v28, %v82_v27  ;;  %v5988_v34 = vpack.c.bf16 %v91_v32, %v88_v30  ;;  %v114_v39 = vrot.slane %v92_v38, %v113_v37  ;;  %v6063_v28 = vld [vmem:[%s7113_s4] ss:$0 sm:$0xff] }
  0x17   :  { %3833 = vmatmul.mubr.msk.f32.gmra.mrb[2].mxu1 %vm118_vm0, %v97_v41  ;;  %v6052_v1 = vrot.slane %v92_v38, %v109_v55 }
  0x18   :  { %3466 = vmatmul.mubr.msk.f32.gmra.mrb[8].mxu0 %vm118_vm0, %v98_v52  ;;  %4493 = vmatpush3.bf16.msra.mxu1 %v5875_v61 }
  0x19   :  { %4472 = vmatpush1.bf16.msra.mxu0 %v5848_v53  ;;  %237 = vmatprep.mubr.f32.mxu0 %v5641_v3 }
  0x1a   :  { %4474 = vmatprep.subr.bf16.mxu0 %v5857_v56  ;;  %4494 = vmatprep.subr.bf16.mxu1 %v5642_v48 }
  0x1b   :  { %3835 = vmatprep.mubr.msk.f32.mxu1 %vm118_vm0, %v98_v52  ;;  %v105_v52 = vsub.s32 0, %v6026_v36 }
  0x1c   :  { %3467 = vmatmul.mubr.msk.f32.gmra.mrb[10].mxu0 %vm118_vm0, %v99_v62  ;;  %4496 = vmatpush3.bf16.msra.mxu1 %v5909_v8 }
  0x1d   :  { %4476 = vmatpush1.bf16.msra.mxu0 %v5882_v63  ;;  %243 = vmatprep.mubr.f32.mxu0 %v5641_v3  ;;  %v6046_v59 = vrot.slane %v92_v38, %v105_v52 }
  0x1e   :  { %4478 = vmatprep.subr.bf16.mxu0 %v5891_v2  ;;  %4497 = vmatprep.subr.bf16.mxu1 %v5642_v48 }
  0x1f   :  { %3836 = vmatmul.mubr.msk.f32.gmra.mrb[4].mxu1 %vm118_vm0, %v99_v62 }
  0x20   :  { %3468 = vmatmul.mubr.msk.f32.gmra.mrb[12].mxu0 %vm118_vm0, %v100_v9  ;;  %4499 = vmatpush3.bf16.msra.mxu1 %v5937_v19 }
  0x21   :  { %4480 = vmatpush1.bf16.msra.mxu0 %v5916_v10  ;;  %249 = vmatprep.mubr.f32.mxu0 %v5641_v3 }
  0x22   :  { %4482 = vmatprep.subr.bf16.mxu0 %v5925_v14  ;;  %4500 = vmatprep.subr.bf16.mxu1 %v5642_v48 }
  0x23   :  { %3838 = vmatprep.mubr.msk.f32.mxu1 %vm118_vm0, %v100_v9 }
  0x24   :  { %3469 = vmatmul.mubr.msk.f32.gmra.mrb[14].mxu0 %vm118_vm0, %v101_v20  ;;  %3839 = vmatmul.mubr.msk.f32.gmra.mrb[6].mxu1 %vm118_vm0, %v101_v20 }
  0x25   :  { %4484 = vmatpush1.bf16.msra.mxu0 %v5944_v21  ;;  %453 = vmatprep.mubr.f32.mxu0 %v5641_v3 }
  0x26   :  { %4510 = vmatprep.subr.bf16.mxu0 %v5723_v12  ;;  %4502 = vmatpush3.bf16.msra.mxu1 %v5957_v26 }
  0x27   :  { %4503 = vmatprep.subr.bf16.mxu1 %v5642_v48  ;;  %3873 = vmatprep.mubr.msk.f32.mxu1 %vm5643_vm1, %v5641_v3 }
  0x28   :  { %454 = vmatmul.mubr.f32.vlgmr.msra.gmra.mrb[0].mxu0 %v5641_v3 }
  0x29   :  { %4512 = vmatpush1.bf16.msra.mxu0 %v5731_v15  ;;  %627 = vmatprep.mubr.f32.mxu0 %v5641_v3 }
  0x2a   :  { %4514 = vmatprep.subr.bf16.mxu0 %v5734_v16  ;;  %4505 = vmatpush3.bf16.msra.mxu1 %v5973_v29 }
  0x2b   :  { %4506 = vmatprep.subr.bf16.mxu1 %v5642_v48 }
  0x2d   :  { %4516 = vmatpush1.bf16.msra.mxu0 %v5754_v22 }
  0x2e   :  { %4518 = vmatprep.subr.bf16.mxu0 %v5757_v23  ;;  %4508 = vmatpush3.bf16.msra.mxu1 %v5988_v34 }
  0x2f   :  { %4541 = vmatprep.subr.bf16.mxu1 %v5642_v48 }
  0x31   :  { %4520 = vmatpush1.bf16.msra.mxu0 %v5783_v31  ;;  %3874 = vmatmul.mubr.f32.vlgmr.msra.gmra.mrb[8].mxu1 %v5641_v3 }
  0x32   :  { %4522 = vmatprep.subr.bf16.mxu0 %v5786_v33  ;;  %4543 = vmatpush3.bf16.msra.mxu1 %v5807_v40 }
  0x33   :  { %3908 = vmatprep.mubr.msk.f32.mxu1 %vm5643_vm1, %v5641_v3  ;;  %4544 = vmatprep.subr.bf16.mxu1 %v5642_v48 }
  0x35   :  { %4524 = vmatpush1.bf16.msra.mxu0 %v5814_v42 }
  0x36   :  { %4526 = vmatprep.subr.bf16.mxu0 %v5823_v45  ;;  %4546 = vmatpush3.bf16.msra.mxu1 %v5841_v51 }
  0x37   :  { %4547 = vmatprep.subr.bf16.mxu1 %v5642_v48 }
  0x39   :  { %4528 = vmatpush1.bf16.msra.mxu0 %v5848_v53 }
  0x3a   :  { %4530 = vmatprep.subr.bf16.mxu0 %v5857_v56  ;;  %4549 = vmatpush3.bf16.msra.mxu1 %v5875_v61 }
  0x3b   :  { %4550 = vmatprep.subr.bf16.mxu1 %v5642_v48 }
  0x3d   :  { %4532 = vmatpush1.bf16.msra.mxu0 %v5882_v63 }
  0x3e   :  { %4534 = vmatprep.subr.bf16.mxu0 %v5891_v2  ;;  %4552 = vmatpush3.bf16.msra.mxu1 %v5909_v8 }
  0x3f   :  { %4553 = vmatprep.subr.bf16.mxu1 %v5642_v48 }
  0x41   :  { %4536 = vmatpush1.bf16.msra.mxu0 %v5916_v10 }
  0x42   :  { %4538 = vmatprep.subr.bf16.mxu0 %v5925_v14  ;;  %4555 = vmatpush3.bf16.msra.mxu1 %v5937_v19 }
  0x43   :  { %4556 = vmatprep.subr.bf16.mxu1 %v5642_v48 }
  0x45   :  { %4540 = vmatpush1.bf16.msra.mxu0 %v5944_v21 }
  0x46   :  { %4566 = vmatprep.subr.bf16.mxu0 %v5723_v12  ;;  %4558 = vmatpush3.bf16.msra.mxu1 %v5957_v26 }
  0x47   :  { %4559 = vmatprep.subr.bf16.mxu1 %v5642_v48 }
  0x4a   :  { %4561 = vmatpush3.bf16.msra.mxu1 %v5973_v29 }
  0x4b   :  { %4562 = vmatprep.subr.bf16.mxu1 %v5642_v48 }
  0x4e   :  { %4564 = vmatpush3.bf16.msra.mxu1 %v5988_v34 }
  0x4f   :  { %4597 = vmatprep.subr.bf16.mxu1 %v5642_v48 }
  0xe2   :  { %v3831_v41 = vpop.f32.mrb[0].mxu1 }
  0xe3   :  { %v6034_v43 = vadd.f32 %v3831_v41, %v114_v39  ;;  %v322_v44 = vpop.f32.mrb[1].mxu1 }
  0xe4   :  { %v323_v38 = vadd.f32 %v322_v44, %v114_v39 }
  0xea   :  { %v3834_v46 = vpop.f32.mrb[2].mxu1 }
  0xeb   :  { %v6036_v47 = vadd.f32 %v3834_v46, %v114_v39  ;;  %v332_v49 = vpop.f32.mrb[3].mxu1 }
  0xec   :  { %v6038_v50 = vadd.f32 %v332_v49, %v114_v39 }
  0xf2   :  { %v3837_v54 = vpop.f32.mrb[4].mxu1 }
  0xf3   :  { %v6042_v57 = vadd.f32 %v3837_v54, %v114_v39  ;;  %v342_v58 = vpop.f32.mrb[5].mxu1 }
  0xf4   :  { %v6048_v60 = vadd.f32 %v342_v58, %v114_v39 }
  0xf7   :  { %v3840_v62 = vpop.f32.mrb[6].mxu1 }
  0xf8   :  { %v6054_v4 = vadd.f32 %v3840_v62, %v114_v39  ;;  %v352_v5 = vpop.f32.mrb[7].mxu1 }
  0xf9   :  { %v6057_v9 = vadd.f32 %v352_v5, %v114_v39 }
  0xfb   :  { %v455_v0 = vpop.f32.mrb[0].mxu0 }
  0xfc   :  { %v5413_v6 = vadd.f32 %v455_v0, %v6046_v59  ;;  %v457_v7 = vpop.f32.mrb[1].mxu0 }
  0xfd   :  { %v5414_v13 = vadd.f32 %v457_v7, %v6052_v1 }
  0xfe   :  { %v3478_v11 = vmul.f32 -1.442695, %v5413_v6 }
  0xff   :  { %v3479_v17 = vmul.f32 -1.442695, %v5414_v13 }
 0x100   :  { %5480 = vpow2.f32 %v3478_v11 }
 0x101   :  { %5482 = vpow2.f32 %v3479_v17 }
 0x104   :  { %v526_v18 = vpop.f32.mrb[8].mxu1 }
 0x105   :  { %v3875_v20 = vpop.f32.mrb[9].mxu1  ;;  %v550_v32 = vadd.f32 %v6063_v28, %v526_v18 }
 0x10a   :  { %v5481_v24 = vpop.eup %5480 }
 0x10b   :  { %v534_v25 = vadd.f32 1.0, %v5481_v24  ;;  %v5483_v27 = vpop.eup %5482 }
 0x10c   :  { %v541_v30 = vadd.f32 1.0, %v5483_v27 }
 0x10d   :  { %5484 = vrcp.f32 %v534_v25 }
 0x10e   :  { %5486 = vrcp.f32 %v541_v30 }
 0x117   :  { %v5485_v35 = vpop.eup %5484 }
 0x118   :  { %v551_v41 = vmul.f32 %v5485_v35, %v550_v32  ;;  %v5487_v49 = vpop.eup %5486 }
 0x119   :  { %v554_v54 = vsub.f32 1.0, %v5487_v49  ;;  %v556_v0 = vmul.f32 0.0, %v5487_v49 }
 0x11a   :  { %v552_v46 = vadd.f32 %v551_v41, %v323_v38 }
 0x11c   :  { %5488 = vtanh.f32 %v552_v46 }
 0x126   :  { %v5489_v58 = vpop.eup %5488 }
 0x127   :  { %v555_v62 = vmul.f32 %v5489_v58, %v554_v54 }
 0x129   :  { %v6066_v5 = vadd.f32 %v556_v0, %v555_v62 }
 0x12b   :  { %628 = vmatmul.mubr.f32.vlgmr.msra.gmra.mrb[2].mxu0 %v6066_v5  ;;  %3909 = vmatmul.mubr.f32.vlgmr.msra.gmra.mrb[10].mxu1 %v6066_v5 }
 0x12c   :  { %4568 = vmatpush1.bf16.msra.mxu0 %v5731_v15  ;;  %4599 = vmatpush3.bf16.msra.mxu1 %v5807_v40 }
 0x12d   :  { %4570 = vmatprep.subr.bf16.mxu0 %v5734_v16  ;;  %4600 = vmatprep.subr.bf16.mxu1 %v5642_v48 }
 0x12e   :  { %796 = vmatprep.mubr.f32.mxu0 %v5641_v3  ;;  %3943 = vmatprep.mubr.msk.f32.mxu1 %vm5643_vm1, %v5641_v3 }
 0x130   :  { %4572 = vmatpush1.bf16.msra.mxu0 %v5754_v22  ;;  %4602 = vmatpush3.bf16.msra.mxu1 %v5841_v51 }
 0x131   :  { %4574 = vmatprep.subr.bf16.mxu0 %v5757_v23  ;;  %4603 = vmatprep.subr.bf16.mxu1 %v5642_v48 }
 0x134   :  { %4576 = vmatpush1.bf16.msra.mxu0 %v5783_v31  ;;  %4605 = vmatpush3.bf16.msra.mxu1 %v5875_v61 }
 0x135   :  { %4578 = vmatprep.subr.bf16.mxu0 %v5786_v33  ;;  %4606 = vmatprep.subr.bf16.mxu1 %v5642_v48 }
 0x138   :  { %4580 = vmatpush1.bf16.msra.mxu0 %v5814_v42  ;;  %4608 = vmatpush3.bf16.msra.mxu1 %v5909_v8 }
 0x139   :  { %4582 = vmatprep.subr.bf16.mxu0 %v5823_v45  ;;  %4609 = vmatprep.subr.bf16.mxu1 %v5642_v48 }
 0x13c   :  { %4584 = vmatpush1.bf16.msra.mxu0 %v5848_v53  ;;  %4611 = vmatpush3.bf16.msra.mxu1 %v5937_v19 }
 0x13d   :  { %4586 = vmatprep.subr.bf16.mxu0 %v5857_v56  ;;  %4612 = vmatprep.subr.bf16.mxu1 %v5642_v48 }
 0x140   :  { %4588 = vmatpush1.bf16.msra.mxu0 %v5882_v63  ;;  %4614 = vmatpush3.bf16.msra.mxu1 %v5957_v26 }
 0x141   :  { %4590 = vmatprep.subr.bf16.mxu0 %v5891_v2  ;;  %4615 = vmatprep.subr.bf16.mxu1 %v5642_v48 }
 0x144   :  { %4592 = vmatpush1.bf16.msra.mxu0 %v5916_v10  ;;  %4617 = vmatpush3.bf16.msra.mxu1 %v5973_v29 }
 0x145   :  { %4594 = vmatprep.subr.bf16.mxu0 %v5925_v14  ;;  %4618 = vmatprep.subr.bf16.mxu1 %v5642_v48 }
 0x148   :  { %4596 = vmatpush1.bf16.msra.mxu0 %v5944_v21  ;;  %4620 = vmatpush3.bf16.msra.mxu1 %v5988_v34 }
 0x149   :  { %4622 = vmatprep.subr.bf16.mxu0 %v5723_v12  ;;  %4653 = vmatprep.subr.bf16.mxu1 %v5642_v48 }
 0x1fe   :  { %v629_v39 = vpop.f32.mrb[2].mxu0  ;;  %v700_v44 = vpop.f32.mrb[10].mxu1 }
 0x1ff   :  { %v5415_v6 = vadd.f32 %v629_v39, %v6046_v59  ;;  %v631_v7 = vpop.f32.mrb[3].mxu0  ;;  %v3910_v11 = vpop.f32.mrb[11].mxu1  ;;  %v718_v30 = vadd.f32 %v6063_v28, %v700_v44 }
 0x200   :  { %v5416_v17 = vadd.f32 %v631_v7, %v6052_v1 }
 0x201   :  { %v3481_v13 = vmul.f32 -1.442695, %v5415_v6 }
 0x202   :  { %v3482_v18 = vmul.f32 -1.442695, %v5416_v17 }
 0x203   :  { %5490 = vpow2.f32 %v3481_v13 }
 0x204   :  { %5492 = vpow2.f32 %v3482_v18 }
 0x20d   :  { %v5491_v20 = vpop.eup %5490 }
 0x20e   :  { %v708_v24 = vadd.f32 1.0, %v5491_v20  ;;  %v5493_v25 = vpop.eup %5492 }
 0x20f   :  { %v715_v27 = vadd.f32 1.0, %v5493_v25 }
 0x210   :  { %5494 = vrcp.f32 %v708_v24 }
 0x211   :  { %5496 = vrcp.f32 %v715_v27 }
 0x21a   :  { %v5495_v32 = vpop.eup %5494 }
 0x21b   :  { %v719_v35 = vmul.f32 %v5495_v32, %v718_v30  ;;  %v5497_v41 = vpop.eup %5496 }
 0x21c   :  { %v722_v46 = vsub.f32 1.0, %v5497_v41  ;;  %v724_v58 = vmul.f32 %v5497_v41, %v6066_v5 }
 0x21d   :  { %v720_v38 = vadd.f32 %v719_v35, %v6034_v43 }
 0x21f   :  { %5498 = vtanh.f32 %v720_v38 }
 0x229   :  { %v5499_v49 = vpop.eup %5498 }
 0x22a   :  { %v723_v54 = vmul.f32 %v5499_v49, %v722_v46 }
 0x22c   :  { %v6110_v62 = vadd.f32 %v724_v58, %v723_v54 }
 0x22e   :  { %797 = vmatmul.mubr.f32.vlgmr.msra.gmra.mrb[4].mxu0 %v6110_v62  ;;  %3944 = vmatmul.mubr.f32.vlgmr.msra.gmra.mrb[12].mxu1 %v6110_v62 }
 0x22f   :  { %4624 = vmatpush1.bf16.msra.mxu0 %v5731_v15  ;;  %4655 = vmatpush3.bf16.msra.mxu1 %v5807_v40 }
 0x230   :  { %4626 = vmatprep.subr.bf16.mxu0 %v5734_v16  ;;  %4656 = vmatprep.subr.bf16.mxu1 %v5642_v48 }
 0x231   :  { %965 = vmatprep.mubr.f32.mxu0 %v5641_v3  ;;  %3978 = vmatprep.mubr.msk.f32.mxu1 %vm5643_vm1, %v5641_v3 }
 0x233   :  { %4628 = vmatpush1.bf16.msra.mxu0 %v5754_v22  ;;  %4658 = vmatpush3.bf16.msra.mxu1 %v5841_v51 }
 0x234   :  { %4630 = vmatprep.subr.bf16.mxu0 %v5757_v23  ;;  %4659 = vmatprep.subr.bf16.mxu1 %v5642_v48 }
 0x237   :  { %4632 = vmatpush1.bf16.msra.mxu0 %v5783_v31  ;;  %4661 = vmatpush3.bf16.msra.mxu1 %v5875_v61 }
 0x238   :  { %4634 = vmatprep.subr.bf16.mxu0 %v5786_v33  ;;  %4662 = vmatprep.subr.bf16.mxu1 %v5642_v48 }
 0x23b   :  { %4636 = vmatpush1.bf16.msra.mxu0 %v5814_v42  ;;  %4664 = vmatpush3.bf16.msra.mxu1 %v5909_v8 }
 0x23c   :  { %4638 = vmatprep.subr.bf16.mxu0 %v5823_v45  ;;  %4665 = vmatprep.subr.bf16.mxu1 %v5642_v48 }
 0x23f   :  { %4640 = vmatpush1.bf16.msra.mxu0 %v5848_v53  ;;  %4667 = vmatpush3.bf16.msra.mxu1 %v5937_v19 }
 0x240   :  { %4642 = vmatprep.subr.bf16.mxu0 %v5857_v56  ;;  %4668 = vmatprep.subr.bf16.mxu1 %v5642_v48 }
 0x243   :  { %4644 = vmatpush1.bf16.msra.mxu0 %v5882_v63  ;;  %4670 = vmatpush3.bf16.msra.mxu1 %v5957_v26 }
 0x244   :  { %4646 = vmatprep.subr.bf16.mxu0 %v5891_v2  ;;  %4671 = vmatprep.subr.bf16.mxu1 %v5642_v48 }
 0x247   :  { %4648 = vmatpush1.bf16.msra.mxu0 %v5916_v10  ;;  %4673 = vmatpush3.bf16.msra.mxu1 %v5973_v29 }
 0x248   :  { %4650 = vmatprep.subr.bf16.mxu0 %v5925_v14  ;;  %4674 = vmatprep.subr.bf16.mxu1 %v5642_v48 }
 0x24b   :  { %4652 = vmatpush1.bf16.msra.mxu0 %v5944_v21  ;;  %4676 = vmatpush3.bf16.msra.mxu1 %v5988_v34 }
 0x24c   :  { %4678 = vmatprep.subr.bf16.mxu0 %v5723_v12  ;;  %4709 = vmatprep.subr.bf16.mxu1 %v5642_v48 }
 0x301   :  { %v798_v43 = vpop.f32.mrb[4].mxu0  ;;  %v869_v0 = vpop.f32.mrb[12].mxu1 }
 0x302   :  { %v5417_v39 = vadd.f32 %v798_v43, %v6046_v59  ;;  %v800_v44 = vpop.f32.mrb[5].mxu0  ;;  %v3945_v6 = vpop.f32.mrb[13].mxu1  ;;  %v887_v25 = vadd.f32 %v6063_v28, %v869_v0 }
 0x303   :  { %v5418_v11 = vadd.f32 %v800_v44, %v6052_v1 }
 0x304   :  { %v3483_v7 = vmul.f32 -1.442695, %v5417_v39 }
 0x305   :  { %v3484_v13 = vmul.f32 -1.442695, %v5418_v11 }
 0x306   :  { %5500 = vpow2.f32 %v3483_v7 }
 0x307   :  { %5502 = vpow2.f32 %v3484_v13 }
 0x310   :  { %v5501_v17 = vpop.eup %5500 }
 0x311   :  { %v877_v18 = vadd.f32 1.0, %v5501_v17  ;;  %v5503_v20 = vpop.eup %5502 }
 0x312   :  { %v884_v24 = vadd.f32 1.0, %v5503_v20 }
 0x313   :  { %5504 = vrcp.f32 %v877_v18 }
 0x314   :  { %5506 = vrcp.f32 %v884_v24 }
 0x31d   :  { %v5505_v27 = vpop.eup %5504 }
 0x31e   :  { %v888_v30 = vmul.f32 %v5505_v27, %v887_v25  ;;  %v5507_v35 = vpop.eup %5506 }
 0x31f   :  { %v891_v38 = vsub.f32 1.0, %v5507_v35  ;;  %v893_v49 = vmul.f32 %v5507_v35, %v6110_v62 }
 0x320   :  { %v889_v32 = vadd.f32 %v888_v30, %v6038_v50 }
 0x322   :  { %5508 = vtanh.f32 %v889_v32 }
 0x32c   :  { %v5509_v41 = vpop.eup %5508 }
 0x32d   :  { %v892_v46 = vmul.f32 %v5509_v41, %v891_v38 }
 0x32f   :  { %v6154_v54 = vadd.f32 %v893_v49, %v892_v46 }
 0x331   :  { %966 = vmatmul.mubr.f32.vlgmr.msra.gmra.mrb[6].mxu0 %v6154_v54  ;;  %3979 = vmatmul.mubr.f32.vlgmr.msra.gmra.mrb[14].mxu1 %v6154_v54 }
 0x332   :  { %4680 = vmatpush1.bf16.msra.mxu0 %v5731_v15  ;;  %4711 = vmatpush3.bf16.msra.mxu1 %v5807_v40 }
 0x333   :  { %4682 = vmatprep.subr.bf16.mxu0 %v5734_v16  ;;  %4712 = vmatprep.subr.bf16.mxu1 %v5642_v48 }
 0x334   :  { %1134 = vmatprep.mubr.f32.mxu0 %v5641_v3  ;;  %4013 = vmatprep.mubr.msk.f32.mxu1 %vm5643_vm1, %v5641_v3 }
 0x336   :  { %4684 = vmatpush1.bf16.msra.mxu0 %v5754_v22  ;;  %4714 = vmatpush3.bf16.msra.mxu1 %v5841_v51 }
 0x337   :  { %4686 = vmatprep.subr.bf16.mxu0 %v5757_v23  ;;  %4715 = vmatprep.subr.bf16.mxu1 %v5642_v48 }
 0x33a   :  { %4688 = vmatpush1.bf16.msra.mxu0 %v5783_v31  ;;  %4717 = vmatpush3.bf16.msra.mxu1 %v5875_v61 }
 0x33b   :  { %4690 = vmatprep.subr.bf16.mxu0 %v5786_v33  ;;  %4718 = vmatprep.subr.bf16.mxu1 %v5642_v48 }
 0x33e   :  { %4692 = vmatpush1.bf16.msra.mxu0 %v5814_v42  ;;  %4720 = vmatpush3.bf16.msra.mxu1 %v5909_v8 }
 0x33f   :  { %4694 = vmatprep.subr.bf16.mxu0 %v5823_v45  ;;  %4721 = vmatprep.subr.bf16.mxu1 %v5642_v48 }
 0x342   :  { %4696 = vmatpush1.bf16.msra.mxu0 %v5848_v53  ;;  %4723 = vmatpush3.bf16.msra.mxu1 %v5937_v19 }
 0x343   :  { %4698 = vmatprep.subr.bf16.mxu0 %v5857_v56  ;;  %4724 = vmatprep.subr.bf16.mxu1 %v5642_v48 }
 0x346   :  { %4700 = vmatpush1.bf16.msra.mxu0 %v5882_v63  ;;  %4726 = vmatpush3.bf16.msra.mxu1 %v5957_v26 }
 0x347   :  { %4702 = vmatprep.subr.bf16.mxu0 %v5891_v2  ;;  %4727 = vmatprep.subr.bf16.mxu1 %v5642_v48 }
 0x34a   :  { %4704 = vmatpush1.bf16.msra.mxu0 %v5916_v10  ;;  %4729 = vmatpush3.bf16.msra.mxu1 %v5973_v29 }
 0x34b   :  { %4706 = vmatprep.subr.bf16.mxu0 %v5925_v14  ;;  %4730 = vmatprep.subr.bf16.mxu1 %v5642_v48 }
 0x34e   :  { %4708 = vmatpush1.bf16.msra.mxu0 %v5944_v21  ;;  %4732 = vmatpush3.bf16.msra.mxu1 %v5988_v34 }
 0x34f   :  { %4734 = vmatprep.subr.bf16.mxu0 %v5723_v12  ;;  %4765 = vmatprep.subr.bf16.mxu1 %v5642_v48 }
 0x404   :  { %v967_v50 = vpop.f32.mrb[6].mxu0  ;;  %v1038_v58 = vpop.f32.mrb[14].mxu1 }
 0x405   :  { %v5419_v43 = vadd.f32 %v967_v50, %v6046_v59  ;;  %v969_v0 = vpop.f32.mrb[7].mxu0  ;;  %v3980_v39 = vpop.f32.mrb[15].mxu1  ;;  %v1056_v20 = vadd.f32 %v6063_v28, %v1038_v58 }
 0x406   :  { %v5420_v6 = vadd.f32 %v969_v0, %v6052_v1 }
 0x407   :  { %v3485_v44 = vmul.f32 -1.442695, %v5419_v43 }
 0x408   :  { %v3486_v7 = vmul.f32 -1.442695, %v5420_v6 }
 0x409   :  { %5510 = vpow2.f32 %v3485_v44 }
 0x40a   :  { %5512 = vpow2.f32 %v3486_v7 }
 0x413   :  { %v5511_v11 = vpop.eup %5510 }
 0x414   :  { %v1046_v13 = vadd.f32 1.0, %v5511_v11  ;;  %v5513_v17 = vpop.eup %5512 }
 0x415   :  { %v1053_v18 = vadd.f32 1.0, %v5513_v17 }
 0x416   :  { %5514 = vrcp.f32 %v1046_v13 }
 0x417   :  { %5516 = vrcp.f32 %v1053_v18 }
 0x420   :  { %v5515_v24 = vpop.eup %5514 }
 0x421   :  { %v1057_v25 = vmul.f32 %v5515_v24, %v1056_v20  ;;  %v5517_v30 = vpop.eup %5516 }
 0x422   :  { %v1060_v32 = vsub.f32 1.0, %v5517_v30  ;;  %v1062_v41 = vmul.f32 %v5517_v30, %v6154_v54 }
 0x423   :  { %v1058_v27 = vadd.f32 %v1057_v25, %v6036_v47 }
 0x425   :  { %5518 = vtanh.f32 %v1058_v27 }
 0x42f   :  { %v5519_v35 = vpop.eup %5518 }
 0x430   :  { %v1061_v38 = vmul.f32 %v5519_v35, %v1060_v32 }
 0x432   :  { %v6198_v46 = vadd.f32 %v1062_v41, %v1061_v38 }
 0x434   :  { %1135 = vmatmul.mubr.f32.vlgmr.msra.gmra.mrb[8].mxu0 %v6198_v46  ;;  %4014 = vmatmul.mubr.f32.vlgmr.msra.gmra.mrb[16].mxu1 %v6198_v46 }
 0x435   :  { %4736 = vmatpush1.bf16.msra.mxu0 %v5731_v15  ;;  %4767 = vmatpush3.bf16.msra.mxu1 %v5807_v40 }
 0x436   :  { %4738 = vmatprep.subr.bf16.mxu0 %v5734_v16  ;;  %4768 = vmatprep.subr.bf16.mxu1 %v5642_v48 }
 0x437   :  { %1303 = vmatprep.mubr.f32.mxu0 %v5641_v3  ;;  %4048 = vmatprep.mubr.msk.f32.mxu1 %vm5643_vm1, %v5641_v3 }
 0x439   :  { %4740 = vmatpush1.bf16.msra.mxu0 %v5754_v22  ;;  %4770 = vmatpush3.bf16.msra.mxu1 %v5841_v51 }
 0x43a   :  { %4742 = vmatprep.subr.bf16.mxu0 %v5757_v23  ;;  %4771 = vmatprep.subr.bf16.mxu1 %v5642_v48 }
 0x43d   :  { %4744 = vmatpush1.bf16.msra.mxu0 %v5783_v31  ;;  %4773 = vmatpush3.bf16.msra.mxu1 %v5875_v61 }
 0x43e   :  { %4746 = vmatprep.subr.bf16.mxu0 %v5786_v33  ;;  %4774 = vmatprep.subr.bf16.mxu1 %v5642_v48 }
 0x441   :  { %4748 = vmatpush1.bf16.msra.mxu0 %v5814_v42  ;;  %4776 = vmatpush3.bf16.msra.mxu1 %v5909_v8 }
 0x442   :  { %4750 = vmatprep.subr.bf16.mxu0 %v5823_v45  ;;  %4777 = vmatprep.subr.bf16.mxu1 %v5642_v48 }
 0x445   :  { %4752 = vmatpush1.bf16.msra.mxu0 %v5848_v53  ;;  %4779 = vmatpush3.bf16.msra.mxu1 %v5937_v19 }
 0x446   :  { %4754 = vmatprep.subr.bf16.mxu0 %v5857_v56  ;;  %4780 = vmatprep.subr.bf16.mxu1 %v5642_v48 }
 0x449   :  { %4756 = vmatpush1.bf16.msra.mxu0 %v5882_v63  ;;  %4782 = vmatpush3.bf16.msra.mxu1 %v5957_v26 }
 0x44a   :  { %4758 = vmatprep.subr.bf16.mxu0 %v5891_v2  ;;  %4783 = vmatprep.subr.bf16.mxu1 %v5642_v48 }
 0x44d   :  { %4760 = vmatpush1.bf16.msra.mxu0 %v5916_v10  ;;  %4785 = vmatpush3.bf16.msra.mxu1 %v5973_v29 }
 0x44e   :  { %4762 = vmatprep.subr.bf16.mxu0 %v5925_v14  ;;  %4786 = vmatprep.subr.bf16.mxu1 %v5642_v48 }
 0x451   :  { %4764 = vmatpush1.bf16.msra.mxu0 %v5944_v21  ;;  %4788 = vmatpush3.bf16.msra.mxu1 %v5988_v34 }
 0x452   :  { %4790 = vmatprep.subr.bf16.mxu0 %v5723_v12  ;;  %4821 = vmatprep.subr.bf16.mxu1 %v5642_v48 }
 0x507   :  { %v1136_v47 = vpop.f32.mrb[8].mxu0  ;;  %v1207_v49 = vpop.f32.mrb[16].mxu1 }
 0x508   :  { %v5421_v50 = vadd.f32 %v1136_v47, %v6046_v59  ;;  %v1138_v58 = vpop.f32.mrb[9].mxu0  ;;  %v4015_v43 = vpop.f32.mrb[17].mxu1  ;;  %v1225_v17 = vadd.f32 %v6063_v28, %v1207_v49 }
 0x509   :  { %v5422_v39 = vadd.f32 %v1138_v58, %v6052_v1 }
 0x50a   :  { %v3487_v0 = vmul.f32 -1.442695, %v5421_v50 }
 0x50b   :  { %v3488_v44 = vmul.f32 -1.442695, %v5422_v39 }
 0x50c   :  { %5520 = vpow2.f32 %v3487_v0 }
 0x50d   :  { %5522 = vpow2.f32 %v3488_v44 }
 0x516   :  { %v5521_v6 = vpop.eup %5520 }
 0x517   :  { %v1215_v7 = vadd.f32 1.0, %v5521_v6  ;;  %v5523_v11 = vpop.eup %5522 }
 0x518   :  { %v1222_v13 = vadd.f32 1.0, %v5523_v11 }
 0x519   :  { %5524 = vrcp.f32 %v1215_v7 }
 0x51a   :  { %5526 = vrcp.f32 %v1222_v13 }
 0x523   :  { %v5525_v18 = vpop.eup %5524 }
 0x524   :  { %v1226_v20 = vmul.f32 %v5525_v18, %v1225_v17  ;;  %v5527_v25 = vpop.eup %5526 }
 0x525   :  { %v1229_v27 = vsub.f32 1.0, %v5527_v25  ;;  %v1231_v35 = vmul.f32 %v5527_v25, %v6198_v46 }
 0x526   :  { %v1227_v24 = vadd.f32 %v1226_v20, %v6048_v60 }
 0x528   :  { %5528 = vtanh.f32 %v1227_v24 }
 0x532   :  { %v5529_v30 = vpop.eup %5528 }
 0x533   :  { %v1230_v32 = vmul.f32 %v5529_v30, %v1229_v27 }
 0x535   :  { %v6242_v38 = vadd.f32 %v1231_v35, %v1230_v32  ;;  %v1743_v32 = vld [vmem:[%s7114_s5] sm:$0xff]  ;;  %v1746_v35 = vld [vmem:[%s7114_s5 + $0x18] sm:$0xff] }
 0x537   :  { %1304 = vmatmul.mubr.f32.vlgmr.msra.gmra.mrb[10].mxu0 %v6242_v38  ;;  %4049 = vmatmul.mubr.f32.vlgmr.msra.gmra.mrb[18].mxu1 %v6242_v38 }
 0x538   :  { %4792 = vmatpush1.bf16.msra.mxu0 %v5731_v15  ;;  %4823 = vmatpush3.bf16.msra.mxu1 %v5807_v40 }
 0x539   :  { %4794 = vmatprep.subr.bf16.mxu0 %v5734_v16  ;;  %4824 = vmatprep.subr.bf16.mxu1 %v5642_v48 }
 0x53a   :  { %1472 = vmatprep.mubr.f32.mxu0 %v5641_v3  ;;  %4083 = vmatprep.mubr.msk.f32.mxu1 %vm5643_vm1, %v5641_v3 }
 0x53c   :  { %4796 = vmatpush1.bf16.msra.mxu0 %v5754_v22  ;;  %4826 = vmatpush3.bf16.msra.mxu1 %v5841_v51 }
 0x53d   :  { %4798 = vmatprep.subr.bf16.mxu0 %v5757_v23  ;;  %4827 = vmatprep.subr.bf16.mxu1 %v5642_v48 }
 0x540   :  { %4800 = vmatpush1.bf16.msra.mxu0 %v5783_v31  ;;  %4829 = vmatpush3.bf16.msra.mxu1 %v5875_v61 }
 0x541   :  { %4802 = vmatprep.subr.bf16.mxu0 %v5786_v33  ;;  %4830 = vmatprep.subr.bf16.mxu1 %v5642_v48 }
 0x544   :  { %4804 = vmatpush1.bf16.msra.mxu0 %v5814_v42  ;;  %4832 = vmatpush3.bf16.msra.mxu1 %v5909_v8 }
 0x545   :  { %4806 = vmatprep.subr.bf16.mxu0 %v5823_v45  ;;  %4833 = vmatprep.subr.bf16.mxu1 %v5642_v48 }
 0x548   :  { %4808 = vmatpush1.bf16.msra.mxu0 %v5848_v53  ;;  %4835 = vmatpush3.bf16.msra.mxu1 %v5937_v19 }
 0x549   :  { %4810 = vmatprep.subr.bf16.mxu0 %v5857_v56  ;;  %4836 = vmatprep.subr.bf16.mxu1 %v5642_v48 }
 0x54c   :  { %4812 = vmatpush1.bf16.msra.mxu0 %v5882_v63  ;;  %4838 = vmatpush3.bf16.msra.mxu1 %v5957_v26 }
 0x54d   :  { %4814 = vmatprep.subr.bf16.mxu0 %v5891_v2  ;;  %4839 = vmatprep.subr.bf16.mxu1 %v5642_v48 }
 0x550   :  { %4816 = vmatpush1.bf16.msra.mxu0 %v5916_v10  ;;  %4841 = vmatpush3.bf16.msra.mxu1 %v5973_v29 }
 0x551   :  { %4818 = vmatprep.subr.bf16.mxu0 %v5925_v14  ;;  %4842 = vmatprep.subr.bf16.mxu1 %v5642_v48 }
 0x554   :  { %4820 = vmatpush1.bf16.msra.mxu0 %v5944_v21  ;;  %4844 = vmatpush3.bf16.msra.mxu1 %v5988_v34 }
 0x555   :  { %4846 = vmatprep.subr.bf16.mxu0 %v5723_v12  ;;  %4877 = vmatprep.subr.bf16.mxu1 %v5642_v48 }
 0x60a   :  { %v1305_v60 = vpop.f32.mrb[10].mxu0  ;;  %v1376_v41 = vpop.f32.mrb[18].mxu1 }
 0x60b   :  { %v5423_v47 = vadd.f32 %v1305_v60, %v6046_v59  ;;  %v1307_v49 = vpop.f32.mrb[11].mxu0  ;;  %v4050_v50 = vpop.f32.mrb[19].mxu1  ;;  %v1394_v12 = vadd.f32 %v6063_v28, %v1376_v41 }
 0x60c   :  { %v5424_v43 = vadd.f32 %v1307_v49, %v6052_v1  ;;  %v1751_v49 = vld [vmem:[%s7114_s5 + $0x40] sm:$0xff]  ;;  %v1754_v50 = vld [vmem:[%s7114_s5 + $0x58] sm:$0xff] }
 0x60d   :  { %v3489_v58 = vmul.f32 -1.442695, %v5423_v47 }
 0x60e   :  { %v3490_v0 = vmul.f32 -1.442695, %v5424_v43 }
 0x60f   :  { %5530 = vpow2.f32 %v3489_v58  ;;  %v4903_v58 = vpack.c.bf16 %v1746_v35, %v1743_v32  ;;  %v1773_v32 = vld [vmem:[%s7114_s5 + $0xf0] sm:$0xff]  ;;  %v1776_v35 = vld [vmem:[%s7114_s5 + $0x108] sm:$0xff] }
 0x610   :  { %5532 = vpow2.f32 %v3490_v0 }
 0x619   :  { %v5531_v39 = vpop.eup %5530 }
 0x61a   :  { %v1384_v44 = vadd.f32 1.0, %v5531_v39  ;;  %v5533_v6 = vpop.eup %5532  ;;  %v1749_v39 = vld [vmem:[%s7114_s5 + $0x30] sm:$0xff] }
 0x61b   :  { %v1391_v7 = vadd.f32 1.0, %v5533_v6  ;;  %v1756_v6 = vld [vmem:[%s7114_s5 + $0x68] sm:$0xff] }
 0x61c   :  { %5534 = vrcp.f32 %v1384_v44  ;;  %v1752_v44 = vld [vmem:[%s7114_s5 + $0x48] sm:$0xff] }
 0x61d   :  { %5536 = vrcp.f32 %v1391_v7  ;;  %v4937_v7 = vpack.c.bf16 %v1754_v50, %v1751_v49 }
 0x626   :  { %v5535_v11 = vpop.eup %5534 }
 0x627   :  { %v1395_v13 = vmul.f32 %v5535_v11, %v1394_v12  ;;  %v5537_v18 = vpop.eup %5536  ;;  %v1759_v12 = vld [vmem:[%s7114_s5 + $0x80] sm:$0xff]  ;;  %v1757_v11 = vld [vmem:[%s7114_s5 + $0x70] sm:$0xff] }
 0x628   :  { %v1398_v20 = vsub.f32 1.0, %v5537_v18  ;;  %v1400_v27 = vmul.f32 %v5537_v18, %v6242_v38  ;;  %v4909_v18 = vpack.c.bf16 %v1759_v12, %v1756_v6  ;;  %v1787_v6 = vld [vmem:[%s7114_s5 + $0x160] sm:$0xff] }
 0x629   :  { %v1396_v17 = vadd.f32 %v1395_v13, %v6042_v57  ;;  %v1760_v13 = vld [vmem:[%s7114_s5 + $0x88] sm:$0xff] }
 0x62b   :  { %5538 = vtanh.f32 %v1396_v17  ;;  %v4907_v17 = vpack.c.bf16 %v1752_v44, %v1749_v39  ;;  %v1786_v39 = vld [vmem:[%s7114_s5 + $0x158] sm:$0xff]  ;;  %v1789_v44 = vld [vmem:[%s7114_s5 + $0x170] sm:$0xff] }
 0x635   :  { %v5539_v24 = vpop.eup %5538 }
 0x636   :  { %v1399_v25 = vmul.f32 %v5539_v24, %v1398_v20  ;;  %v4941_v20 = vpack.c.bf16 %v1760_v13, %v1757_v11  ;;  %v1755_v24 = vld [vmem:[%s7114_s5 + $0x60] sm:$0xff]  ;;  %v4929_v11 = vpack.c.bf16 %v1789_v44, %v1786_v39  ;;  %v1834_v44 = vld [vmem:[%s7115_s6 + $0x158] sm:$0xff] }
 0x638   :  { %v6286_v30 = vadd.f32 %v1400_v27, %v1399_v25  ;;  %v1758_v25 = vld [vmem:[%s7114_s5 + $0x78] sm:$0xff] }
 0x639   :  { %v1762_v27 = vld [vmem:[%s7114_s5 + $0x98] sm:$0xff] }
 0x63a   :  { %1473 = vmatmul.mubr.f32.vlgmr.msra.gmra.mrb[12].mxu0 %v6286_v30  ;;  %4084 = vmatmul.mubr.f32.vlgmr.msra.gmra.mrb[20].mxu1 %v6286_v30 }
 0x63b   :  { %4848 = vmatpush1.bf16.msra.mxu0 %v5731_v15  ;;  %4879 = vmatpush3.bf16.msra.mxu1 %v5807_v40  ;;  %v1744_v15 = vld [vmem:[%s7114_s5 + $0x8] sm:$0xff] }
 0x63c   :  { %4850 = vmatprep.subr.bf16.mxu0 %v5734_v16  ;;  %4880 = vmatprep.subr.bf16.mxu1 %v5642_v48  ;;  %v1747_v16 = vld [vmem:[%s7114_s5 + $0x20] sm:$0xff] }
 0x63d   :  { %1641 = vmatprep.mubr.f32.mxu0 %v5641_v3  ;;  %4118 = vmatprep.mubr.msk.f32.mxu1 %vm5643_vm1, %v5641_v3 }
 0x63f   :  { %4852 = vmatpush1.bf16.msra.mxu0 %v5754_v22  ;;  %4882 = vmatpush3.bf16.msra.mxu1 %v5841_v51  ;;  %v1745_v22 = vld [vmem:[%s7114_s5 + $0x10] sm:$0xff] }
 0x640   :  { %4854 = vmatprep.subr.bf16.mxu0 %v5757_v23  ;;  %4883 = vmatprep.subr.bf16.mxu1 %v5642_v48  ;;  %v4901_v23 = vpack.c.bf16 %v1747_v16, %v1744_v15  ;;  %v1765_v15 = vld [vmem:[%s7114_s5 + $0xb0] sm:$0xff]  ;;  %v1763_v16 = vld [vmem:[%s7114_s5 + $0xa0] sm:$0xff] }
 0x643   :  { %4856 = vmatpush1.bf16.msra.mxu0 %v5783_v31  ;;  %4885 = vmatpush3.bf16.msra.mxu1 %v5875_v61  ;;  %v1748_v31 = vld [vmem:[%s7114_s5 + $0x28] sm:$0xff] }
 0x644   :  { %4858 = vmatprep.subr.bf16.mxu0 %v5786_v33  ;;  %4886 = vmatprep.subr.bf16.mxu1 %v5642_v48  ;;  %v4933_v33 = vpack.c.bf16 %v1748_v31, %v1745_v22  ;;  %v1766_v22 = vld [vmem:[%s7114_s5 + $0xb8] sm:$0xff]  ;;  %v4913_v31 = vpack.c.bf16 %v1765_v15, %v1762_v27  ;;  %v1797_v15 = vld [vmem:[%s7115_s6 + $0x30] sm:$0xff] }
 0x647   :  { %4860 = vmatpush1.bf16.msra.mxu0 %v5814_v42  ;;  %4888 = vmatpush3.bf16.msra.mxu1 %v5909_v8 }
 0x648   :  { %4862 = vmatprep.subr.bf16.mxu0 %v5823_v45  ;;  %4889 = vmatprep.subr.bf16.mxu1 %v5642_v48 }
 0x64b   :  { %4864 = vmatpush1.bf16.msra.mxu0 %v5848_v53  ;;  %4891 = vmatpush3.bf16.msra.mxu1 %v5937_v19 }
 0x64c   :  { %4866 = vmatprep.subr.bf16.mxu0 %v5857_v56  ;;  %4892 = vmatprep.subr.bf16.mxu1 %v5642_v48 }
 0x64f   :  { %4868 = vmatpush1.bf16.msra.mxu0 %v5882_v63  ;;  %4894 = vmatpush3.bf16.msra.mxu1 %v5957_v26 }
 0x650   :  { %4870 = vmatprep.subr.bf16.mxu0 %v5891_v2  ;;  %4895 = vmatprep.subr.bf16.mxu1 %v5642_v48 }
 0x653   :  { %4872 = vmatpush1.bf16.msra.mxu0 %v5916_v10  ;;  %4897 = vmatpush3.bf16.msra.mxu1 %v5973_v29 }
 0x654   :  { %4874 = vmatprep.subr.bf16.mxu0 %v5925_v14  ;;  %4898 = vmatprep.subr.bf16.mxu1 %v5642_v48 }
 0x657   :  { %4876 = vmatpush1.bf16.msra.mxu0 %v5944_v21  ;;  %4900 = vmatpush3.bf16.msra.mxu1 %v5988_v34 }
 0x658   :  { %4902 = vmatprep.subr.bf16.mxu0 %v4901_v23  ;;  %4934 = vmatprep.subr.bf16.mxu1 %v4933_v33  ;;  %v4911_v23 = vpack.c.bf16 %v1758_v25, %v1755_v24  ;;  %v1798_v24 = vld [vmem:[%s7115_s6 + $0x38] sm:$0xff]  ;;  %v1801_v25 = vld [vmem:[%s7115_s6 + $0x50] sm:$0xff] }
 0x659   :  { %v6523_v27 = vpack.c.bf16 %v1801_v25, %v1798_v24  ;;  %v1814_v24 = vld [vmem:[%s7115_s6 + $0xb8] sm:$0xff] }
 0x70d   :  { %v1474_v40 = vpop.f32.mrb[12].mxu0  ;;  %v1545_v42 = vpop.f32.mrb[20].mxu1 }
 0x70e   :  { %v5425_v45 = vadd.f32 %v1474_v40, %v6046_v59  ;;  %v1476_v51 = vpop.f32.mrb[13].mxu0  ;;  %v4085_v53 = vpop.f32.mrb[21].mxu1  ;;  %v1563_v19 = vadd.f32 %v6063_v28, %v1545_v42  ;;  %v1750_v28 = vld [vmem:[%s7114_s5 + $0x38] sm:$0xff]  ;;  %v1761_v40 = vld [vmem:[%s7114_s5 + $0x90] sm:$0xff]  ;;  %v1764_v42 = vld [vmem:[%s7114_s5 + $0xa8] sm:$0xff] }
 0x70f   :  { %v5426_v61 = vadd.f32 %v1476_v51, %v6052_v1  ;;  %v1771_v51 = vld [vmem:[%s7114_s5 + $0xe0] sm:$0xff]  ;;  %v1769_v53 = vld [vmem:[%s7114_s5 + $0xd0] sm:$0xff] }
 0x710   :  { %v3491_v56 = vmul.f32 -1.442695, %v5425_v45  ;;  %v1768_v45 = vld [vmem:[%s7114_s5 + $0xc8] sm:$0xff] }
 0x711   :  { %v3492_v63 = vmul.f32 -1.442695, %v5426_v61  ;;  %v4915_v61 = vpack.c.bf16 %v1764_v42, %v1761_v40  ;;  %v1803_v40 = vld [vmem:[%s7115_s6 + $0x60] sm:$0xff]  ;;  %v1806_v42 = vld [vmem:[%s7115_s6 + $0x78] sm:$0xff] }
 0x712   :  { %5540 = vpow2.f32 %v3491_v56  ;;  %v1772_v56 = vld [vmem:[%s7114_s5 + $0xe8] sm:$0xff] }
 0x713   :  { %5542 = vpow2.f32 %v3492_v63  ;;  %v4917_v63 = vpack.c.bf16 %v1771_v51, %v1768_v45  ;;  %v6549_v45 = vpack.c.bf16 %v1806_v42, %v1803_v40  ;;  %v1810_v51 = vld [vmem:[%s7115_s6 + $0x98] sm:$0xff] }
 0x714   :  { %v1826_v40 = vld [vmem:[%s7115_s6 + $0x118] sm:$0xff] }
 0x71c   :  { %v5541_v2 = vpop.eup %5540 }
 0x71d   :  { %v1553_v8 = vadd.f32 1.0, %v5541_v2  ;;  %v5543_v10 = vpop.eup %5542  ;;  %v4949_v2 = vpack.c.bf16 %v1772_v56, %v1769_v53  ;;  %v1813_v53 = vld [vmem:[%s7115_s6 + $0xb0] sm:$0xff] }
 0x71e   :  { %v1560_v14 = vadd.f32 1.0, %v5543_v10  ;;  %v1770_v10 = vld [vmem:[%s7114_s5 + $0xd8] sm:$0xff]  ;;  %v6559_v56 = vpack.c.bf16 %v1813_v53, %v1810_v51  ;;  %v1829_v51 = vld [vmem:[%s7115_s6 + $0x130] sm:$0xff]  ;;  %v1832_v53 = vld [vmem:[%s7115_s6 + $0x148] sm:$0xff] }
 0x71f   :  { %5544 = vrcp.f32 %v1553_v8  ;;  %v1767_v8 = vld [vmem:[%s7114_s5 + $0xc0] sm:$0xff] }
 0x720   :  { %5546 = vrcp.f32 %v1560_v14  ;;  %v1774_v14 = vld [vmem:[%s7114_s5 + $0xf8] sm:$0xff] }
 0x729   :  { %v5545_v21 = vpop.eup %5544 }
 0x72a   :  { %v1564_v26 = vmul.f32 %v5545_v21, %v1563_v19  ;;  %v5547_v34 = vpop.eup %5546  ;;  %v1777_v19 = vld [vmem:[%s7114_s5 + $0x110] sm:$0xff]  ;;  %v1775_v21 = vld [vmem:[%s7114_s5 + $0x100] sm:$0xff] }
 0x72b   :  { %v1567_v57 = vsub.f32 1.0, %v5547_v34  ;;  %v1569_v47 = vmul.f32 %v5547_v34, %v6286_v30  ;;  %v4921_v34 = vpack.c.bf16 %v1777_v19, %v1774_v14  ;;  %v1815_v19 = vld [vmem:[%s7115_s6 + $0xc0] sm:$0xff] }
 0x72c   :  { %v1565_v29 = vadd.f32 %v1564_v26, %v6057_v9  ;;  %v1753_v9 = vld [vmem:[%s7114_s5 + $0x50] sm:$0xff]  ;;  %v1778_v26 = vld [vmem:[%s7114_s5 + $0x118] sm:$0xff] }
 0x72d   :  { %v4905_v0 = vpack.c.bf16 %v1753_v9, %v1750_v28  ;;  %v1783_v28 = vld [vmem:[%s7114_s5 + $0x140] sm:$0xff]  ;;  %v1781_v9 = vld [vmem:[%s7114_s5 + $0x130] sm:$0xff] }
 0x72e   :  { %5548 = vtanh.f32 %v1565_v29  ;;  %v4919_v29 = vpack.c.bf16 %v1770_v10, %v1767_v8  ;;  %v1816_v8 = vld [vmem:[%s7115_s6 + $0xc8] sm:$0xff]  ;;  %v1819_v10 = vld [vmem:[%s7115_s6 + $0xe0] sm:$0xff] }
 0x72f   :  { %v6577_v14 = vpack.c.bf16 %v1819_v10, %v1816_v8  ;;  %v1838_v8 = vld [vmem:[%s7115_s6 + $0x178] sm:$0xff] }
 0x738   :  { %v5549_v60 = vpop.eup %5548 }
 0x739   :  { %v1568_v41 = vmul.f32 %v5549_v60, %v1567_v57  ;;  %v4953_v57 = vpack.c.bf16 %v1778_v26, %v1775_v21  ;;  %v1780_v60 = vld [vmem:[%s7114_s5 + $0x128] sm:$0xff]  ;;  %v1818_v21 = vld [vmem:[%s7115_s6 + $0xd8] sm:$0xff] }
 0x73a   :  { %v4925_v49 = vpack.c.bf16 %v1783_v28, %v1780_v60  ;;  %v6585_v26 = vpack.c.bf16 %v1818_v21, %v1815_v19  ;;  %v1828_v28 = vld [vmem:[%s7115_s6 + $0x128] sm:$0xff] }
 0x73b   :  { %v6358_v43 = vadd.f32 %v1569_v47, %v1568_v41  ;;  %v1784_v41 = vld [vmem:[%s7114_s5 + $0x148] sm:$0xff]  ;;  %v4923_v47 = vpack.c.bf16 %v1776_v35, %v1773_v32  ;;  %v1821_v32 = vld [vmem:[%s7115_s6 + $0xf0] sm:$0xff] }
 0x73c   :  { %v4957_v50 = vpack.c.bf16 %v1784_v41, %v1781_v9  ;;  %v1824_v35 = vld [vmem:[%s7115_s6 + $0x108] sm:$0xff]  ;;  %v1831_v9 = vld [vmem:[%s7115_s6 + $0x140] sm:$0xff] }
 0x73d   :  { %1642 = vmatmul.mubr.f32.vlgmr.msra.gmra.mrb[14].mxu0 %v6358_v43  ;;  %4119 = vmatmul.mubr.f32.vlgmr.msra.gmra.mrb[22].mxu1 %v6358_v43  ;;  %v6603_v60 = vpack.c.bf16 %v1824_v35, %v1821_v32  ;;  %v1827_v41 = vld [vmem:[%s7115_s6 + $0x120] sm:$0xff] }
 0x73e   :  { %4904 = vmatpush1.bf16.msra.mxu0 %v4903_v58  ;;  %4936 = vmatpush3.bf16.msra.mxu1 %v4933_v33  ;;  %v4945_v33 = vpack.c.bf16 %v1766_v22, %v1763_v16  ;;  %v1779_v58 = vld [vmem:[%s7114_s5 + $0x120] sm:$0xff]  ;;  %v1800_v16 = vld [vmem:[%s7115_s6 + $0x48] sm:$0xff] }
 0x73f   :  { %4153 = vmatprep.mubr.f32.mxu1 %v6066_v5  ;;  %4906 = vmatprep.subr.bf16.mxu0 %v4905_v0  ;;  %v1782_v0 = vld [vmem:[%s7114_s5 + $0x138] sm:$0xff]  ;;  %v6531_v22 = vpack.c.bf16 %v1800_v16, %v1797_v15  ;;  %v1817_v15 = vld [vmem:[%s7115_s6 + $0xd0] sm:$0xff]  ;;  %v1820_v16 = vld [vmem:[%s7115_s6 + $0xe8] sm:$0xff] }
 0x740   :  { %4938 = vmatprep.subr.bf16.mxu1 %v4937_v7  ;;  %1929 = vmatprep.mubr.f32.mxu0 %v5641_v3  ;;  %v4927_v12 = vpack.c.bf16 %v1782_v0, %v1779_v58  ;;  %v1796_v58 = vld [vmem:[%s7115_s6 + $0x28] sm:$0xff] }
 0x742   :  { %4908 = vmatpush1.bf16.msra.mxu0 %v4907_v17  ;;  %4940 = vmatpush3.bf16.msra.mxu1 %v4937_v7  ;;  %v1790_v7 = vld [vmem:[%s7114_s5 + $0x178] sm:$0xff]  ;;  %v1785_v17 = vld [vmem:[%s7114_s5 + $0x150] sm:$0xff] }
 0x743   :  { %4910 = vmatprep.subr.bf16.mxu0 %v4909_v18  ;;  %4942 = vmatprep.subr.bf16.mxu1 %v4941_v20  ;;  %v4961_v13 = vpack.c.bf16 %v1790_v7, %v1787_v6  ;;  %v1788_v18 = vld [vmem:[%s7114_s5 + $0x168] sm:$0xff]  ;;  %v1837_v6 = vld [vmem:[%s7115_s6 + $0x170] sm:$0xff] }
 0x744   :  { %v6640_v7 = vpack.c.bf16 %v1837_v6, %v1834_v44  ;;  %v5640_v44 = vld [vmem:[%s7113_s4] ss:$0 sm:$0xff] }
 0x746   :  { %4912 = vmatpush1.bf16.msra.mxu0 %v4911_v23  ;;  %4944 = vmatpush3.bf16.msra.mxu1 %v4941_v20  ;;  %v4931_v20 = vpack.c.bf16 %v1788_v18, %v1785_v17  ;;  %v1804_v23 = vld [vmem:[%s7115_s6 + $0x68] sm:$0xff]  ;;  %v1799_v17 = vld [vmem:[%s7115_s6 + $0x40] sm:$0xff]  ;;  %v1802_v18 = vld [vmem:[%s7115_s6 + $0x58] sm:$0xff] }
 0x747   :  { %4914 = vmatprep.subr.bf16.mxu0 %v4913_v31  ;;  %4946 = vmatprep.subr.bf16.mxu1 %v4945_v33  ;;  %v1807_v31 = vld [vmem:[%s7115_s6 + $0x80] sm:$0xff] }
 0x74a   :  { %4916 = vmatpush1.bf16.msra.mxu0 %v4915_v61  ;;  %4948 = vmatpush3.bf16.msra.mxu1 %v4945_v33  ;;  %v6541_v33 = vpack.c.bf16 %v1807_v31, %v1804_v23  ;;  %v1809_v61 = vld [vmem:[%s7115_s6 + $0x90] sm:$0xff]  ;;  %v6689_v23 = vpack.c.bf16 %v1820_v16, %v1817_v15  ;;  %v1823_v31 = vld [vmem:[%s7115_s6 + $0x100] sm:$0xff] }
 0x74b   :  { %4918 = vmatprep.subr.bf16.mxu0 %v4917_v63  ;;  %4950 = vmatprep.subr.bf16.mxu1 %v4949_v2  ;;  %v1812_v63 = vld [vmem:[%s7115_s6 + $0xa8] sm:$0xff]  ;;  %v6699_v42 = vpack.c.bf16 %v1826_v40, %v1823_v31 }
 0x74e   :  { %4920 = vmatpush1.bf16.msra.mxu0 %v4919_v29  ;;  %4952 = vmatpush3.bf16.msra.mxu1 %v4949_v2  ;;  %v6567_v2 = vpack.c.bf16 %v1812_v63, %v1809_v61  ;;  %v1822_v29 = vld [vmem:[%s7115_s6 + $0xf8] sm:$0xff]  ;;  %v6709_v61 = vpack.c.bf16 %v1832_v53, %v1829_v51  ;;  %v1835_v63 = vld [vmem:[%s7115_s6 + $0x160] sm:$0xff] }
 0x74f   :  { %4922 = vmatprep.subr.bf16.mxu0 %v4921_v34  ;;  %4954 = vmatprep.subr.bf16.mxu1 %v4953_v57  ;;  %v1825_v34 = vld [vmem:[%s7115_s6 + $0x110] sm:$0xff]  ;;  %v6719_v10 = vpack.c.bf16 %v1838_v8, %v1835_v63 }
 0x752   :  { %4924 = vmatpush1.bf16.msra.mxu0 %v4923_v47  ;;  %4956 = vmatpush3.bf16.msra.mxu1 %v4953_v57  ;;  %v6595_v57 = vpack.c.bf16 %v1825_v34, %v1822_v29  ;;  %v6616_v47 = vpack.c.bf16 %v1831_v9, %v1828_v28 }
 0x753   :  { %4926 = vmatprep.subr.bf16.mxu0 %v4925_v49  ;;  %4958 = vmatprep.subr.bf16.mxu1 %v4957_v50  ;;  %v1830_v49 = vld [vmem:[%s7115_s6 + $0x138] sm:$0xff] }
 0x754   :  { %v6627_v0 = vpack.c.bf16 %v1830_v49, %v1827_v41 }
 0x756   :  { %4928 = vmatpush1.bf16.msra.mxu0 %v4927_v12  ;;  %4960 = vmatpush3.bf16.msra.mxu1 %v4957_v50  ;;  %v1793_v50 = vld [vmem:[%s7115_s6 + $0x10] sm:$0xff] }
 0x757   :  { %4930 = vmatprep.subr.bf16.mxu0 %v4929_v11  ;;  %4962 = vmatprep.subr.bf16.mxu1 %v4961_v13  ;;  %v6629_v39 = vpack.c.bf16 %v1796_v58, %v1793_v50  ;;  %v1833_v12 = vld [vmem:[%s7115_s6 + $0x150] sm:$0xff]  ;;  %v1836_v11 = vld [vmem:[%s7115_s6 + $0x168] sm:$0xff] }
 0x75a   :  { %4932 = vmatpush1.bf16.msra.mxu0 %v4931_v20  ;;  %4964 = vmatpush3.bf16.msra.mxu1 %v4961_v13  ;;  %v6649_v13 = vpack.c.bf16 %v1836_v11, %v1833_v12  ;;  %v6658_v20 = vpack.c.bf16 %v1802_v18, %v1799_v17 }
 0x75b   :  { %4997 = vmatprep.subr.bf16.mxu1 %v5642_v48 }
 0x75d   :  { %1930 = vmatmul.mubr.f32.vlgmr.msra.gmra.mrb[16].mxu0 %v6066_v5  ;;  %4154 = vmatmul.mubr.f32.vlgmr.msra.gmra.mrb[24].mxu1 %v6110_v62  ;;  %v1792_v5 = vld [vmem:[%s7115_s6 + $0x8] sm:$0xff] }
 0x75e   :  { %4156 = vmatprep.mubr.f32.mxu1 %v6154_v54  ;;  %1935 = vmatprep.mubr.f32.mxu0 %v5641_v3 }
 0x75f   :  { %4999 = vmatpush3.bf16.msra.mxu1 %v6629_v39 }
 0x760   :  { %5000 = vmatprep.subr.bf16.mxu1 %v5642_v48 }
 0x761   :  { %1936 = vmatmul.mubr.f32.gmra.mrb[18].mxu0 %v6110_v62  ;;  %4157 = vmatmul.mubr.f32.gmra.mrb[26].mxu1 %v6198_v46  ;;  %v1795_v62 = vld [vmem:[%s7115_s6 + $0x20] sm:$0xff] }
 0x762   :  { %4159 = vmatprep.mubr.f32.mxu1 %v6242_v38  ;;  %1941 = vmatprep.mubr.f32.mxu0 %v5641_v3 }
 0x763   :  { %5002 = vmatpush3.bf16.msra.mxu1 %v6658_v20 }
 0x764   :  { %5003 = vmatprep.subr.bf16.mxu1 %v5642_v48 }
 0x765   :  { %1942 = vmatmul.mubr.f32.gmra.mrb[20].mxu0 %v6154_v54  ;;  %4160 = vmatmul.mubr.f32.gmra.mrb[28].mxu1 %v6286_v30  ;;  %v6505_v54 = vpack.c.bf16 %v1795_v62, %v1792_v5  ;;  %v1805_v5 = vld [vmem:[%s7115_s6 + $0x70] sm:$0xff]  ;;  %v1808_v62 = vld [vmem:[%s7115_s6 + $0x88] sm:$0xff] }
 0x766   :  { %4162 = vmatprep.mubr.f32.mxu1 %v6358_v43  ;;  %1947 = vmatprep.mubr.f32.mxu0 %v5641_v3 }
 0x767   :  { %4966 = vmatprep.subr.bf16.mxu0 %v6505_v54 }
 0x769   :  { %1948 = vmatmul.mubr.f32.gmra.mrb[22].mxu0 %v6198_v46  ;;  %v1791_v46 = vld [vmem:[%s7115_s6] sm:$0xff] }
 0x76a   :  { %1953 = vmatprep.mubr.f32.mxu0 %v5641_v3 }
 0x76d   :  { %1954 = vmatmul.mubr.f32.gmra.mrb[24].mxu0 %v6242_v38  ;;  %v1794_v38 = vld [vmem:[%s7115_s6 + $0x18] sm:$0xff] }
 0x76e   :  { %1959 = vmatprep.mubr.f32.mxu0 %v5641_v3 }
 0x771   :  { %1960 = vmatmul.mubr.f32.gmra.mrb[26].mxu0 %v6286_v30  ;;  %v6513_v30 = vpack.c.bf16 %v1794_v38, %v1791_v46  ;;  %v1811_v46 = vld [vmem:[%s7115_s6 + $0xa0] sm:$0xff]  ;;  %v6673_v38 = vpack.c.bf16 %v1808_v62, %v1805_v5 }
 0x772   :  { %1965 = vmatprep.mubr.f32.mxu0 %v5641_v3  ;;  %v6679_v25 = vpack.c.bf16 %v1814_v24, %v1811_v46 }
 0x773   :  { %4968 = vmatpush1.bf16.msra.mxu0 %v6513_v30  ;;  %5005 = vmatpush3.bf16.msra.mxu1 %v6673_v38 }
 0x774   :  { %4970 = vmatprep.subr.bf16.mxu0 %v6523_v27  ;;  %5006 = vmatprep.subr.bf16.mxu1 %v5642_v48 }
 0x775   :  { %1966 = vmatmul.mubr.f32.gmra.mrb[28].mxu0 %v6358_v43 }
 0x776   :  { %1971 = vmatprep.mubr.f32.mxu0 %v5641_v3 }
 0x777   :  { %4972 = vmatpush1.bf16.msra.mxu0 %v6531_v22  ;;  %5008 = vmatpush3.bf16.msra.mxu1 %v6679_v25 }
 0x778   :  { %4974 = vmatprep.subr.bf16.mxu0 %v6541_v33  ;;  %5009 = vmatprep.subr.bf16.mxu1 %v5642_v48 }
 0x77b   :  { %4976 = vmatpush1.bf16.msra.mxu0 %v6549_v45  ;;  %5011 = vmatpush3.bf16.msra.mxu1 %v6689_v23 }
 0x77c   :  { %4978 = vmatprep.subr.bf16.mxu0 %v6559_v56  ;;  %5012 = vmatprep.subr.bf16.mxu1 %v5642_v48 }
 0x77f   :  { %4980 = vmatpush1.bf16.msra.mxu0 %v6567_v2  ;;  %5014 = vmatpush3.bf16.msra.mxu1 %v6699_v42 }
 0x780   :  { %4982 = vmatprep.subr.bf16.mxu0 %v6577_v14  ;;  %5015 = vmatprep.subr.bf16.mxu1 %v5642_v48 }
 0x783   :  { %4984 = vmatpush1.bf16.msra.mxu0 %v6585_v26  ;;  %5017 = vmatpush3.bf16.msra.mxu1 %v6709_v61 }
 0x784   :  { %4986 = vmatprep.subr.bf16.mxu0 %v6595_v57  ;;  %5018 = vmatprep.subr.bf16.mxu1 %v5642_v48 }
 0x787   :  { %4988 = vmatpush1.bf16.msra.mxu0 %v6603_v60  ;;  %5020 = vmatpush3.bf16.msra.mxu1 %v6719_v10 }
 0x788   :  { %4990 = vmatprep.subr.bf16.mxu0 %v6616_v47  ;;  %5053 = vmatprep.subr.bf16.mxu1 %v5642_v48 }
 0x78b   :  { %4992 = vmatpush1.bf16.msra.mxu0 %v6627_v0 }
 0x78c   :  { %4994 = vmatprep.subr.bf16.mxu0 %v6640_v7 }
 0x78f   :  { %4996 = vmatpush1.bf16.msra.mxu0 %v6649_v13 }
 0x790   :  { %5022 = vmatprep.subr.bf16.mxu0 %v6505_v54 }
 0x810   :  { %v1643_v19 = vpop.f32.mrb[14].mxu0  ;;  %v1714_v21 = vpop.f32.mrb[22].mxu1 }
 0x811   :  { %v5427_v29 = vadd.f32 %v1643_v19, %v6046_v59  ;;  %v1645_v34 = vpop.f32.mrb[15].mxu0  ;;  %v4120_v32 = vpop.f32.mrb[23].mxu1  ;;  %v1732_v6 = vadd.f32 %v5640_v44, %v1714_v21 }
 0x812   :  { %v5428_v28 = vadd.f32 %v1645_v34, %v6052_v1 }
 0x813   :  { %v3493_v35 = vmul.f32 -1.442695, %v5427_v29 }
 0x814   :  { %v3494_v9 = vmul.f32 -1.442695, %v5428_v28 }
 0x815   :  { %5550 = vpow2.f32 %v3493_v35 }
 0x816   :  { %5552 = vpow2.f32 %v3494_v9 }
 0x81f   :  { %v5551_v41 = vpop.eup %5550 }
 0x820   :  { %v1722_v49 = vadd.f32 1.0, %v5551_v41  ;;  %v5553_v50 = vpop.eup %5552 }
 0x821   :  { %v1729_v58 = vadd.f32 1.0, %v5553_v50 }
 0x822   :  { %5554 = vrcp.f32 %v1722_v49 }
 0x823   :  { %5556 = vrcp.f32 %v1729_v58 }
 0x82c   :  { %v5555_v12 = vpop.eup %5554 }
 0x82d   :  { %v1733_v59 = vmul.f32 %v5555_v12, %v1732_v6  ;;  %v5557_v62 = vpop.eup %5556 }
 0x82e   :  { %v1736_v15 = vsub.f32 1.0, %v5557_v62  ;;  %v1738_v40 = vmul.f32 %v5557_v62, %v6358_v43  ;;  %v1839_v43 = vld [vmem:[%s7116_s7] sm:$0x7] }
 0x82f   :  { %v1734_v11 = vadd.f32 %v1733_v59, %v6054_v4  ;;  %v6792_v63 = vrot.slane %v1839_v43, %v105_v52  ;;  %v6796_v19 = vrot.slane %v1839_v43, %v109_v55  ;;  %v6803_v55 = vld [vmem:[%s7117_s8] ss:$0 sm:$0xff]  ;;  %v6807_v50 = vrot.slane %v1839_v43, %v113_v37 }
 0x830   :  { %v6730_v17 = vpop.f32.mrb[24].mxu1 }
 0x831   :  { %5558 = vtanh.f32 %v1734_v11  ;;  %v6732_v1 = vpop.f32.mrb[25].mxu1 }
 0x832   :  { %v2045_v12 = vadd.f32 %v6732_v1, %v6807_v50 }
 0x834   :  { %v6734_v18 = vpop.f32.mrb[26].mxu1 }
 0x835   :  { %v6736_v5 = vpop.f32.mrb[27].mxu1 }
 0x838   :  { %v6738_v46 = vpop.f32.mrb[28].mxu1 }
 0x839   :  { %v6740_v24 = vpop.f32.mrb[29].mxu1 }
 0x83b   :  { %v5559_v16 = vpop.eup %5558 }
 0x83c   :  { %v1737_v31 = vmul.f32 %v5559_v16, %v1736_v15 }
 0x83e   :  { %v1739_v4 = vadd.f32 %v1738_v40, %v1737_v31 }
 0x840   :  { %1972 = vmatmul.mubr.f32.gmra.mrb[30].mxu0 %v1739_v4  ;;  %4163 = vmatmul.mubr.f32.gmra.mrb[30].mxu1 %v1739_v4 }
 0x841   :  { %2175 = vmatprep.mubr.f32.mxu0 %v5641_v3  ;;  %4197 = vmatprep.mubr.msk.f32.mxu1 %vm5643_vm1, %v5641_v3 }
 0x844   :  { %2176 = vmatmul.mubr.f32.vlgmr.msra.gmra.mrb[16].mxu0 %v5641_v3  ;;  %4198 = vmatmul.mubr.f32.vlgmr.msra.gmra.mrb[32].mxu1 %v5641_v3 }
 0x845   :  { %5024 = vmatpush1.bf16.msra.mxu0 %v6513_v30  ;;  %5055 = vmatpush3.bf16.msra.mxu1 %v6629_v39 }
 0x846   :  { %5026 = vmatprep.subr.bf16.mxu0 %v6523_v27  ;;  %5056 = vmatprep.subr.bf16.mxu1 %v5642_v48 }
 0x847   :  { %2348 = vmatprep.mubr.f32.mxu0 %v5641_v3  ;;  %4232 = vmatprep.mubr.msk.f32.mxu1 %vm5643_vm1, %v5641_v3 }
 0x849   :  { %5028 = vmatpush1.bf16.msra.mxu0 %v6531_v22  ;;  %5058 = vmatpush3.bf16.msra.mxu1 %v6658_v20 }
 0x84a   :  { %5030 = vmatprep.subr.bf16.mxu0 %v6541_v33  ;;  %5059 = vmatprep.subr.bf16.mxu1 %v5642_v48 }
 0x84d   :  { %5032 = vmatpush1.bf16.msra.mxu0 %v6549_v45  ;;  %5061 = vmatpush3.bf16.msra.mxu1 %v6673_v38 }
 0x84e   :  { %5034 = vmatprep.subr.bf16.mxu0 %v6559_v56  ;;  %5062 = vmatprep.subr.bf16.mxu1 %v5642_v48 }
 0x851   :  { %5036 = vmatpush1.bf16.msra.mxu0 %v6567_v2  ;;  %5064 = vmatpush3.bf16.msra.mxu1 %v6679_v25 }
 0x852   :  { %5038 = vmatprep.subr.bf16.mxu0 %v6577_v14  ;;  %5065 = vmatprep.subr.bf16.mxu1 %v5642_v48 }
 0x855   :  { %5040 = vmatpush1.bf16.msra.mxu0 %v6585_v26  ;;  %5067 = vmatpush3.bf16.msra.mxu1 %v6689_v23 }
 0x856   :  { %5042 = vmatprep.subr.bf16.mxu0 %v6595_v57  ;;  %5068 = vmatprep.subr.bf16.mxu1 %v5642_v48 }
 0x859   :  { %5044 = vmatpush1.bf16.msra.mxu0 %v6603_v60  ;;  %5070 = vmatpush3.bf16.msra.mxu1 %v6699_v42 }
 0x85a   :  { %5046 = vmatprep.subr.bf16.mxu0 %v6616_v47  ;;  %5071 = vmatprep.subr.bf16.mxu1 %v5642_v48 }
 0x85d   :  { %5048 = vmatpush1.bf16.msra.mxu0 %v6627_v0  ;;  %5073 = vmatpush3.bf16.msra.mxu1 %v6709_v61 }
 0x85e   :  { %5050 = vmatprep.subr.bf16.mxu0 %v6640_v7  ;;  %5074 = vmatprep.subr.bf16.mxu1 %v5642_v48 }
 0x861   :  { %5052 = vmatpush1.bf16.msra.mxu0 %v6649_v13  ;;  %5076 = vmatpush3.bf16.msra.mxu1 %v6719_v10 }
 0x862   :  { %5078 = vmatprep.subr.bf16.mxu0 %v6505_v54  ;;  %5109 = vmatprep.subr.bf16.mxu1 %v5642_v48 }
 0x913   :  { %v6786_v51 = vpop.f32.mrb[30].mxu1 }
 0x914   :  { %v6788_v53 = vpop.f32.mrb[31].mxu1 }
 0x917   :  { %v2177_v8 = vpop.f32.mrb[16].mxu0  ;;  %v2248_v21 = vpop.f32.mrb[32].mxu1 }
 0x918   :  { %v5429_v29 = vadd.f32 %v2177_v8, %v6792_v63  ;;  %v2179_v34 = vpop.f32.mrb[17].mxu0  ;;  %v4199_v32 = vpop.f32.mrb[33].mxu1  ;;  %v2272_v44 = vadd.f32 %v6803_v55, %v2248_v21 }
 0x919   :  { %v5430_v28 = vadd.f32 %v2179_v34, %v6796_v19 }
 0x91a   :  { %v3495_v35 = vmul.f32 -1.442695, %v5429_v29 }
 0x91b   :  { %v3496_v9 = vmul.f32 -1.442695, %v5430_v28 }
 0x91c   :  { %5560 = vpow2.f32 %v3495_v35 }
 0x91d   :  { %5562 = vpow2.f32 %v3496_v9 }
 0x926   :  { %v5561_v41 = vpop.eup %5560 }
 0x927   :  { %v2256_v49 = vadd.f32 1.0, %v5561_v41  ;;  %v5563_v52 = vpop.eup %5562 }
 0x928   :  { %v2263_v58 = vadd.f32 1.0, %v5563_v52  ;;  %v2050_v52 = vadd.f32 %v6730_v17, %v6807_v50 }
 0x929   :  { %5564 = vrcp.f32 %v2256_v49 }
 0x92a   :  { %5566 = vrcp.f32 %v2263_v58 }
 0x933   :  { %v5565_v6 = vpop.eup %5564 }
 0x934   :  { %v2273_v59 = vmul.f32 %v5565_v6, %v2272_v44  ;;  %v5567_v62 = vpop.eup %5566 }
 0x935   :  { %v2276_v15 = vsub.f32 1.0, %v5567_v62  ;;  %v2278_v40 = vmul.f32 0.0, %v5567_v62 }
 0x936   :  { %v2274_v11 = vadd.f32 %v2273_v59, %v2045_v12 }
 0x938   :  { %5568 = vtanh.f32 %v2274_v11 }
 0x942   :  { %v5569_v16 = vpop.eup %5568 }
 0x943   :  { %v2277_v31 = vmul.f32 %v5569_v16, %v2276_v15 }
 0x945   :  { %v6812_v4 = vadd.f32 %v2278_v40, %v2277_v31 }
 0x947   :  { %2280 = vst [vmem:[%s7118_s9] sm:$0xff] %v6812_v4  ;;  %2349 = vmatmul.mubr.f32.vlgmr.msra.gmra.mrb[18].mxu0 %v6812_v4  ;;  %4233 = vmatmul.mubr.f32.vlgmr.msra.gmra.mrb[34].mxu1 %v6812_v4 }
 0x948   :  { %5080 = vmatpush1.bf16.msra.mxu0 %v6513_v30  ;;  %5111 = vmatpush3.bf16.msra.mxu1 %v6629_v39 }
 0x949   :  { %5082 = vmatprep.subr.bf16.mxu0 %v6523_v27  ;;  %5112 = vmatprep.subr.bf16.mxu1 %v5642_v48 }
 0x94a   :  { %2516 = vmatprep.mubr.f32.mxu0 %v5641_v3  ;;  %4267 = vmatprep.mubr.msk.f32.mxu1 %vm5643_vm1, %v5641_v3 }
 0x94c   :  { %5084 = vmatpush1.bf16.msra.mxu0 %v6531_v22  ;;  %5114 = vmatpush3.bf16.msra.mxu1 %v6658_v20 }
 0x94d   :  { %5086 = vmatprep.subr.bf16.mxu0 %v6541_v33  ;;  %5115 = vmatprep.subr.bf16.mxu1 %v5642_v48 }
 0x950   :  { %5088 = vmatpush1.bf16.msra.mxu0 %v6549_v45  ;;  %5117 = vmatpush3.bf16.msra.mxu1 %v6673_v38 }
 0x951   :  { %5090 = vmatprep.subr.bf16.mxu0 %v6559_v56  ;;  %5118 = vmatprep.subr.bf16.mxu1 %v5642_v48 }
 0x954   :  { %5092 = vmatpush1.bf16.msra.mxu0 %v6567_v2  ;;  %5120 = vmatpush3.bf16.msra.mxu1 %v6679_v25 }
 0x955   :  { %5094 = vmatprep.subr.bf16.mxu0 %v6577_v14  ;;  %5121 = vmatprep.subr.bf16.mxu1 %v5642_v48 }
 0x958   :  { %5096 = vmatpush1.bf16.msra.mxu0 %v6585_v26  ;;  %5123 = vmatpush3.bf16.msra.mxu1 %v6689_v23 }
 0x959   :  { %5098 = vmatprep.subr.bf16.mxu0 %v6595_v57  ;;  %5124 = vmatprep.subr.bf16.mxu1 %v5642_v48 }
 0x95c   :  { %5100 = vmatpush1.bf16.msra.mxu0 %v6603_v60  ;;  %5126 = vmatpush3.bf16.msra.mxu1 %v6699_v42 }
 0x95d   :  { %5102 = vmatprep.subr.bf16.mxu0 %v6616_v47  ;;  %5127 = vmatprep.subr.bf16.mxu1 %v5642_v48 }
 0x960   :  { %5104 = vmatpush1.bf16.msra.mxu0 %v6627_v0  ;;  %5129 = vmatpush3.bf16.msra.mxu1 %v6709_v61 }
 0x961   :  { %5106 = vmatprep.subr.bf16.mxu0 %v6640_v7  ;;  %5130 = vmatprep.subr.bf16.mxu1 %v5642_v48 }
 0x964   :  { %5108 = vmatpush1.bf16.msra.mxu0 %v6649_v13  ;;  %5132 = vmatpush3.bf16.msra.mxu1 %v6719_v10 }
 0x965   :  { %5134 = vmatprep.subr.bf16.mxu0 %v6505_v54  ;;  %5165 = vmatprep.subr.bf16.mxu1 %v5642_v48 }
 0xa1a   :  { %v2350_v36 = vpop.f32.mrb[18].mxu0  ;;  %v2421_v37 = vpop.f32.mrb[34].mxu1 }
 0xa1b   :  { %v5431_v1 = vadd.f32 %v2350_v36, %v6792_v63  ;;  %v2352_v43 = vpop.f32.mrb[19].mxu0  ;;  %v4234_v8 = vpop.f32.mrb[35].mxu1  ;;  %v2439_v41 = vadd.f32 %v6803_v55, %v2421_v37 }
 0xa1c   :  { %v5432_v29 = vadd.f32 %v2352_v43, %v6796_v19 }
 0xa1d   :  { %v3498_v21 = vmul.f32 -1.442695, %v5431_v1 }
 0xa1e   :  { %v3499_v34 = vmul.f32 -1.442695, %v5432_v29 }
 0xa1f   :  { %5570 = vpow2.f32 %v3498_v21 }
 0xa20   :  { %5572 = vpow2.f32 %v3499_v34 }
 0xa29   :  { %v5571_v32 = vpop.eup %5570 }
 0xa2a   :  { %v2429_v35 = vadd.f32 1.0, %v5571_v32  ;;  %v5573_v28 = vpop.eup %5572 }
 0xa2b   :  { %v2436_v9 = vadd.f32 1.0, %v5573_v28 }
 0xa2c   :  { %5574 = vrcp.f32 %v2429_v35  ;;  %v2055_v35 = vadd.f32 %v6736_v5, %v6807_v50 }
 0xa2d   :  { %5576 = vrcp.f32 %v2436_v9 }
 0xa36   :  { %v5575_v49 = vpop.eup %5574 }
 0xa37   :  { %v2440_v58 = vmul.f32 %v5575_v49, %v2439_v41  ;;  %v5577_v6 = vpop.eup %5576 }
 0xa38   :  { %v2443_v12 = vsub.f32 1.0, %v5577_v6  ;;  %v2445_v62 = vmul.f32 %v5577_v6, %v6812_v4 }
 0xa39   :  { %v2441_v44 = vadd.f32 %v2440_v58, %v2050_v52 }
 0xa3b   :  { %5578 = vtanh.f32 %v2441_v44 }
 0xa45   :  { %v5579_v59 = vpop.eup %5578 }
 0xa46   :  { %v2444_v11 = vmul.f32 %v5579_v59, %v2443_v12 }
 0xa48   :  { %v6861_v15 = vadd.f32 %v2445_v62, %v2444_v11 }
 0xa4a   :  { %3500 = vst [vmem:[%s7118_s9 + $0x8] sm:$0xff] %v6861_v15  ;;  %2517 = vmatmul.mubr.f32.vlgmr.msra.gmra.mrb[20].mxu0 %v6861_v15  ;;  %4268 = vmatmul.mubr.f32.vlgmr.msra.gmra.mrb[36].mxu1 %v6861_v15 }
 0xa4b   :  { %5136 = vmatpush1.bf16.msra.mxu0 %v6513_v30  ;;  %5167 = vmatpush3.bf16.msra.mxu1 %v6629_v39 }
 0xa4c   :  { %5138 = vmatprep.subr.bf16.mxu0 %v6523_v27  ;;  %5168 = vmatprep.subr.bf16.mxu1 %v5642_v48 }
 0xa4d   :  { %2684 = vmatprep.mubr.f32.mxu0 %v5641_v3  ;;  %4302 = vmatprep.mubr.msk.f32.mxu1 %vm5643_vm1, %v5641_v3 }
 0xa4f   :  { %5140 = vmatpush1.bf16.msra.mxu0 %v6531_v22  ;;  %5170 = vmatpush3.bf16.msra.mxu1 %v6658_v20 }
 0xa50   :  { %5142 = vmatprep.subr.bf16.mxu0 %v6541_v33  ;;  %5171 = vmatprep.subr.bf16.mxu1 %v5642_v48 }
 0xa53   :  { %5144 = vmatpush1.bf16.msra.mxu0 %v6549_v45  ;;  %5173 = vmatpush3.bf16.msra.mxu1 %v6673_v38 }
 0xa54   :  { %5146 = vmatprep.subr.bf16.mxu0 %v6559_v56  ;;  %5174 = vmatprep.subr.bf16.mxu1 %v5642_v48 }
 0xa57   :  { %5148 = vmatpush1.bf16.msra.mxu0 %v6567_v2  ;;  %5176 = vmatpush3.bf16.msra.mxu1 %v6679_v25 }
 0xa58   :  { %5150 = vmatprep.subr.bf16.mxu0 %v6577_v14  ;;  %5177 = vmatprep.subr.bf16.mxu1 %v5642_v48 }
 0xa5b   :  { %5152 = vmatpush1.bf16.msra.mxu0 %v6585_v26  ;;  %5179 = vmatpush3.bf16.msra.mxu1 %v6689_v23 }
 0xa5c   :  { %5154 = vmatprep.subr.bf16.mxu0 %v6595_v57  ;;  %5180 = vmatprep.subr.bf16.mxu1 %v5642_v48 }
 0xa5f   :  { %5156 = vmatpush1.bf16.msra.mxu0 %v6603_v60  ;;  %5182 = vmatpush3.bf16.msra.mxu1 %v6699_v42 }
 0xa60   :  { %5158 = vmatprep.subr.bf16.mxu0 %v6616_v47  ;;  %5183 = vmatprep.subr.bf16.mxu1 %v5642_v48 }
 0xa63   :  { %5160 = vmatpush1.bf16.msra.mxu0 %v6627_v0  ;;  %5185 = vmatpush3.bf16.msra.mxu1 %v6709_v61 }
 0xa64   :  { %5162 = vmatprep.subr.bf16.mxu0 %v6640_v7  ;;  %5186 = vmatprep.subr.bf16.mxu1 %v5642_v48 }
 0xa67   :  { %5164 = vmatpush1.bf16.msra.mxu0 %v6649_v13  ;;  %5188 = vmatpush3.bf16.msra.mxu1 %v6719_v10 }
 0xa68   :  { %5190 = vmatprep.subr.bf16.mxu0 %v6505_v54  ;;  %5221 = vmatprep.subr.bf16.mxu1 %v5642_v48 }
 0xb1d   :  { %v2518_v17 = vpop.f32.mrb[20].mxu0  ;;  %v2589_v16 = vpop.f32.mrb[36].mxu1 }
 0xb1e   :  { %v5433_v31 = vadd.f32 %v2518_v17, %v6792_v63  ;;  %v2520_v40 = vpop.f32.mrb[21].mxu0  ;;  %v4269_v4 = vpop.f32.mrb[37].mxu1  ;;  %v2607_v34 = vadd.f32 %v6803_v55, %v2589_v16 }
 0xb1f   :  { %v5434_v37 = vadd.f32 %v2520_v40, %v6796_v19 }
 0xb20   :  { %v3501_v36 = vmul.f32 -1.442695, %v5433_v31 }
 0xb21   :  { %v3502_v1 = vmul.f32 -1.442695, %v5434_v37 }
 0xb22   :  { %5580 = vpow2.f32 %v3501_v36 }
 0xb23   :  { %5582 = vpow2.f32 %v3502_v1 }
 0xb2c   :  { %v5581_v43 = vpop.eup %5580 }
 0xb2d   :  { %v2597_v8 = vadd.f32 1.0, %v5581_v43  ;;  %v5583_v21 = vpop.eup %5582  ;;  %v2060_v43 = vadd.f32 %v6734_v18, %v6807_v50 }
 0xb2e   :  { %v2604_v29 = vadd.f32 1.0, %v5583_v21 }
 0xb2f   :  { %5584 = vrcp.f32 %v2597_v8 }
 0xb30   :  { %5586 = vrcp.f32 %v2604_v29 }
 0xb39   :  { %v5585_v32 = vpop.eup %5584 }
 0xb3a   :  { %v2608_v28 = vmul.f32 %v5585_v32, %v2607_v34  ;;  %v5587_v41 = vpop.eup %5586 }
 0xb3b   :  { %v2611_v49 = vsub.f32 1.0, %v5587_v41  ;;  %v2613_v44 = vmul.f32 %v5587_v41, %v6861_v15 }
 0xb3c   :  { %v2609_v9 = vadd.f32 %v2608_v28, %v2055_v35 }
 0xb3e   :  { %5588 = vtanh.f32 %v2609_v9 }
 0xb48   :  { %v5589_v52 = vpop.eup %5588 }
 0xb49   :  { %v2612_v58 = vmul.f32 %v5589_v52, %v2611_v49 }
 0xb4b   :  { %v6910_v6 = vadd.f32 %v2613_v44, %v2612_v58 }
 0xb4d   :  { %3503 = vst [vmem:[%s7118_s9 + $0x10] sm:$0xff] %v6910_v6  ;;  %2685 = vmatmul.mubr.f32.vlgmr.msra.gmra.mrb[22].mxu0 %v6910_v6  ;;  %4303 = vmatmul.mubr.f32.vlgmr.msra.gmra.mrb[38].mxu1 %v6910_v6 }
 0xb4e   :  { %5192 = vmatpush1.bf16.msra.mxu0 %v6513_v30  ;;  %5223 = vmatpush3.bf16.msra.mxu1 %v6629_v39 }
 0xb4f   :  { %5194 = vmatprep.subr.bf16.mxu0 %v6523_v27  ;;  %5224 = vmatprep.subr.bf16.mxu1 %v5642_v48 }
 0xb50   :  { %2852 = vmatprep.mubr.f32.mxu0 %v5641_v3  ;;  %4337 = vmatprep.mubr.msk.f32.mxu1 %vm5643_vm1, %v5641_v3 }
 0xb52   :  { %5196 = vmatpush1.bf16.msra.mxu0 %v6531_v22  ;;  %5226 = vmatpush3.bf16.msra.mxu1 %v6658_v20 }
 0xb53   :  { %5198 = vmatprep.subr.bf16.mxu0 %v6541_v33  ;;  %5227 = vmatprep.subr.bf16.mxu1 %v5642_v48 }
 0xb56   :  { %5200 = vmatpush1.bf16.msra.mxu0 %v6549_v45  ;;  %5229 = vmatpush3.bf16.msra.mxu1 %v6673_v38 }
 0xb57   :  { %5202 = vmatprep.subr.bf16.mxu0 %v6559_v56  ;;  %5230 = vmatprep.subr.bf16.mxu1 %v5642_v48 }
 0xb5a   :  { %5204 = vmatpush1.bf16.msra.mxu0 %v6567_v2  ;;  %5232 = vmatpush3.bf16.msra.mxu1 %v6679_v25 }
 0xb5b   :  { %5206 = vmatprep.subr.bf16.mxu0 %v6577_v14  ;;  %5233 = vmatprep.subr.bf16.mxu1 %v5642_v48 }
 0xb5e   :  { %5208 = vmatpush1.bf16.msra.mxu0 %v6585_v26  ;;  %5235 = vmatpush3.bf16.msra.mxu1 %v6689_v23 }
 0xb5f   :  { %5210 = vmatprep.subr.bf16.mxu0 %v6595_v57  ;;  %5236 = vmatprep.subr.bf16.mxu1 %v5642_v48 }
 0xb62   :  { %5212 = vmatpush1.bf16.msra.mxu0 %v6603_v60  ;;  %5238 = vmatpush3.bf16.msra.mxu1 %v6699_v42 }
 0xb63   :  { %5214 = vmatprep.subr.bf16.mxu0 %v6616_v47  ;;  %5239 = vmatprep.subr.bf16.mxu1 %v5642_v48 }
 0xb66   :  { %5216 = vmatpush1.bf16.msra.mxu0 %v6627_v0  ;;  %5241 = vmatpush3.bf16.msra.mxu1 %v6709_v61 }
 0xb67   :  { %5218 = vmatprep.subr.bf16.mxu0 %v6640_v7  ;;  %5242 = vmatprep.subr.bf16.mxu1 %v5642_v48 }
 0xb6a   :  { %5220 = vmatpush1.bf16.msra.mxu0 %v6649_v13  ;;  %5244 = vmatpush3.bf16.msra.mxu1 %v6719_v10 }
 0xb6b   :  { %5246 = vmatprep.subr.bf16.mxu0 %v6505_v54  ;;  %5277 = vmatprep.subr.bf16.mxu1 %v5642_v48 }
 0xc20   :  { %v2686_v5 = vpop.f32.mrb[22].mxu0  ;;  %v2757_v12 = vpop.f32.mrb[38].mxu1 }
 0xc21   :  { %v5435_v59 = vadd.f32 %v2686_v5, %v6792_v63  ;;  %v2688_v11 = vpop.f32.mrb[23].mxu0  ;;  %v4304_v62 = vpop.f32.mrb[39].mxu1  ;;  %v2775_v37 = vadd.f32 %v6803_v55, %v2757_v12 }
 0xc22   :  { %v5436_v17 = vadd.f32 %v2688_v11, %v6796_v19 }
 0xc23   :  { %v3504_v15 = vmul.f32 -1.442695, %v5435_v59 }
 0xc24   :  { %v3505_v16 = vmul.f32 -1.442695, %v5436_v17 }
 0xc25   :  { %5590 = vpow2.f32 %v3504_v15 }
 0xc26   :  { %5592 = vpow2.f32 %v3505_v16  ;;  %v2065_v16 = vadd.f32 %v6740_v24, %v6807_v50 }
 0xc2f   :  { %v5591_v31 = vpop.eup %5590 }
 0xc30   :  { %v2765_v40 = vadd.f32 1.0, %v5591_v31  ;;  %v5593_v4 = vpop.eup %5592 }
 0xc31   :  { %v2772_v36 = vadd.f32 1.0, %v5593_v4 }
 0xc32   :  { %5594 = vrcp.f32 %v2765_v40 }
 0xc33   :  { %5596 = vrcp.f32 %v2772_v36 }
 0xc3c   :  { %v5595_v1 = vpop.eup %5594 }
 0xc3d   :  { %v2776_v8 = vmul.f32 %v5595_v1, %v2775_v37  ;;  %v5597_v29 = vpop.eup %5596 }
 0xc3e   :  { %v2779_v34 = vsub.f32 1.0, %v5597_v29  ;;  %v2781_v28 = vmul.f32 %v5597_v29, %v6910_v6 }
 0xc3f   :  { %v2777_v21 = vadd.f32 %v2776_v8, %v2060_v43 }
 0xc41   :  { %5598 = vtanh.f32 %v2777_v21 }
 0xc4b   :  { %v5599_v32 = vpop.eup %5598 }
 0xc4c   :  { %v2780_v35 = vmul.f32 %v5599_v32, %v2779_v34 }
 0xc4e   :  { %v6959_v9 = vadd.f32 %v2781_v28, %v2780_v35 }
 0xc50   :  { %3506 = vst [vmem:[%s7118_s9 + $0x18] sm:$0xff] %v6959_v9  ;;  %2853 = vmatmul.mubr.f32.vlgmr.msra.gmra.mrb[24].mxu0 %v6959_v9  ;;  %4338 = vmatmul.mubr.f32.vlgmr.msra.gmra.mrb[40].mxu1 %v6959_v9 }
 0xc51   :  { %5248 = vmatpush1.bf16.msra.mxu0 %v6513_v30  ;;  %5279 = vmatpush3.bf16.msra.mxu1 %v6629_v39 }
 0xc52   :  { %5250 = vmatprep.subr.bf16.mxu0 %v6523_v27  ;;  %5280 = vmatprep.subr.bf16.mxu1 %v5642_v48 }
 0xc53   :  { %3020 = vmatprep.mubr.f32.mxu0 %v5641_v3  ;;  %4372 = vmatprep.mubr.msk.f32.mxu1 %vm5643_vm1, %v5641_v3 }
 0xc55   :  { %5252 = vmatpush1.bf16.msra.mxu0 %v6531_v22  ;;  %5282 = vmatpush3.bf16.msra.mxu1 %v6658_v20 }
 0xc56   :  { %5254 = vmatprep.subr.bf16.mxu0 %v6541_v33  ;;  %5283 = vmatprep.subr.bf16.mxu1 %v5642_v48 }
 0xc59   :  { %5256 = vmatpush1.bf16.msra.mxu0 %v6549_v45  ;;  %5285 = vmatpush3.bf16.msra.mxu1 %v6673_v38 }
 0xc5a   :  { %5258 = vmatprep.subr.bf16.mxu0 %v6559_v56  ;;  %5286 = vmatprep.subr.bf16.mxu1 %v5642_v48 }
 0xc5d   :  { %5260 = vmatpush1.bf16.msra.mxu0 %v6567_v2  ;;  %5288 = vmatpush3.bf16.msra.mxu1 %v6679_v25 }
 0xc5e   :  { %5262 = vmatprep.subr.bf16.mxu0 %v6577_v14  ;;  %5289 = vmatprep.subr.bf16.mxu1 %v5642_v48 }
 0xc61   :  { %5264 = vmatpush1.bf16.msra.mxu0 %v6585_v26  ;;  %5291 = vmatpush3.bf16.msra.mxu1 %v6689_v23 }
 0xc62   :  { %5266 = vmatprep.subr.bf16.mxu0 %v6595_v57  ;;  %5292 = vmatprep.subr.bf16.mxu1 %v5642_v48 }
 0xc65   :  { %5268 = vmatpush1.bf16.msra.mxu0 %v6603_v60  ;;  %5294 = vmatpush3.bf16.msra.mxu1 %v6699_v42 }
 0xc66   :  { %5270 = vmatprep.subr.bf16.mxu0 %v6616_v47  ;;  %5295 = vmatprep.subr.bf16.mxu1 %v5642_v48 }
 0xc69   :  { %5272 = vmatpush1.bf16.msra.mxu0 %v6627_v0  ;;  %5297 = vmatpush3.bf16.msra.mxu1 %v6709_v61 }
 0xc6a   :  { %5274 = vmatprep.subr.bf16.mxu0 %v6640_v7  ;;  %5298 = vmatprep.subr.bf16.mxu1 %v5642_v48 }
 0xc6d   :  { %5276 = vmatpush1.bf16.msra.mxu0 %v6649_v13  ;;  %5300 = vmatpush3.bf16.msra.mxu1 %v6719_v10 }
 0xc6e   :  { %5302 = vmatprep.subr.bf16.mxu0 %v6505_v54  ;;  %5333 = vmatprep.subr.bf16.mxu1 %v5642_v48 }
 0xd23   :  { %v2854_v18 = vpop.f32.mrb[24].mxu0  ;;  %v2925_v41 = vpop.f32.mrb[40].mxu1 }
 0xd24   :  { %v5437_v49 = vadd.f32 %v2854_v18, %v6792_v63  ;;  %v2856_v52 = vpop.f32.mrb[25].mxu0  ;;  %v4339_v58 = vpop.f32.mrb[41].mxu1  ;;  %v2943_v15 = vadd.f32 %v6803_v55, %v2925_v41 }
 0xd25   :  { %v5438_v6 = vadd.f32 %v2856_v52, %v6796_v19 }
 0xd26   :  { %v3507_v44 = vmul.f32 -1.442695, %v5437_v49 }
 0xd27   :  { %v3508_v5 = vmul.f32 -1.442695, %v5438_v6 }
 0xd28   :  { %5600 = vpow2.f32 %v3507_v44  ;;  %v2070_v44 = vadd.f32 %v6738_v46, %v6807_v50 }
 0xd29   :  { %5602 = vpow2.f32 %v3508_v5 }
 0xd32   :  { %v5601_v12 = vpop.eup %5600 }
 0xd33   :  { %v2933_v59 = vadd.f32 1.0, %v5601_v12  ;;  %v5603_v11 = vpop.eup %5602 }
 0xd34   :  { %v2940_v62 = vadd.f32 1.0, %v5603_v11 }
 0xd35   :  { %5604 = vrcp.f32 %v2933_v59 }
 0xd36   :  { %5606 = vrcp.f32 %v2940_v62 }
 0xd3f   :  { %v5605_v17 = vpop.eup %5604 }
 0xd40   :  { %v2944_v31 = vmul.f32 %v5605_v17, %v2943_v15  ;;  %v5607_v4 = vpop.eup %5606 }
 0xd41   :  { %v2947_v36 = vsub.f32 1.0, %v5607_v4  ;;  %v2949_v43 = vmul.f32 %v5607_v4, %v6959_v9 }
 0xd42   :  { %v2945_v40 = vadd.f32 %v2944_v31, %v2065_v16 }
 0xd44   :  { %5608 = vtanh.f32 %v2945_v40 }
 0xd4e   :  { %v5609_v37 = vpop.eup %5608 }
 0xd4f   :  { %v2948_v1 = vmul.f32 %v5609_v37, %v2947_v36 }
 0xd51   :  { %v7008_v8 = vadd.f32 %v2949_v43, %v2948_v1 }
 0xd53   :  { %3509 = vst [vmem:[%s7118_s9 + $0x20] sm:$0xff] %v7008_v8  ;;  %3021 = vmatmul.mubr.f32.vlgmr.msra.gmra.mrb[26].mxu0 %v7008_v8  ;;  %4373 = vmatmul.mubr.f32.vlgmr.msra.gmra.mrb[42].mxu1 %v7008_v8 }
 0xd54   :  { %5304 = vmatpush1.bf16.msra.mxu0 %v6513_v30  ;;  %5335 = vmatpush3.bf16.msra.mxu1 %v6629_v39 }
 0xd55   :  { %5306 = vmatprep.subr.bf16.mxu0 %v6523_v27  ;;  %5336 = vmatprep.subr.bf16.mxu1 %v5642_v48 }
 0xd56   :  { %3188 = vmatprep.mubr.f32.mxu0 %v5641_v3  ;;  %4407 = vmatprep.mubr.msk.f32.mxu1 %vm5643_vm1, %v5641_v3 }
 0xd58   :  { %5308 = vmatpush1.bf16.msra.mxu0 %v6531_v22  ;;  %5338 = vmatpush3.bf16.msra.mxu1 %v6658_v20 }
 0xd59   :  { %5310 = vmatprep.subr.bf16.mxu0 %v6541_v33  ;;  %5339 = vmatprep.subr.bf16.mxu1 %v5642_v48 }
 0xd5c   :  { %5312 = vmatpush1.bf16.msra.mxu0 %v6549_v45  ;;  %5341 = vmatpush3.bf16.msra.mxu1 %v6673_v38 }
 0xd5d   :  { %5314 = vmatprep.subr.bf16.mxu0 %v6559_v56  ;;  %5342 = vmatprep.subr.bf16.mxu1 %v5642_v48 }
 0xd60   :  { %5316 = vmatpush1.bf16.msra.mxu0 %v6567_v2  ;;  %5344 = vmatpush3.bf16.msra.mxu1 %v6679_v25 }
 0xd61   :  { %5318 = vmatprep.subr.bf16.mxu0 %v6577_v14  ;;  %5345 = vmatprep.subr.bf16.mxu1 %v5642_v48 }
 0xd64   :  { %5320 = vmatpush1.bf16.msra.mxu0 %v6585_v26  ;;  %5347 = vmatpush3.bf16.msra.mxu1 %v6689_v23 }
 0xd65   :  { %5322 = vmatprep.subr.bf16.mxu0 %v6595_v57  ;;  %5348 = vmatprep.subr.bf16.mxu1 %v5642_v48 }
 0xd68   :  { %5324 = vmatpush1.bf16.msra.mxu0 %v6603_v60  ;;  %5350 = vmatpush3.bf16.msra.mxu1 %v6699_v42 }
 0xd69   :  { %5326 = vmatprep.subr.bf16.mxu0 %v6616_v47  ;;  %5351 = vmatprep.subr.bf16.mxu1 %v5642_v48 }
 0xd6c   :  { %5328 = vmatpush1.bf16.msra.mxu0 %v6627_v0  ;;  %5353 = vmatpush3.bf16.msra.mxu1 %v6709_v61 }
 0xd6d   :  { %5330 = vmatprep.subr.bf16.mxu0 %v6640_v7  ;;  %5354 = vmatprep.subr.bf16.mxu1 %v5642_v48 }
 0xd70   :  { %5332 = vmatpush1.bf16.msra.mxu0 %v6649_v13  ;;  %5356 = vmatpush3.bf16.msra.mxu1 %v6719_v10 }
 0xd71   :  { %5358 = vmatprep.subr.bf16.mxu0 %v6505_v54  ;;  %5389 = vmatprep.subr.bf16.mxu1 %v5642_v48 }
 0xe26   :  { %v3022_v24 = vpop.f32.mrb[26].mxu0  ;;  %v3093_v21 = vpop.f32.mrb[42].mxu1 }
 0xe27   :  { %v5439_v29 = vadd.f32 %v3022_v24, %v6792_v63  ;;  %v3024_v34 = vpop.f32.mrb[27].mxu0  ;;  %v4374_v32 = vpop.f32.mrb[43].mxu1  ;;  %v3111_v54 = vadd.f32 %v6803_v55, %v3093_v21  ;;  %v2080_v21 = vadd.f32 %v6786_v51, %v6807_v50 }
 0xe28   :  { %v5440_v28 = vadd.f32 %v3024_v34, %v6796_v19 }
 0xe29   :  { %v3510_v35 = vmul.f32 -1.442695, %v5439_v29 }
 0xe2a   :  { %v3511_v9 = vmul.f32 -1.442695, %v5440_v28 }
 0xe2b   :  { %5610 = vpow2.f32 %v3510_v35 }
 0xe2c   :  { %5612 = vpow2.f32 %v3511_v9 }
 0xe35   :  { %v5611_v18 = vpop.eup %5610 }
 0xe36   :  { %v3101_v41 = vadd.f32 1.0, %v5611_v18  ;;  %v5613_v49 = vpop.eup %5612 }
 0xe37   :  { %v3108_v52 = vadd.f32 1.0, %v5613_v49 }
 0xe38   :  { %5614 = vrcp.f32 %v3101_v41 }
 0xe39   :  { %5616 = vrcp.f32 %v3108_v52 }
 0xe42   :  { %v5615_v58 = vpop.eup %5614 }
 0xe43   :  { %v3112_v6 = vmul.f32 %v5615_v58, %v3111_v54  ;;  %v5617_v12 = vpop.eup %5616 }
 0xe44   :  { %v3115_v59 = vsub.f32 1.0, %v5617_v12  ;;  %v3117_v15 = vmul.f32 %v5617_v12, %v7008_v8 }
 0xe45   :  { %v3113_v5 = vadd.f32 %v3112_v6, %v2070_v44 }
 0xe47   :  { %5618 = vtanh.f32 %v3113_v5 }
 0xe51   :  { %v5619_v11 = vpop.eup %5618 }
 0xe52   :  { %v3116_v62 = vmul.f32 %v5619_v11, %v3115_v59 }
 0xe54   :  { %v3118_v17 = vadd.f32 %v3117_v15, %v3116_v62 }
 0xe56   :  { %3512 = vst [vmem:[%s7118_s9 + $0x28] sm:$0xff] %v3118_v17  ;;  %3189 = vmatmul.mubr.f32.vlgmr.msra.gmra.mrb[28].mxu0 %v3118_v17  ;;  %4408 = vmatmul.mubr.f32.vlgmr.msra.gmra.mrb[44].mxu1 %v3118_v17 }
 0xe57   :  { %5360 = vmatpush1.bf16.msra.mxu0 %v6513_v30  ;;  %5391 = vmatpush3.bf16.msra.mxu1 %v6629_v39 }
 0xe58   :  { %5362 = vmatprep.subr.bf16.mxu0 %v6523_v27  ;;  %5392 = vmatprep.subr.bf16.mxu1 %v5642_v48 }
 0xe59   :  { %3356 = vmatprep.mubr.f32.mxu0 %v5641_v3  ;;  %4442 = vmatprep.mubr.msk.f32.mxu1 %vm5643_vm1, %v5641_v3 }
 0xe5b   :  { %5364 = vmatpush1.bf16.msra.mxu0 %v6531_v22  ;;  %5394 = vmatpush3.bf16.msra.mxu1 %v6658_v20 }
 0xe5c   :  { %5366 = vmatprep.subr.bf16.mxu0 %v6541_v33  ;;  %5395 = vmatprep.subr.bf16.mxu1 %v5642_v48 }
 0xe5f   :  { %5368 = vmatpush1.bf16.msra.mxu0 %v6549_v45  ;;  %5397 = vmatpush3.bf16.msra.mxu1 %v6673_v38 }
 0xe60   :  { %5370 = vmatprep.subr.bf16.mxu0 %v6559_v56  ;;  %5398 = vmatprep.subr.bf16.mxu1 %v5642_v48 }
 0xe63   :  { %5372 = vmatpush1.bf16.msra.mxu0 %v6567_v2  ;;  %5400 = vmatpush3.bf16.msra.mxu1 %v6679_v25 }
 0xe64   :  { %5374 = vmatprep.subr.bf16.mxu0 %v6577_v14  ;;  %5401 = vmatprep.subr.bf16.mxu1 %v5642_v48 }
 0xe67   :  { %5376 = vmatpush1.bf16.msra.mxu0 %v6585_v26  ;;  %5403 = vmatpush3.bf16.msra.mxu1 %v6689_v23 }
 0xe68   :  { %5378 = vmatprep.subr.bf16.mxu0 %v6595_v57  ;;  %5404 = vmatprep.subr.bf16.mxu1 %v5642_v48 }
 0xe6b   :  { %5380 = vmatpush1.bf16.msra.mxu0 %v6603_v60  ;;  %5406 = vmatpush3.bf16.msra.mxu1 %v6699_v42 }
 0xe6c   :  { %5382 = vmatprep.subr.bf16.mxu0 %v6616_v47  ;;  %5407 = vmatprep.subr.bf16.mxu1 %v5642_v48 }
 0xe6f   :  { %5384 = vmatpush1.bf16.msra.mxu0 %v6627_v0  ;;  %5409 = vmatpush3.bf16.msra.mxu1 %v6709_v61  ;;  %v2075_v0 = vadd.f32 %v6788_v53, %v6807_v50 }
 0xe70   :  { %5386 = vmatprep.subr.bf16.mxu0 %v6640_v7  ;;  %5410 = vmatprep.subr.bf16.mxu1 %v5642_v48 }
 0xe73   :  { %5388 = vmatpush1.bf16.msra.mxu0 %v6649_v13  ;;  %5412 = vmatpush3.bf16.msra.mxu1 %v6719_v10 }
 0xf29   :  { %v3190_v3 = vpop.f32.mrb[28].mxu0  ;;  %v3261_v30 = vpop.f32.mrb[44].mxu1 }
 0xf2a   :  { %v5441_v27 = vadd.f32 %v3190_v3, %v6792_v63  ;;  %v3192_v22 = vpop.f32.mrb[29].mxu0  ;;  %v4409_v33 = vpop.f32.mrb[45].mxu1  ;;  %v3279_v60 = vadd.f32 %v6803_v55, %v3261_v30 }
 0xf2b   :  { %v5442_v56 = vadd.f32 %v3192_v22, %v6796_v19 }
 0xf2c   :  { %v3513_v45 = vmul.f32 -1.442695, %v5441_v27 }
 0xf2d   :  { %v3514_v2 = vmul.f32 -1.442695, %v5442_v56 }
 0xf2e   :  { %5620 = vpow2.f32 %v3513_v45 }
 0xf2f   :  { %5622 = vpow2.f32 %v3514_v2 }
 0xf38   :  { %v5621_v14 = vpop.eup %5620 }
 0xf39   :  { %v3269_v26 = vadd.f32 1.0, %v5621_v14  ;;  %v5623_v48 = vpop.eup %5622 }
 0xf3a   :  { %v3276_v57 = vadd.f32 1.0, %v5623_v48 }
 0xf3b   :  { %5624 = vrcp.f32 %v3269_v26 }
 0xf3c   :  { %5626 = vrcp.f32 %v3276_v57 }
 0xf45   :  { %v5625_v47 = vpop.eup %5624 }
 0xf46   :  { %v3280_v39 = vmul.f32 %v5625_v47, %v3279_v60  ;;  %v5627_v13 = vpop.eup %5626 }
 0xf47   :  { %v3283_v20 = vsub.f32 1.0, %v5627_v13  ;;  %v3285_v23 = vmul.f32 %v5627_v13, %v3118_v17 }
 0xf48   :  { %v3281_v7 = vadd.f32 %v3280_v39, %v2075_v0 }
 0xf4a   :  { %5628 = vtanh.f32 %v3281_v7 }
 0xf54   :  { %v5629_v38 = vpop.eup %5628 }
 0xf55   :  { %v3284_v25 = vmul.f32 %v5629_v38, %v3283_v20 }
 0xf57   :  { %v3286_v42 = vadd.f32 %v3285_v23, %v3284_v25 }
 0xf59   :  { %3515 = vst [vmem:[%s7118_s9 + $0x30] sm:$0xff] %v3286_v42  ;;  %3357 = vmatmul.mubr.f32.vlgmr.msra.gmra.mrb[30].mxu0 %v3286_v42  ;;  %4443 = vmatmul.mubr.f32.vlgmr.msra.gmra.mrb[46].mxu1 %v3286_v42 }
0x102c   :  { %v3358_v61 = vpop.f32.mrb[30].mxu0  ;;  %v3429_v10 = vpop.f32.mrb[46].mxu1 }
0x102d   :  { %v5443_v46 = vadd.f32 %v3358_v61, %v6792_v63  ;;  %v3360_v53 = vpop.f32.mrb[31].mxu0  ;;  %v4444_v16 = vpop.f32.mrb[47].mxu1  ;;  %v3447_v8 = vadd.f32 %v6803_v55, %v3429_v10 }
0x102e   :  { %v5444_v40 = vadd.f32 %v3360_v53, %v6796_v19 }
0x102f   :  { %v3516_v31 = vmul.f32 -1.442695, %v5443_v46 }
0x1030   :  { %v3517_v4 = vmul.f32 -1.442695, %v5444_v40 }
0x1031   :  { %5630 = vpow2.f32 %v3516_v31 }
0x1032   :  { %5632 = vpow2.f32 %v3517_v4 }
0x103b   :  { %v5631_v36 = vpop.eup %5630 }
0x103c   :  { %v3437_v37 = vadd.f32 1.0, %v5631_v36  ;;  %v5633_v1 = vpop.eup %5632 }
0x103d   :  { %v3444_v43 = vadd.f32 1.0, %v5633_v1 }
0x103e   :  { %5634 = vrcp.f32 %v3437_v37 }
0x103f   :  { %5636 = vrcp.f32 %v3444_v43 }
0x1048   :  { %v5635_v24 = vpop.eup %5634 }
0x1049   :  { %v3448_v63 = vmul.f32 %v5635_v24, %v3447_v8  ;;  %v5637_v34 = vpop.eup %5636 }
0x104a   :  { %v3451_v19 = vsub.f32 1.0, %v5637_v34  ;;  %v3453_v28 = vmul.f32 %v5637_v34, %v3286_v42 }
0x104b   :  { %v3449_v29 = vadd.f32 %v3448_v63, %v2080_v21 }
0x104d   :  { %5638 = vtanh.f32 %v3449_v29 }
0x1057   :  { %v5639_v32 = vpop.eup %5638 }
0x1058   :  { %v3452_v35 = vmul.f32 %v5639_v32, %v3451_v19 }
0x105a   :  { %v3454_v9 = vadd.f32 %v3453_v28, %v3452_v35 }
0x105c   :  { %3518 = vst [vmem:[%s7118_s9 + $0x38] sm:$0xff] %v3454_v9 }

</bundles_post_ra>
